<compile_context>
chip_gen: v7x
topology: tpu7x:2x2x1
jax: 0.10.0
libtpu: 0.0.40
codegen_flags: <defaults>
</compile_context>

<pallas_src>
import functools

import jax
import jax.numpy as jnp
from jax import lax
from jax.experimental import pallas as pl
from jax.experimental.pallas import tpu as pltpu

NEG_SLOPE = 0.01  # nn.LeakyReLU default negative_slope
LANE = 128


def _leaky(x):
    return jnp.where(x > 0, x, NEG_SLOPE * x)


def _round_up(x, m):
    return (x + m - 1) // m * m


def _cdiv(a, b):
    return (a + b - 1) // b


def bottleneck_kernel(mask_ref, x_ref, w1_ref, b1_ref, w2_ref, b2_ref,
                      w3_ref, b3_ref, o_ref, t1buf_ref, *, Hs, W_pad):
    """One (batch, row-strip) per grid step.

    x_ref   : ((Hs+2)*W_pad, Cp_in) bf16 - strip rows + 1-image-row halo.
    mask_ref: ((Hs+2)*W_pad, 1)     f32  - 1.0 on real image pixels, else 0.
    o_ref   : (Hs*W_pad, Cp_out)    bf16 - output rows of this strip.
    """
    Ls = Hs * W_pad

    # ---- conv1 (1x1) + folded bn1 + LeakyReLU over the halo window ----
    t1 = jnp.dot(x_ref[...], w1_ref[...], preferred_element_type=jnp.float32)
    # One validity-mask multiply: zeroes image-border rows and pad columns so
    # conv2 sees true zero padding and the width-tap rolls need no edge masks.
    t1 = _leaky(t1 + b1_ref[...]) * mask_ref[...]
    t1buf_ref[...] = t1
    # TODO(synk): keep t1buf in bf16 once bf16 sublane rolls are confirmed to
    #             lower cleanly; halves scratch reload + roll vreg traffic.

    # ---- conv2 (3x3, pad=1): 9 accumulated MXU matmuls, value accumulator ----
    acc = None
    for kh in range(3):
        rows = t1buf_ref[pl.ds(kh * W_pad, Ls), :]     # aligned (Ls, Cg) f32
        for kw in range(3):
            dw = kw - 1
            if dw == 0:
                win = rows
            else:
                # win[i] = rows[i + dw]; width edges land on zeroed pad
                # columns / zero halo rows, so no per-tap mask is needed.
                win = pltpu.roll(rows, shift=(-dw) % Ls, axis=0)
            contrib = jnp.dot(win.astype(jnp.bfloat16), w2_ref[kh * 3 + kw],
                              preferred_element_type=jnp.float32)
            acc = contrib if acc is None else acc + contrib
    # TODO(synk): on v5e/v6e benchmark a fused K=9*Cg matmul (persistent K-slab)
    #             against these 9 K=Cg dots (MRF pop amortization).

    # ---- bn2 + LeakyReLU, conv3 (1x1) + bn3 + residual + LeakyReLU ----
    t2 = _leaky(acc + b2_ref[...])
    t3 = jnp.dot(t2.astype(jnp.bfloat16), w3_ref[...],
                 preferred_element_type=jnp.float32) + b3_ref[...]
    res = x_ref[pl.ds(W_pad, Ls), :].astype(jnp.float32)   # downsample=None
    o_ref[...] = _leaky(t3 + res).astype(o_ref.dtype)


def pack_for_kernel(params, Cin):
    """Fold BN scales into conv weights, pad channels to 128, bf16-cast."""
    w1, s1, b1, w2, s2, b2, w3, s3, b3 = params
    Cg, Cout = w1.shape[1], w3.shape[1]
    Cp_in, Cp_g, Cp_out = (_round_up(Cin, LANE), _round_up(Cg, LANE),
                           _round_up(Cout, LANE))

    w1f = w1 * s1                 # (Cin, Cg) * (1, Cg)
    w2f = w2 * s2[0]              # (3,3,Cg,Cg) * (Cg,)  output-channel scale
    w3f = w3 * s3                 # (Cg, Cout) * (1, Cout)

    w1p = jnp.zeros((Cp_in, Cp_g), jnp.float32).at[:Cin, :Cg].set(w1f)
    w2p = jnp.zeros((3, 3, Cp_g, Cp_g), jnp.float32).at[:, :, :Cg, :Cg].set(w2f)
    w3p = jnp.zeros((Cp_g, Cp_out), jnp.float32).at[:Cg, :Cout].set(w3f)
    w2t = w2p.reshape(9, Cp_g, Cp_g)          # tap index t = kh*3 + kw

    b1p = jnp.zeros((1, Cp_g), jnp.float32).at[:, :Cg].set(b1)
    b2p = jnp.zeros((1, Cp_g), jnp.float32).at[:, :Cg].set(b2)
    b3p = jnp.zeros((1, Cp_out), jnp.float32).at[:, :Cout].set(b3)

    return (w1p.astype(jnp.bfloat16), b1p,
            w2t.astype(jnp.bfloat16), b2p,
            w3p.astype(jnp.bfloat16), b3p,
            Cp_in, Cp_g, Cp_out, Cout)


def bottleneck_forward(x_nhwc, params, row_strip=None):
    N, H, W, Cin = x_nhwc.shape
    (w1p, b1p, w2t, b2p, w3p, b3p,
     Cp_in, Cp_g, Cp_out, Cout) = pack_for_kernel(params, Cin)
    assert Cin == Cout, "downsample=None requires inplanes == planes*4"
    assert Cp_in == Cp_out

    # Row-padded lane-dense layout: W -> W_pad (>= W+1, multiple of 8) so all
    # sublane slices are aligned and the zero pad column handles width edges.
    W_pad = _round_up(W + 1, 8)

    # Row-strip grid axis: each step handles Hs image rows (+1-row halo).
    if row_strip is None:
        n_strips = max(1, _cdiv(H, max(1, 2048 // W_pad)))
        Hs = _cdiv(H, n_strips)
    else:
        Hs = max(1, min(row_strip, H))
    n_strips = _cdiv(H, Hs)
    H_pad = n_strips * Hs
    Lw = (Hs + 2) * W_pad        # window rows per step (strip + halo)
    Ls = Hs * W_pad              # output rows per step

    # bf16 activations in HBM (halves the dominant DMA term).  One zero
    # image-row above/below, zero pad columns / channel lanes.
    xpad = jnp.zeros((N, H_pad + 2, W_pad, Cp_in), jnp.bfloat16)
    xpad = xpad.at[:, 1:H + 1, :W, :Cin].set(x_nhwc.astype(jnp.bfloat16))
    xflat = xpad.reshape(N, (H_pad + 2) * W_pad, Cp_in)
    # Overlapping 1-row-halo strips (duplicates only 2/Hs of the rows in HBM).
    x_strips = jnp.stack(
        [xflat[:, s * Ls:s * Ls + Lw, :] for s in range(n_strips)], axis=1)

    # Per-strip validity mask (1.0 on real image pixels).
    rows_ok = (jnp.arange(H_pad + 2) >= 1) & (jnp.arange(H_pad + 2) <= H)
    cols_ok = jnp.arange(W_pad) < W
    mask_full = (rows_ok[:, None] & cols_ok[None, :]).astype(jnp.float32)
    mask_full = mask_full.reshape((H_pad + 2) * W_pad, 1)
    mask_strips = jnp.stack(
        [mask_full[s * Ls:s * Ls + Lw, :] for s in range(n_strips)], axis=0)

    # Explicit scoped-VMEM budget (v5e default is only 16 MiB; keep <=56 MiB
    # so it also fits v7x's 64 MiB physical VMEM).
    est = (2 * (Lw * Cp_in * 2 + Ls * Cp_out * 2 + Lw * 4)          # x/out/mask
           + 4 * (Cp_in * Cp_g + 9 * Cp_g * Cp_g + Cp_g * Cp_out)   # weights x2
           + Lw * Cp_g * 4                                          # t1 scratch
           + 8 * Ls * Cp_g * 4)                                     # transients
    vmem_limit = int(min(max(32 << 20, 3 * est // 2), 56 << 20))

    kernel = functools.partial(bottleneck_kernel, Hs=Hs, W_pad=W_pad)
    out_p = pl.pallas_call(
        kernel,
        out_shape=jax.ShapeDtypeStruct((N, n_strips, Ls, Cp_out), jnp.bfloat16),
        grid_spec=pltpu.PrefetchScalarGridSpec(
            num_scalar_prefetch=0,
            grid=(N, n_strips),
            in_specs=[
                pl.BlockSpec((None, Lw, 1), lambda n, s: (s, 0, 0)),         # mask
                pl.BlockSpec((None, None, Lw, Cp_in),
                             lambda n, s: (n, s, 0, 0)),                     # x
                pl.BlockSpec((Cp_in, Cp_g), lambda n, s: (0, 0)),            # w1
                pl.BlockSpec((1, Cp_g), lambda n, s: (0, 0)),                # b1
                pl.BlockSpec((9, Cp_g, Cp_g), lambda n, s: (0, 0, 0)),       # w2 taps
                pl.BlockSpec((1, Cp_g), lambda n, s: (0, 0)),                # b2
                pl.BlockSpec((Cp_g, Cp_out), lambda n, s: (0, 0)),           # w3
                pl.BlockSpec((1, Cp_out), lambda n, s: (0, 0)),              # b3
            ],
            out_specs=pl.BlockSpec((None, None, Ls, Cp_out),
                                   lambda n, s: (n, s, 0, 0)),
            scratch_shapes=[pltpu.VMEM((Lw, Cp_g), jnp.float32)],
        ),
        compiler_params=pltpu.CompilerParams(
            dimension_semantics=("parallel", "parallel"),
            vmem_limit_bytes=vmem_limit),
    )(mask_strips, x_strips, w1p, b1p, w2t, b2p, w3p, b3p)

    out = out_p.reshape(N, H_pad, W_pad, Cp_out)[:, :H, :W, :Cout]
    return out.astype(jnp.float32)


# ----------------------------- host-side setup -----------------------------

def fold_bn(gamma, beta, mean, var, eps=1e-5):
    scale = gamma / jnp.sqrt(var + eps)
    bias = beta - mean * scale
    return (scale.reshape(1, -1).astype(jnp.float32),
            bias.reshape(1, -1).astype(jnp.float32))


def make_params(key, inplanes, planes, bottleneck_width=64, cardinality=1):
    group_width = int(planes * (bottleneck_width / 64.0)) * cardinality
    cout = planes * 4
    ks = jax.random.split(key, 6)
    w1 = jax.random.normal(ks[0], (inplanes, group_width), jnp.float32) * 0.1
    w2 = jax.random.normal(ks[1], (3, 3, group_width, group_width), jnp.float32) * 0.1
    w3 = jax.random.normal(ks[2], (group_width, cout), jnp.float32) * 0.1

    def bn(k, c):
        k1, k2, k3, k4 = jax.random.split(k, 4)
        gamma = 1.0 + 0.1 * jax.random.normal(k1, (c,), jnp.float32)
        beta = 0.1 * jax.random.normal(k2, (c,), jnp.float32)
        mean = 0.1 * jax.random.normal(k3, (c,), jnp.float32)
        var = jnp.abs(jax.random.normal(k4, (c,), jnp.float32)) + 0.5
        return fold_bn(gamma, beta, mean, var)

    s1, b1 = bn(ks[3], group_width)
    s2, b2 = bn(ks[4], group_width)
    s3, b3 = bn(ks[5], cout)
    return (w1, s1, b1, w2, s2, b2, w3, s3, b3)


def ref_forward(x_nhwc, params):
    """Plain-JAX f32 reference (same math as the PyTorch eval-mode forward)."""
    w1, s1, b1, w2, s2, b2, w3, s3, b3 = params
    t1 = _leaky(jnp.einsum('nhwc,cd->nhwd', x_nhwc, w1) * s1[0] + b1[0])
    t2 = lax.conv_general_dilated(
        t1, w2, (1, 1), 'SAME', dimension_numbers=('NHWC', 'HWIO', 'NHWC'))
    t2 = _leaky(t2 * s2[0] + b2[0])
    t3 = jnp.einsum('nhwc,cd->nhwd', t2, w3) * s3[0] + b3[0]
    return _leaky(t3 + x_nhwc)


if __name__ == "__main__":
    key = jax.random.PRNGKey(0)
    k_x, k_p = jax.random.split(key)

    # inplanes must equal planes*4 because downsample=None (residual add).
    N, inplanes, H, W = 2, 16, 16, 16
    planes = 4

    x_nchw = jax.random.normal(k_x, (N, inplanes, H, W), jnp.float32)
    x_nhwc = jnp.transpose(x_nchw, (0, 2, 3, 1))   # kernel works in NHWC

    params = make_params(k_p, inplanes, planes)

    # row_strip=6 exercises the multi-strip path including an uneven remainder
    # (n_strips=3, H_pad=18 > H=16) and the W -> W_pad column padding.
    out = bottleneck_forward(x_nhwc, params, row_strip=6)
    out = jax.block_until_ready(out)

    ref = ref_forward(x_nhwc, params)
    assert out.shape == (N, H, W, planes * 4)
    # bf16 matmul inputs / bf16 activation I/O (f32 accumulation) -> loosened
    # tolerance vs the f32 reference.
    assert jnp.allclose(out, ref, atol=3e-2, rtol=3e-2), "mismatch vs reference"

    print("KERNEL_OK")
</pallas_src>

<mosaic_0001>
module attributes {stable_mosaic.version = 11 : i64} {
  func.func @bottleneck_kernel(%arg0: i32, %arg1: i32, %arg2: memref<1x192x1xf32, #tpu.memory_space<vmem>>, %arg3: memref<1x1x192x128xbf16, #tpu.memory_space<vmem>>, %arg4: memref<128x128xbf16, #tpu.memory_space<vmem>>, %arg5: memref<1x128xf32, #tpu.memory_space<vmem>>, %arg6: memref<9x128x128xbf16, #tpu.memory_space<vmem>>, %arg7: memref<1x128xf32, #tpu.memory_space<vmem>>, %arg8: memref<128x128xbf16, #tpu.memory_space<vmem>>, %arg9: memref<1x128xf32, #tpu.memory_space<vmem>>, %arg10: memref<1x1x144x128xbf16, #tpu.memory_space<vmem>>, %arg11: memref<192x128xf32, #tpu.memory_space<vmem>>) attributes {dimension_semantics = [#tpu.dimension_semantics<parallel>, #tpu.dimension_semantics<parallel>], iteration_bounds = array<i64: 2, 3>, scalar_prefetch = 0 : i64, scratch_operands = 1 : i64, tpu.core_type = #tpu.core_type<tc>, window_params = [{transform_indices = @transform_0, window_bounds = array<i64: 1, 192, 1>}, {transform_indices = @transform_1, window_bounds = array<i64: 1, 1, 192, 128>}, {pipeline_mode = #tpu.pipeline_mode<synchronous>, transform_indices = @transform_2, window_bounds = array<i64: 128, 128>}, {pipeline_mode = #tpu.pipeline_mode<synchronous>, transform_indices = @transform_3, window_bounds = array<i64: 1, 128>}, {pipeline_mode = #tpu.pipeline_mode<synchronous>, transform_indices = @transform_4, window_bounds = array<i64: 9, 128, 128>}, {pipeline_mode = #tpu.pipeline_mode<synchronous>, transform_indices = @transform_5, window_bounds = array<i64: 1, 128>}, {pipeline_mode = #tpu.pipeline_mode<synchronous>, transform_indices = @transform_6, window_bounds = array<i64: 128, 128>}, {pipeline_mode = #tpu.pipeline_mode<synchronous>, transform_indices = @transform_7, window_bounds = array<i64: 1, 128>}, {transform_indices = @transform_8, window_bounds = array<i64: 1, 1, 144, 128>}]} {
    %c0 = arith.constant 0 : index
    %c0_0 = arith.constant 0 : index
    %c0_1 = arith.constant 0 : index
    %c0_2 = arith.constant 0 : index
    %0 = vector.load %arg3[%c0, %c0_0, %c0_1, %c0_2] : memref<1x1x192x128xbf16, #tpu.memory_space<vmem>>, vector<1x1x192x128xbf16>
    %1 = vector.shape_cast %0 : vector<1x1x192x128xbf16> to vector<192x128xbf16>
    %c0_3 = arith.constant 0 : index
    %c0_4 = arith.constant 0 : index
    %2 = vector.load %arg4[%c0_3, %c0_4] : memref<128x128xbf16, #tpu.memory_space<vmem>>, vector<128x128xbf16>
    %cst = arith.constant dense<0.000000e+00> : vector<192x128xf32>
    %3 = tpu.matmul %1, %2, %cst {dimension_numbers = #tpu.dot_dimension_numbers<[1], [0], [0], [1], [0, 0, 1, 1], [], []>} : vector<192x128xbf16>, vector<128x128xbf16>, vector<192x128xf32> -> vector<192x128xf32>
    %c0_5 = arith.constant 0 : index
    %c0_6 = arith.constant 0 : index
    %4 = vector.load %arg5[%c0_5, %c0_6] : memref<1x128xf32, #tpu.memory_space<vmem>>, vector<1x128xf32>
    %5 = vector.broadcast %4 : vector<1x128xf32> to vector<192x128xf32>
    %6 = arith.addf %3, %5 : vector<192x128xf32>
    %cst_7 = arith.constant 0.000000e+00 : f32
    %7 = vector.broadcast %cst_7 : f32 to vector<192x128xf32>
    %8 = arith.cmpf ogt, %6, %7 : vector<192x128xf32>
    %cst_8 = arith.constant 0.00999999977 : f32
    %9 = vector.broadcast %cst_8 : f32 to vector<192x128xf32>
    %10 = arith.mulf %9, %6 : vector<192x128xf32>
    %11 = arith.select %8, %6, %10 : vector<192x128xi1>, vector<192x128xf32>
    %c0_9 = arith.constant 0 : index
    %c0_10 = arith.constant 0 : index
    %c0_11 = arith.constant 0 : index
    %12 = vector.load %arg2[%c0_9, %c0_10, %c0_11] : memref<1x192x1xf32, #tpu.memory_space<vmem>>, vector<1x192x1xf32>
    %13 = vector.shape_cast %12 : vector<1x192x1xf32> to vector<192x1xf32>
    %14 = vector.broadcast %13 : vector<192x1xf32> to vector<192x128xf32>
    %15 = arith.mulf %11, %14 : vector<192x128xf32>
    %c0_12 = arith.constant 0 : index
    %c0_13 = arith.constant 0 : index
    %16 = vector.load %arg11[%c0_12, %c0_13] : memref<192x128xf32, #tpu.memory_space<vmem>>, vector<192x128xf32>
    tpu.vector_store %arg11[%c0_12, %c0_13], %15 {strides = array<i32>} : memref<192x128xf32, #tpu.memory_space<vmem>>, vector<192x128xf32>,
    %c0_14 = arith.constant 0 : index
    %c0_15 = arith.constant 0 : index
    %17 = vector.load %arg11[%c0_14, %c0_15] : memref<192x128xf32, #tpu.memory_space<vmem>>, vector<144x128xf32>
    %c1_i32 = arith.constant 1 : i32
    %18 = tpu.dynamic_rotate %17 by %c1_i32 dim 0 : vector<144x128xf32>, i32 -> vector<144x128xf32>
    %19 = arith.truncf %18 : vector<144x128xf32> to vector<144x128xbf16>
    %c0_16 = arith.constant 0 : index
    %c0_17 = arith.constant 0 : index
    %c0_18 = arith.constant 0 : index
    %20 = vector.load %arg6[%c0_16, %c0_17, %c0_18] : memref<9x128x128xbf16, #tpu.memory_space<vmem>>, vector<1x128x128xbf16>
    %21 = vector.shape_cast %20 : vector<1x128x128xbf16> to vector<128x128xbf16>
    %cst_19 = arith.constant dense<0.000000e+00> : vector<144x128xf32>
    %22 = tpu.matmul %19, %21, %cst_19 {dimension_numbers = #tpu.dot_dimension_numbers<[1], [0], [0], [1], [0, 0, 1, 1], [], []>} : vector<144x128xbf16>, vector<128x128xbf16>, vector<144x128xf32> -> vector<144x128xf32>
    %23 = arith.truncf %17 : vector<144x128xf32> to vector<144x128xbf16>
    %c1 = arith.constant 1 : index
    %c0_20 = arith.constant 0 : index
    %c0_21 = arith.constant 0 : index
    %24 = vector.load %arg6[%c1, %c0_20, %c0_21] : memref<9x128x128xbf16, #tpu.memory_space<vmem>>, vector<1x128x128xbf16>
    %25 = vector.shape_cast %24 : vector<1x128x128xbf16> to vector<128x128xbf16>
    %cst_22 = arith.constant dense<0.000000e+00> : vector<144x128xf32>
    %26 = tpu.matmul %23, %25, %cst_22 {dimension_numbers = #tpu.dot_dimension_numbers<[1], [0], [0], [1], [0, 0, 1, 1], [], []>} : vector<144x128xbf16>, vector<128x128xbf16>, vector<144x128xf32> -> vector<144x128xf32>
    %27 = arith.addf %22, %26 : vector<144x128xf32>
    %c143_i32 = arith.constant 143 : i32
    %28 = tpu.dynamic_rotate %17 by %c143_i32 dim 0 : vector<144x128xf32>, i32 -> vector<144x128xf32>
    %29 = arith.truncf %28 : vector<144x128xf32> to vector<144x128xbf16>
    %c2 = arith.constant 2 : index
    %c0_23 = arith.constant 0 : index
    %c0_24 = arith.constant 0 : index
    %30 = vector.load %arg6[%c2, %c0_23, %c0_24] : memref<9x128x128xbf16, #tpu.memory_space<vmem>>, vector<1x128x128xbf16>
    %31 = vector.shape_cast %30 : vector<1x128x128xbf16> to vector<128x128xbf16>
    %cst_25 = arith.constant dense<0.000000e+00> : vector<144x128xf32>
    %32 = tpu.matmul %29, %31, %cst_25 {dimension_numbers = #tpu.dot_dimension_numbers<[1], [0], [0], [1], [0, 0, 1, 1], [], []>} : vector<144x128xbf16>, vector<128x128xbf16>, vector<144x128xf32> -> vector<144x128xf32>
    %33 = arith.addf %27, %32 : vector<144x128xf32>
    %c24 = arith.constant 24 : index
    %c0_26 = arith.constant 0 : index
    %34 = vector.load %arg11[%c24, %c0_26] : memref<192x128xf32, #tpu.memory_space<vmem>>, vector<144x128xf32>
    %c1_i32_27 = arith.constant 1 : i32
    %35 = tpu.dynamic_rotate %34 by %c1_i32_27 dim 0 : vector<144x128xf32>, i32 -> vector<144x128xf32>
    %36 = arith.truncf %35 : vector<144x128xf32> to vector<144x128xbf16>
    %c3 = arith.constant 3 : index
    %c0_28 = arith.constant 0 : index
    %c0_29 = arith.constant 0 : index
    %37 = vector.load %arg6[%c3, %c0_28, %c0_29] : memref<9x128x128xbf16, #tpu.memory_space<vmem>>, vector<1x128x128xbf16>
    %38 = vector.shape_cast %37 : vector<1x128x128xbf16> to vector<128x128xbf16>
    %cst_30 = arith.constant dense<0.000000e+00> : vector<144x128xf32>
    %39 = tpu.matmul %36, %38, %cst_30 {dimension_numbers = #tpu.dot_dimension_numbers<[1], [0], [0], [1], [0, 0, 1, 1], [], []>} : vector<144x128xbf16>, vector<128x128xbf16>, vector<144x128xf32> -> vector<144x128xf32>
    %40 = arith.addf %33, %39 : vector<144x128xf32>
    %41 = arith.truncf %34 : vector<144x128xf32> to vector<144x128xbf16>
    %c4 = arith.constant 4 : index
    %c0_31 = arith.constant 0 : index
    %c0_32 = arith.constant 0 : index
    %42 = vector.load %arg6[%c4, %c0_31, %c0_32] : memref<9x128x128xbf16, #tpu.memory_space<vmem>>, vector<1x128x128xbf16>
    %43 = vector.shape_cast %42 : vector<1x128x128xbf16> to vector<128x128xbf16>
    %cst_33 = arith.constant dense<0.000000e+00> : vector<144x128xf32>
    %44 = tpu.matmul %41, %43, %cst_33 {dimension_numbers = #tpu.dot_dimension_numbers<[1], [0], [0], [1], [0, 0, 1, 1], [], []>} : vector<144x128xbf16>, vector<128x128xbf16>, vector<144x128xf32> -> vector<144x128xf32>
    %45 = arith.addf %40, %44 : vector<144x128xf32>
    %c143_i32_34 = arith.constant 143 : i32
    %46 = tpu.dynamic_rotate %34 by %c143_i32_34 dim 0 : vector<144x128xf32>, i32 -> vector<144x128xf32>
    %47 = arith.truncf %46 : vector<144x128xf32> to vector<144x128xbf16>
    %c5 = arith.constant 5 : index
    %c0_35 = arith.constant 0 : index
    %c0_36 = arith.constant 0 : index
    %48 = vector.load %arg6[%c5, %c0_35, %c0_36] : memref<9x128x128xbf16, #tpu.memory_space<vmem>>, vector<1x128x128xbf16>
    %49 = vector.shape_cast %48 : vector<1x128x128xbf16> to vector<128x128xbf16>
    %cst_37 = arith.constant dense<0.000000e+00> : vector<144x128xf32>
    %50 = tpu.matmul %47, %49, %cst_37 {dimension_numbers = #tpu.dot_dimension_numbers<[1], [0], [0], [1], [0, 0, 1, 1], [], []>} : vector<144x128xbf16>, vector<128x128xbf16>, vector<144x128xf32> -> vector<144x128xf32>
    %51 = arith.addf %45, %50 : vector<144x128xf32>
    %c48 = arith.constant 48 : index
    %c0_38 = arith.constant 0 : index
    %52 = vector.load %arg11[%c48, %c0_38] : memref<192x128xf32, #tpu.memory_space<vmem>>, vector<144x128xf32>
    %c1_i32_39 = arith.constant 1 : i32
    %53 = tpu.dynamic_rotate %52 by %c1_i32_39 dim 0 : vector<144x128xf32>, i32 -> vector<144x128xf32>
    %54 = arith.truncf %53 : vector<144x128xf32> to vector<144x128xbf16>
    %c6 = arith.constant 6 : index
    %c0_40 = arith.constant 0 : index
    %c0_41 = arith.constant 0 : index
    %55 = vector.load %arg6[%c6, %c0_40, %c0_41] : memref<9x128x128xbf16, #tpu.memory_space<vmem>>, vector<1x128x128xbf16>
    %56 = vector.shape_cast %55 : vector<1x128x128xbf16> to vector<128x128xbf16>
    %cst_42 = arith.constant dense<0.000000e+00> : vector<144x128xf32>
    %57 = tpu.matmul %54, %56, %cst_42 {dimension_numbers = #tpu.dot_dimension_numbers<[1], [0], [0], [1], [0, 0, 1, 1], [], []>} : vector<144x128xbf16>, vector<128x128xbf16>, vector<144x128xf32> -> vector<144x128xf32>
    %58 = arith.addf %51, %57 : vector<144x128xf32>
    %59 = arith.truncf %52 : vector<144x128xf32> to vector<144x128xbf16>
    %c7 = arith.constant 7 : index
    %c0_43 = arith.constant 0 : index
    %c0_44 = arith.constant 0 : index
    %60 = vector.load %arg6[%c7, %c0_43, %c0_44] : memref<9x128x128xbf16, #tpu.memory_space<vmem>>, vector<1x128x128xbf16>
    %61 = vector.shape_cast %60 : vector<1x128x128xbf16> to vector<128x128xbf16>
    %cst_45 = arith.constant dense<0.000000e+00> : vector<144x128xf32>
    %62 = tpu.matmul %59, %61, %cst_45 {dimension_numbers = #tpu.dot_dimension_numbers<[1], [0], [0], [1], [0, 0, 1, 1], [], []>} : vector<144x128xbf16>, vector<128x128xbf16>, vector<144x128xf32> -> vector<144x128xf32>
    %63 = arith.addf %58, %62 : vector<144x128xf32>
    %c143_i32_46 = arith.constant 143 : i32
    %64 = tpu.dynamic_rotate %52 by %c143_i32_46 dim 0 : vector<144x128xf32>, i32 -> vector<144x128xf32>
    %65 = arith.truncf %64 : vector<144x128xf32> to vector<144x128xbf16>
    %c8 = arith.constant 8 : index
    %c0_47 = arith.constant 0 : index
    %c0_48 = arith.constant 0 : index
    %66 = vector.load %arg6[%c8, %c0_47, %c0_48] : memref<9x128x128xbf16, #tpu.memory_space<vmem>>, vector<1x128x128xbf16>
    %67 = vector.shape_cast %66 : vector<1x128x128xbf16> to vector<128x128xbf16>
    %cst_49 = arith.constant dense<0.000000e+00> : vector<144x128xf32>
    %68 = tpu.matmul %65, %67, %cst_49 {dimension_numbers = #tpu.dot_dimension_numbers<[1], [0], [0], [1], [0, 0, 1, 1], [], []>} : vector<144x128xbf16>, vector<128x128xbf16>, vector<144x128xf32> -> vector<144x128xf32>
    %69 = arith.addf %63, %68 : vector<144x128xf32>
    %c0_50 = arith.constant 0 : index
    %c0_51 = arith.constant 0 : index
    %70 = vector.load %arg7[%c0_50, %c0_51] : memref<1x128xf32, #tpu.memory_space<vmem>>, vector<1x128xf32>
    %71 = vector.broadcast %70 : vector<1x128xf32> to vector<144x128xf32>
    %72 = arith.addf %69, %71 : vector<144x128xf32>
    %cst_52 = arith.constant 0.000000e+00 : f32
    %73 = vector.broadcast %cst_52 : f32 to vector<144x128xf32>
    %74 = arith.cmpf ogt, %72, %73 : vector<144x128xf32>
    %cst_53 = arith.constant 0.00999999977 : f32
    %75 = vector.broadcast %cst_53 : f32 to vector<144x128xf32>
    %76 = arith.mulf %75, %72 : vector<144x128xf32>
    %77 = arith.select %74, %72, %76 : vector<144x128xi1>, vector<144x128xf32>
    %78 = arith.truncf %77 : vector<144x128xf32> to vector<144x128xbf16>
    %c0_54 = arith.constant 0 : index
    %c0_55 = arith.constant 0 : index
    %79 = vector.load %arg8[%c0_54, %c0_55] : memref<128x128xbf16, #tpu.memory_space<vmem>>, vector<128x128xbf16>
    %cst_56 = arith.constant dense<0.000000e+00> : vector<144x128xf32>
    %80 = tpu.matmul %78, %79, %cst_56 {dimension_numbers = #tpu.dot_dimension_numbers<[1], [0], [0], [1], [0, 0, 1, 1], [], []>} : vector<144x128xbf16>, vector<128x128xbf16>, vector<144x128xf32> -> vector<144x128xf32>
    %c0_57 = arith.constant 0 : index
    %c0_58 = arith.constant 0 : index
    %81 = vector.load %arg9[%c0_57, %c0_58] : memref<1x128xf32, #tpu.memory_space<vmem>>, vector<1x128xf32>
    %82 = vector.broadcast %81 : vector<1x128xf32> to vector<144x128xf32>
    %83 = arith.addf %80, %82 : vector<144x128xf32>
    %c0_59 = arith.constant 0 : index
    %c0_60 = arith.constant 0 : index
    %c24_61 = arith.constant 24 : index
    %c0_62 = arith.constant 0 : index
    %84 = vector.load %arg3[%c0_59, %c0_60, %c24_61, %c0_62] : memref<1x1x192x128xbf16, #tpu.memory_space<vmem>>, vector<1x1x144x128xbf16>
    %85 = vector.shape_cast %84 : vector<1x1x144x128xbf16> to vector<144x128xbf16>
    %86 = arith.extf %85 : vector<144x128xbf16> to vector<144x128xf32>
    %87 = arith.addf %83, %86 : vector<144x128xf32>
    %cst_63 = arith.constant 0.000000e+00 : f32
    %88 = vector.broadcast %cst_63 : f32 to vector<144x128xf32>
    %89 = arith.cmpf ogt, %87, %88 : vector<144x128xf32>
    %cst_64 = arith.constant 0.00999999977 : f32
    %90 = vector.broadcast %cst_64 : f32 to vector<144x128xf32>
    %91 = arith.mulf %90, %87 : vector<144x128xf32>
    %92 = arith.select %89, %87, %91 : vector<144x128xi1>, vector<144x128xf32>
    %93 = arith.truncf %92 : vector<144x128xf32> to vector<144x128xbf16>
    %c0_65 = arith.constant 0 : index
    %c0_66 = arith.constant 0 : index
    %c0_67 = arith.constant 0 : index
    %c0_68 = arith.constant 0 : index
    %94 = vector.load %arg10[%c0_65, %c0_66, %c0_67, %c0_68] : memref<1x1x144x128xbf16, #tpu.memory_space<vmem>>, vector<1x1x144x128xbf16>
    %95 = vector.shape_cast %94 : vector<1x1x144x128xbf16> to vector<144x128xbf16>
    %96 = vector.shape_cast %93 : vector<144x128xbf16> to vector<1x1x144x128xbf16>
    tpu.vector_store %arg10[%c0_65, %c0_66, %c0_67, %c0_68], %96 {strides = array<i32>} : memref<1x1x144x128xbf16, #tpu.memory_space<vmem>>, vector<1x1x144x128xbf16>,
    return
  }
  func.func @transform_0(%arg0: i32, %arg1: i32) -> (i32, i32, i32) {
    %c0_i32 = arith.constant 0 : i32
    %c0_i32_0 = arith.constant 0 : i32
    %c0_i32_1 = arith.constant 0 : i32
    return %arg1, %c0_i32, %c0_i32_0 : i32, i32, i32
  }
  func.func @transform_1(%arg0: i32, %arg1: i32) -> (i32, i32, i32, i32) {
    %c0_i32 = arith.constant 0 : i32
    %c0_i32_0 = arith.constant 0 : i32
    %c0_i32_1 = arith.constant 0 : i32
    return %arg0, %arg1, %c0_i32, %c0_i32_0 : i32, i32, i32, i32
  }
  func.func @transform_2(%arg0: i32, %arg1: i32) -> (i32, i32) {
    %c0_i32 = arith.constant 0 : i32
    %c0_i32_0 = arith.constant 0 : i32
    %c0_i32_1 = arith.constant 0 : i32
    return %c0_i32, %c0_i32_0 : i32, i32
  }
  func.func @transform_3(%arg0: i32, %arg1: i32) -> (i32, i32) {
    %c0_i32 = arith.constant 0 : i32
    %c0_i32_0 = arith.constant 0 : i32
    %c0_i32_1 = arith.constant 0 : i32
    return %c0_i32, %c0_i32_0 : i32, i32
  }
  func.func @transform_4(%arg0: i32, %arg1: i32) -> (i32, i32, i32) {
    %c0_i32 = arith.constant 0 : i32
    %c0_i32_0 = arith.constant 0 : i32
    %c0_i32_1 = arith.constant 0 : i32
    %c0_i32_2 = arith.constant 0 : i32
    return %c0_i32, %c0_i32_0, %c0_i32_1 : i32, i32, i32
  }
  func.func @transform_5(%arg0: i32, %arg1: i32) -> (i32, i32) {
    %c0_i32 = arith.constant 0 : i32
    %c0_i32_0 = arith.constant 0 : i32
    %c0_i32_1 = arith.constant 0 : i32
    return %c0_i32, %c0_i32_0 : i32, i32
  }
  func.func @transform_6(%arg0: i32, %arg1: i32) -> (i32, i32) {
    %c0_i32 = arith.constant 0 : i32
    %c0_i32_0 = arith.constant 0 : i32
    %c0_i32_1 = arith.constant 0 : i32
    return %c0_i32, %c0_i32_0 : i32, i32
  }
  func.func @transform_7(%arg0: i32, %arg1: i32) -> (i32, i32) {
    %c0_i32 = arith.constant 0 : i32
    %c0_i32_0 = arith.constant 0 : i32
    %c0_i32_1 = arith.constant 0 : i32
    return %c0_i32, %c0_i32_0 : i32, i32
  }
  func.func @transform_8(%arg0: i32, %arg1: i32) -> (i32, i32, i32, i32) {
    %c0_i32 = arith.constant 0 : i32
    %c0_i32_0 = arith.constant 0 : i32
    %c0_i32_1 = arith.constant 0 : i32
    return %arg0, %arg1, %c0_i32, %c0_i32_0 : i32, i32, i32, i32
  }
}

</mosaic_0001>

<bundles_post_ra>
// kernel: tpu_custom_call.1
= control target key start
LH: loop header
LB: loop body
LE: loop exit
PB: predicated region body
PF: predicated region fallthrough
CT: control target
= control target key end

     0   :  { %13 = vsyncpa [#allocation4], 0  ;;  %s6714_s0 = inlined_call_operand.vmem [shape: f32[3,192,1], index: 0, kind: input, shape index: {}]   ;;  %s6715_s1 = inlined_call_operand.vmem [shape: bf16[2,3,192,128], index: 1, kind: input, shape index: {}]   ;;  %s6716_s2 = inlined_call_operand.hbm [shape: bf16[128,128], index: 2, kind: input, shape index: {}]   ;;  %s6717_s3 = inlined_call_operand.vmem [shape: f32[1,128], index: 3, kind: input, shape index: {}]   ;;  %s6718_s4 = inlined_call_operand.hbm [shape: bf16[9,128,128], index: 4, kind: input, shape index: {}]   ;;  %s6719_s5 = inlined_call_operand.vmem [shape: f32[1,128], index: 5, kind: input, shape index: {}]   ;;  %s6720_s6 = inlined_call_operand.hbm [shape: bf16[128,128], index: 6, kind: input, shape index: {}]   ;;  %s6721_s7 = inlined_call_operand.vmem [shape: f32[1,128], index: 7, kind: input, shape index: {}]   ;;  %s6722_s8 = inlined_call_operand.hbm [shape: bf16[2,3,144,128], index: 8, kind: output, shape index: {}]  }
   0x1   :  { %14 = vsyncpa [#allocation7], 0 }
   0x2   :  { %15 = vsyncpa [#allocation5], 0 }
   0x3   :  { %17 = vsyncpa [#allocation5 + $0x1], 0  ;;  %s5048_s27 = smov 0   ;;  %s5050_s28 = smov 0  }
   0x4   :  { %s5052_s29 = smov 0   ;;  %s5054_s30 = smov 0  }
   0x5   :  { %s5056_s9 = smov 0   ;;  %s5058_s10 = smov 0  }
   0x6   :  { %s5060_s11 = smov 0   ;;  %s5062_s12 = smov 0  }
   0x7 LB: > { %6778 = sst [smem:[#allocation13_spill]] %s4962_s27  ;;  %s3573_s13 = sadd.s32 4294967295, %s4990_s12   ;;  %s4990_s12 = sphi %s5062_s12, %s23_s12   ;;  %s4986_s11 = sphi %s5060_s11, %s6928_s11   ;;  %s4982_s10 = sphi %s5058_s10, %s6927_s10   ;;  %s4978_s9 = sphi %s5056_s9, %s6926_s9   ;;  %s4974_s30 = sphi %s5054_s30, %s6925_s30   ;;  %s4970_s29 = sphi %s5052_s29, %s6924_s29   ;;  %s4966_s28 = sphi %s5050_s28, %s6930_s28   ;;  %s4962_s27 = sphi %s5048_s27, %s6929_s27  }
   0x8   : > { %6779 = sst [smem:[#allocation14_spill]] %s4970_s29  ;;  %s3574_s14 = sadd.s32 4294967294, %s4990_s12  }
   0x9   : > { %6780 = sst [smem:[#allocation15_spill]] %s4982_s10  ;;  %s32_s15 = sadd.s32 1, %s4982_s10 }
   0xa   : > { %6781 = sst [smem:[#allocation16_spill]] %s4986_s11  ;;  %s35_s16 = sadd.s32 1, %s4986_s11 }
   0xb   : > { %6782 = sst [smem:[#allocation17_spill]] %s4990_s12  ;;  %p33_p0 = scmp.ge.s32.totalorder %s32_s15, 3 }
   0xc   : > { %s224_s17 = sadd.s32 1, %s4970_s29  ;;  %p234_p1 = scmp.ne.s32.totalorder %s4970_s29, %s4966_s28 }
   0xd   : > { %p235_p2 = scmp.eq.s32.totalorder %s3573_s13, 5  ;;  %s6932_s15 = smov (%p33_p0, %s32_s15), 0 }
   0xe   : > { %6783 = sst [smem:[#allocation18_spill]] %s6932_s15  ;;  %s6934_s16 = smov (!%p33_p0, %s35_s16), %s4986_s11 }
   0xf   : > { %s220_s18 = ssub.s32 %s4982_s10, %s6932_s15  ;;  %p5100_p3 = por %p235_p2, %p234_p1 }
  0x10   : > { %p37_p4 = scmp.ge.s32.totalorder %s6934_s16, 2  ;;  %p240_p5 = scmp.ne.s32.totalorder %s4966_s28, %s4962_s27 }
  0x11   : > { %s6784_s19 = scalar_select %p5100_p3, 1, 0 }
  0x12   : > { %p241_p6 = scmp.eq.s32.totalorder %s3574_s14, 5  ;;  %p3575_p7 = scmp.ge.s32.totalorder %s4990_s12, 1 }
  0x13   : > { %s6936_s16 = smov (%p37_p4, %s6934_s16), 0  ;;  %p248_p9 = scmp.lt.s32.totalorder %s4990_s12, 7 }
  0x14   : > { %6785 = sst [smem:[#allocation19_spill]] %s6936_s16  ;;  %p5109_p8 = por %p241_p6, %p240_p5 }
  0x15   : > { %s219_s21 = ssub.s32 %s4986_s11, %s6936_s16  ;;  %p5116_p10 = pnand %p3575_p7, %p248_p9 }
  0x16   : > { %s6786_s20 = scalar_select %p5109_p8, 1, 0 }
  0x17   : > { %s221_s22 = sor.u32 %s220_s18, %s219_s21  ;;  %p5120_p12 = scmp.eq.s32.totalorder %s3573_s13, 0 }
  0x18   : > { %6787 = sst [smem:[#allocation20_spill]] %s6786_s20  ;;  %p222_p11 = scmp.eq.s32.totalorder %s221_s22, 0 }
  0x19   : > { %s6788_s23 = scalar_select %p5116_p10, 1, 0 }
  0x1a   : > { %s6789_s24 = scalar_select %p5120_p12, 1, 0 }
  0x1b   : > { %p4607_p13 = pneg %p5116_p10  ;;  %s4992_s14 = smov [#allocation6]  }
  0x1c   : > { %s5127_s25 = scalar_select %p222_p11, %s4970_s29, %s224_s17  }
  0x1d   : > { %p5131_p0 = pnand %p5120_p12, %p4607_p13  ;;  %s276_s18 = sshll.u32 %s4992_s14, 4  ;;  %s277_s18 = int_to_ptr.vmem [resolvable:$true] %s276_s18 }
  0x1e   : > { %6790 = sst [smem:[#allocation21_spill]] %s5127_s25  ;;  %s4804_s13 = scalar_lea.hbm %s6718_s4, 9216 }
  0x1f   : > { %p4805_p1 = scmp.ne.s32.totalorder %s6718_s4, %s4804_s13  ;;  %p5143_p2 = pneg %p5131_p0 }
  0x20   : > { %p4811_p6 = scmp.lt.u32.totalorder %s4804_s13, %s6718_s4 }
  0x21   : > { %p4807_p4 = pnand %p5143_p2, %p4805_p1 }
  0x23   : > { %p4808_p5 = pneg %p4807_p4 }
  0x25   : > { %p4813_p7 = pnand %p4811_p6, %p4808_p5 }
  0x27   : > { %4816 = shalt.err (!%p4813_p7)
}
  0x28   : > { %s4817_s21 = scalar_lea.vmem %s277_s18, 9216  ;;  %p4825_p8 = scmp.lt.s32.totalorder %s277_s18, %s277_s18 }
  0x29   : > { %p4818_p9 = scmp.ne.s32.totalorder %s277_s18, %s4817_s21  ;;  %p4826_p3 = scmp.lt.s32.totalorder %s4817_s21, %s4817_s21 }
  0x2b   : > { %p4820_p11 = pnand %p4818_p9, %p5143_p2  ;;  %p4827_p12 = por %p4826_p3, %p4825_p8 }
  0x2d   : > { %p4821_p13 = pneg %p4820_p11 }
  0x2f   : > { %p4828_p10 = pnand %p4827_p12, %p4821_p13 }
  0x31   : > { %4831 = shalt.err (!%p4828_p10)
}
  0x32   : > { %s4993_s15 = smov 64   ;;  %s4994_s16 = smov 4  }
  0x33   : > { %4613 = dma.hbm_to_vmem [thread:$0]  (!%p5131_p0), %s6718_s4, 9216, %s277_s18, [#allocation7], %s4993_s15, %s4993_s15, %s4994_s16  }
  0x34   : > { %s4995_s13 = smov [#allocation3]   ;;  %s4996_s10 = smov [#allocation8]  }
  0x35   : > { %s260_s14 = sshll.u32 %s4995_s13, 4  ;;  %s292_s25 = sshll.u32 %s4996_s10, 4  ;;  %s261_s14 = int_to_ptr.vmem [resolvable:$true] %s260_s14  ;;  %s5162_s25 = int_to_ptr.vmem [resolvable:$true] %s292_s25 }
  0x36   : > { %s4832_s20 = scalar_lea.hbm %s6716_s2, 1024 }
  0x37   : > { %p4833_p3 = scmp.ne.s32.totalorder %s6716_s2, %s4832_s20  ;;  %p4839_p12 = scmp.lt.u32.totalorder %s4832_s20, %s6716_s2 }
  0x39   : > { %p4835_p8 = pnand %p4833_p3, %p5143_p2 }
  0x3b   : > { %p4836_p10 = pneg %p4835_p8 }
  0x3d   : > { %p4841_p1 = pnand %p4839_p12, %p4836_p10 }
  0x3f   : > { %4844 = shalt.err (!%p4841_p1)
}
  0x40   : > { %s4845_s10 = scalar_lea.vmem %s261_s14, 1024  ;;  %p4853_p7 = scmp.lt.s32.totalorder %s261_s14, %s261_s14 }
  0x41   : > { %p4846_p4 = scmp.ne.s32.totalorder %s261_s14, %s4845_s10  ;;  %p4854_p9 = scmp.lt.s32.totalorder %s4845_s10, %s4845_s10 }
  0x43   : > { %p4848_p5 = pnand %p4846_p4, %p5143_p2  ;;  %p4855_p11 = por %p4854_p9, %p4853_p7 }
  0x45   : > { %p4849_p6 = pneg %p4848_p5 }
  0x47   : > { %p4856_p13 = pnand %p4855_p11, %p4849_p6 }
  0x49   : > { %4859 = shalt.err (!%p4856_p13)
}
  0x4a   : > { %4610 = dma.hbm_to_vmem [thread:$0]  (!%p5131_p0), %s6716_s2, 1024, %s261_s14, [#allocation4], %s4993_s15, %s4993_s15, %s4994_s16  }
  0x4b   : > { %s4860_s22 = scalar_lea.hbm %s6720_s6, 1024 }
  0x4c   : > { %p4861_p3 = scmp.ne.s32.totalorder %s6720_s6, %s4860_s22  ;;  %p4867_p12 = scmp.lt.u32.totalorder %s4860_s22, %s6720_s6 }
  0x4e   : > { %p4863_p8 = pnand %p4861_p3, %p5143_p2 }
  0x50   : > { %p4864_p10 = pneg %p4863_p8 }
  0x52   : > { %p4869_p1 = pnand %p4867_p12, %p4864_p10 }
  0x54   : > { %4872 = shalt.err (!%p4869_p1)
}
  0x55   : > { %s4873_s14 = scalar_lea.vmem %s5162_s25, 1024  ;;  %p4881_p7 = scmp.lt.s32.totalorder %s5162_s25, %s5162_s25 }
  0x56   : > { %p4874_p4 = scmp.ne.s32.totalorder %s5162_s25, %s4873_s14  ;;  %p4882_p9 = scmp.lt.s32.totalorder %s4873_s14, %s4873_s14 }
  0x58   : > { %p4876_p5 = pnand %p4874_p4, %p5143_p2  ;;  %p4883_p11 = por %p4882_p9, %p4881_p7 }
  0x5a   : > { %p4877_p6 = pneg %p4876_p5 }
  0x5c   : > { %p4884_p13 = pnand %p4883_p11, %p4877_p6 }
  0x5e   : > { %4887 = shalt.err (!%p4884_p13)
}
  0x5f   : > { %4616 = dma.hbm_to_vmem [thread:$0]  (!%p5131_p0), %s6720_s6, 1024, %s5162_s25, [#allocation7], %s4993_s15, %s4993_s15, %s4994_s16  }
  0x60   : > { %p6793_p3 = scmp.ne.s32.totalorder %s6788_s23, 0 }
  0x62   : > { %331 = sbr.rel (%p6793_p3) target bundleno = 1183 (0x49f), region = 52 }
  0x69   : > { %p6794_p2 = scmp.ne.s32.totalorder %s6789_s24, 0 }
  0x6b   : > { %4949 = dma.done.wait (%p6794_p2), [#allocation4], 1024  }
  0x6c   : > { %4951 = vsyncadd (%p6794_p2), [#allocation4], 4294966272 }
  0x6d   : > { %4953 = dma.done.wait (%p6794_p2), [#allocation7], 10240  }
  0x6e   : > { %4955 = vsyncadd (%p6794_p2), [#allocation7], 4294957056  ;;  %p382_p0 = scmp.lt.s32.totalorder %s4974_s30, 2  ;;  %p387_p8 = scmp.lt.s32.totalorder %s4978_s9, 1  ;;  %v4997_v0 = vmov 0   ;;  %v4704_v1 = vld [vmem:[#allocation3] sm:$0xff]  }
  0x6f   : > { %4702 = vset.pattern.permute.xlu0 %v4997_v0  ;;  %4703 = vset.pattern.permute.xlu1 %v4997_v0  ;;  %v4705_v2 = vld [vmem:[#allocation3 + $0x8] sm:$0xff]   ;;  %v4706_v3 = vld [vmem:[#allocation3 + $0x10] sm:$0xff]   ;;  %v4707_v4 = vld [vmem:[#allocation3 + $0x18] sm:$0xff]   ;;  %v6739_v26 = vmov 0.0   ;;  %vm4999_vm0 = vmmov 0   ;;  %p6918_p12 = scmp.ne.s32.totalorder %s6784_s19, 0 }
  0x70   : > { %s383_s23 = scalar_select %p382_p0, %s4974_s30, 2  ;;  %4011 = vmatprep.subr.bf16.mxu0 %v4704_v1  ;;  %v4708_v6 = vld [vmem:[#allocation3 + $0x20] sm:$0xff]   ;;  %v4709_v7 = vld [vmem:[#allocation3 + $0x28] sm:$0xff]   ;;  %v4710_v8 = vld [vmem:[#allocation3 + $0x30] sm:$0xff]   ;;  %4051 = vmatprep.subr.bf16.mxu1 %v6739_v26 }
  0x71   : > { %s388_s25 = scalar_select %p387_p8, %s4978_s9, 1  ;;  %4012 = vmatpush3.bf16.msra.mxu0 %v4704_v1  ;;  %v4711_v13 = vld [vmem:[#allocation3 + $0x38] sm:$0xff]   ;;  %v4724_v29 = vld [vmem:[#allocation6 + $0x40] sm:$0xff]   ;;  %v4725_v33 = vld [vmem:[#allocation6 + $0x48] sm:$0xff]   ;;  %4067 = vmatprep.mubr.msk.bf16.mxu1 %vm4999_vm0, %v6739_v26 }
  0x72   : > { %s4589_s26 = smul.u32 24, %s383_s23  ;;  %4013 = vmatprep.subr.bf16.mxu0 %v4705_v2  ;;  %4052 = vmatpush3.bf16.msra.mxu1 %v4724_v29  ;;  %v4726_v37 = vld [vmem:[#allocation6 + $0x50] sm:$0xff]   ;;  %v4727_v41 = vld [vmem:[#allocation6 + $0x58] sm:$0xff]   ;;  %v4728_v45 = vld [vmem:[#allocation6 + $0x60] sm:$0xff]  }
  0x73   : > { %s4590_s17 = smul.u32 72, %s388_s25  ;;  %4053 = vmatprep.subr.bf16.mxu1 %v6739_v26  ;;  %v4729_v51 = vld [vmem:[#allocation6 + $0x68] sm:$0xff]   ;;  %v4730_v52 = vld [vmem:[#allocation6 + $0x70] sm:$0xff]   ;;  %v4731_v53 = vld [vmem:[#allocation6 + $0x78] sm:$0xff]   ;;  %s379_s25 = sand.u32 1, %s4966_s28  }
  0x74   : > { %s4588_s20 = smul.u32 192, %s383_s23  ;;  %v4733_v54 = vld [vmem:[#allocation6] sm:$0xff]   ;;  %v4734_v55 = vld [vmem:[#allocation6 + $0x8] sm:$0xff]   ;;  %v4736_v56 = vld [vmem:[#allocation6 + $0x10] sm:$0xff]   ;;  %s6662_s22 = scalar_lea.sflag [#allocation5], %s379_s25 }
  0x75   : > { %s393_s15 = sadd.s32 %s4590_s17, %s4589_s26  ;;  %4014 = vmatpush3.bf16.msra.mxu0 %v4705_v2  ;;  %v4737_v57 = vld [vmem:[#allocation6 + $0x18] sm:$0xff]   ;;  %v4739_v58 = vld [vmem:[#allocation6 + $0x20] sm:$0xff]   ;;  %v4740_v59 = vld [vmem:[#allocation6 + $0x28] sm:$0xff]   ;;  %s4587_s26 = smul.u32 72, %s379_s25 }
  0x76   : > { %s3585_s16 = sshll.u32 %s393_s15, 2  ;;  %4015 = vmatprep.subr.bf16.mxu0 %v4706_v3  ;;  %s5234_s21 = scalar_lea.vmem %s6714_s0, %s4588_s20  ;;  %4054 = vmatpush3.bf16.msra.mxu1 %v4725_v33  ;;  %v4742_v60 = vld [vmem:[#allocation6 + $0x30] sm:$0xff]   ;;  %v4743_v61 = vld [vmem:[#allocation6 + $0x38] sm:$0xff]  }
  0x77   : > { %s5228_s12 = scalar_lea.vmem %s6715_s1, %s3585_s16  ;;  %v765_v9 = vld [vmem:[%s5234_s21] sm:$0xff]  ;;  %v767_v10 = vld [vmem:[%s5234_s21 + $0x10] sm:$0xff]  ;;  %v766_v11 = vld [vmem:[%s5234_s21 + $0x8] sm:$0xff]  ;;  %4055 = vmatprep.subr.bf16.mxu1 %v6739_v26  ;;  %s6618_s17 = scalar_lea.vmem [#allocation9], %s4587_s26 }
  0x78   : > { %v4712_v5 = vld [vmem:[%s5228_s12] sm:$0xff]   ;;  %791 = vperm.xlu0 %4702, %v765_v9   ;;  %801 = vperm.xlu1 %4703, %v767_v10   ;;  %v768_v12 = vld [vmem:[%s5234_s21 + $0x18] sm:$0xff]  ;;  %v770_v15 = vld [vmem:[%s5234_s21 + $0x28] sm:$0xff]  ;;  %s4591_s15 = smul.u32 18, %s4974_s30 }
  0x79   : > { %4027 = vmatprep.mubr.bf16.mxu0 %v4712_v5  ;;  %4016 = vmatpush3.bf16.msra.mxu0 %v4706_v3  ;;  %v769_v14 = vld [vmem:[%s5234_s21 + $0x20] sm:$0xff]  ;;  %v4713_v16 = vld [vmem:[%s5228_s12 + $0x8] sm:$0xff]   ;;  %v771_v17 = vld [vmem:[%s5234_s21 + $0x30] sm:$0xff]  ;;  %s4592_s16 = smul.u32 54, %s4978_s9  ;;  %s3445_s9 = sshll.u32 %s6618_s17, 4  ;;  %s6652_s9 = int_to_ptr.vmem [resolvable:$true] %s3445_s9 }
  0x7a   : > { %4017 = vmatprep.subr.bf16.mxu0 %v4707_v4  ;;  %v772_v18 = vld [vmem:[%s5234_s21 + $0x38] sm:$0xff]  ;;  %v4714_v19 = vld [vmem:[%s5228_s12 + $0x10] sm:$0xff]   ;;  %v773_v20 = vld [vmem:[%s5234_s21 + $0x40] sm:$0xff]  ;;  %4056 = vmatpush3.bf16.msra.mxu1 %v4726_v37  ;;  %s4888_s13 = scalar_lea.vmem %s6652_s9, 1152 }
  0x7b   : > { %v774_v21 = vld [vmem:[%s5234_s21 + $0x48] sm:$0xff]  ;;  %v4715_v22 = vld [vmem:[%s5228_s12 + $0x18] sm:$0xff]   ;;  %v775_v23 = vld [vmem:[%s5234_s21 + $0x50] sm:$0xff]  ;;  %4057 = vmatprep.subr.bf16.mxu1 %v6739_v26  ;;  %s3442_s30 = sadd.s32 %s4592_s16, %s4591_s15  ;;  %p4889_p10 = scmp.ne.s32.totalorder %s6652_s9, %s4888_s13 }
  0x7c   : > { %796 = vperm.xlu0 %4702, %v766_v11   ;;  %806 = vperm.xlu1 %4703, %v768_v12   ;;  %v776_v24 = vld [vmem:[%s5234_s21 + $0x58] sm:$0xff]  ;;  %v4716_v25 = vld [vmem:[%s5228_s12 + $0x20] sm:$0xff]   ;;  %v778_v28 = vld [vmem:[%s5234_s21 + $0x68] sm:$0xff]  ;;  %s3707_s24 = sshll.u32 %s3442_s30, 6 }
  0x7d   : > { %4018 = vmatpush3.bf16.msra.mxu0 %v4707_v4  ;;  %v777_v27 = vld [vmem:[%s5234_s21 + $0x60] sm:$0xff]  ;;  %v4717_v30 = vld [vmem:[%s5228_s12 + $0x28] sm:$0xff]   ;;  %v779_v31 = vld [vmem:[%s5234_s21 + $0x70] sm:$0xff]  ;;  %s6657_s20 = scalar_lea.hbm %s6722_s8, %s3707_s24  ;;  %p4890_p1 = pnand %p4889_p10, %p6918_p12 }
  0x7e   : > { %4019 = vmatprep.subr.bf16.mxu0 %v4708_v6  ;;  %v780_v32 = vld [vmem:[%s5234_s21 + $0x78] sm:$0xff]  ;;  %v4718_v34 = vld [vmem:[%s5228_s12 + $0x30] sm:$0xff]   ;;  %v781_v35 = vld [vmem:[%s5234_s21 + $0x80] sm:$0xff]  ;;  %4058 = vmatpush3.bf16.msra.mxu1 %v4727_v41 }
  0x7f   : > { %v782_v36 = vld [vmem:[%s5234_s21 + $0x88] sm:$0xff]  ;;  %v4719_v38 = vld [vmem:[%s5228_s12 + $0x38] sm:$0xff]   ;;  %v785_v39 = vld [vmem:[%s5234_s21 + $0xa0] sm:$0xff]  ;;  %4059 = vmatprep.subr.bf16.mxu1 %v6739_v26  ;;  %p4891_p4 = pneg %p4890_p1 }
  0x80   : > { %811 = vperm.xlu0 %4702, %v769_v14   ;;  %816 = vperm.xlu1 %4703, %v770_v15   ;;  %v783_v40 = vld [vmem:[%s5234_s21 + $0x90] sm:$0xff]  ;;  %v4720_v42 = vld [vmem:[%s5228_s12 + $0x40] sm:$0xff]   ;;  %v784_v43 = vld [vmem:[%s5234_s21 + $0x98] sm:$0xff] }
  0x81   : > { %4020 = vmatpush3.bf16.msra.mxu0 %v4708_v6  ;;  %v788_v44 = vld [vmem:[%s5234_s21 + $0xb8] sm:$0xff]  ;;  %v4721_v46 = vld [vmem:[%s5228_s12 + $0x48] sm:$0xff]   ;;  %v787_v48 = vld [vmem:[%s5234_s21 + $0xb0] sm:$0xff] }
  0x82   : > { %4021 = vmatprep.subr.bf16.mxu0 %v4709_v7  ;;  %4060 = vmatpush3.bf16.msra.mxu1 %v4728_v45  ;;  %v786_v47 = vld [vmem:[%s5234_s21 + $0xa8] sm:$0xff]  ;;  %v4722_v49 = vld [vmem:[%s5228_s12 + $0x50] sm:$0xff]   ;;  %v4723_v50 = vld [vmem:[%s5228_s12 + $0x58] sm:$0xff]   ;;  %s5000_s21 = smov [#allocation9]  }
  0x83   : > { %4061 = vmatprep.subr.bf16.mxu1 %v6739_v26  ;;  %v5302_v6 = vld [vmem:[%s6717_s3] ss:$0 sm:$0xff]  ;;  %s4892_s11 = sshll.u32 %s5000_s21, 4  ;;  %s4893_s11 = int_to_ptr.vmem [resolvable:$false] %s4892_s11 }
  0x84   : > { %821 = vperm.xlu0 %4702, %v771_v17   ;;  %826 = vperm.xlu1 %4703, %v772_v18   ;;  %s4894_s18 = scalar_lea.vmem %s4893_s11, 2304  ;;  %p4895_p5 = scmp.lt.s32.totalorder %s6652_s9, %s4893_s11 }
  0x85   : > { %4022 = vmatpush3.bf16.msra.mxu0 %v4709_v7  ;;  %v993_v7 = vlaneseq  ;;  %p4896_p6 = scmp.lt.s32.totalorder %s4894_s18, %s4888_s13 }
  0x86   : > { %4023 = vmatprep.subr.bf16.mxu0 %v4710_v8  ;;  %4062 = vmatpush3.bf16.msra.mxu1 %v4729_v51 }
  0x87   : > { %4063 = vmatprep.subr.bf16.mxu1 %v6739_v26  ;;  %v5311_v18 = vshrl.u32 %v993_v7, 7  ;;  %p4897_p7 = por %p4896_p6, %p4895_p5 }
  0x88   : > { %831 = vperm.xlu0 %4702, %v773_v20   ;;  %836 = vperm.xlu1 %4703, %v774_v21  }
  0x89   : > { %4024 = vmatpush3.bf16.msra.mxu0 %v4710_v8  ;;  %vm995_vm5 = vcmp.lt.s32.totalorder %v5311_v18, 1  ;;  %vm1389_vm6 = vcmp.lt.s32.totalorder %v5311_v18, 7  ;;  %v4749_v18 = vld [vmem:[#allocation6 + $0x100] sm:$0xff]   ;;  %p4898_p9 = pnand %p4897_p7, %p4891_p4 }
  0x8a   : > { %4025 = vmatprep.subr.bf16.mxu0 %v4711_v13  ;;  %4064 = vmatpush3.bf16.msra.mxu1 %v4730_v52 }
  0x8b   : > { %4065 = vmatprep.subr.bf16.mxu1 %v6739_v26 }
  0x8c   : > { %841 = vperm.xlu0 %4702, %v775_v23   ;;  %846 = vperm.xlu1 %4703, %v776_v24  }
  0x8d   : > { %4026 = vmatpush3.bf16.msra.mxu0 %v4711_v13 }
  0x8e   : > { %4103 = vmatprep.subr.bf16.mxu0 %v6739_v26  ;;  %4066 = vmatpush3.bf16.msra.mxu1 %v4731_v53  ;;  %v4732_v53 = vld [vmem:[#allocation6 + $0x80] sm:$0xff]  }
  0x8f   : > { %4155 = vmatprep.subr.bf16.mxu1 %v6739_v26 }
  0x90   : > { %4028 = vmatmul.mubr.bf16.vlgmr.msra.gmra.mrb[0].mxu0 %v4713_v16  ;;  %851 = vperm.xlu0 %4702, %v777_v27  }
  0x91   : > { %4031 = vmatprep.mubr.bf16.mxu0 %v4714_v19  ;;  %856 = vperm.xlu1 %4703, %v778_v28  }
  0x92   : > { %4104 = vmatpush3.bf16.msra.mxu0 %v4733_v54 }
  0x93   : > { %4105 = vmatprep.subr.bf16.mxu0 %v6739_v26 }
  0x94   : > { %861 = vperm.xlu0 %4702, %v779_v31  }
  0x95   : > { %866 = vperm.xlu1 %4703, %v780_v32  }
  0x96   : > { %4106 = vmatpush3.bf16.msra.mxu0 %v4734_v55 }
  0x97   : > { %4107 = vmatprep.subr.bf16.mxu0 %v6739_v26 }
  0x98   : > { %4032 = vmatmul.mubr.bf16.gmra.mrb[4].mxu0 %v4715_v22  ;;  %871 = vperm.xlu0 %4702, %v781_v35  }
  0x99   : > { %4035 = vmatprep.mubr.bf16.mxu0 %v4716_v25  ;;  %876 = vperm.xlu1 %4703, %v782_v36  }
  0x9a   : > { %4108 = vmatpush3.bf16.msra.mxu0 %v4736_v56 }
  0x9b   : > { %4109 = vmatprep.subr.bf16.mxu0 %v6739_v26 }
  0x9c   : > { %891 = vperm.xlu0 %4702, %v785_v39  }
  0x9d   : > { %881 = vperm.xlu1 %4703, %v783_v40  }
  0x9e   : > { %4110 = vmatpush3.bf16.msra.mxu0 %v4737_v57 }
  0x9f   : > { %4111 = vmatprep.subr.bf16.mxu0 %v6739_v26 }
  0xa0   : > { %4036 = vmatmul.mubr.bf16.gmra.mrb[8].mxu0 %v4717_v30  ;;  %886 = vperm.xlu0 %4702, %v784_v43  }
  0xa1   : > { %4039 = vmatprep.mubr.bf16.mxu0 %v4718_v34  ;;  %906 = vperm.xlu1 %4703, %v788_v44  }
  0xa2   : > { %4112 = vmatpush3.bf16.msra.mxu0 %v4739_v58 }
  0xa3   : > { %4113 = vmatprep.subr.bf16.mxu0 %v6739_v26 }
  0xa4   : > { %896 = vperm.xlu0 %4702, %v786_v47  }
  0xa5   : > { %901 = vperm.xlu1 %4703, %v787_v48  }
  0xa6   : > { %4114 = vmatpush3.bf16.msra.mxu0 %v4740_v59 }
  0xa7   : > { %4115 = vmatprep.subr.bf16.mxu0 %v6739_v26 }
  0xa8   : > { %4040 = vmatmul.mubr.bf16.gmra.mrb[12].mxu0 %v4719_v38 }
  0xa9   : > { %4043 = vmatprep.mubr.bf16.mxu0 %v4720_v42 }
  0xaa   : > { %4116 = vmatpush3.bf16.msra.mxu0 %v4742_v60 }
  0xab   : > { %4117 = vmatprep.subr.bf16.mxu0 %v6739_v26 }
  0xae   : > { %4118 = vmatpush3.bf16.msra.mxu0 %v4743_v61 }
  0xaf   : > { %4207 = vmatprep.subr.bf16.mxu0 %v6739_v26 }
  0xb0   : > { %4044 = vmatmul.mubr.bf16.gmra.mrb[16].mxu0 %v4721_v46 }
  0xb1   : > { %4047 = vmatprep.mubr.bf16.mxu0 %v4722_v49 }
  0xb8   : > { %4048 = vmatmul.mubr.bf16.gmra.mrb[20].mxu0 %v4723_v50 }
  0xb9   : > { %4119 = vmatprep.mubr.msk.bf16.mxu0 %vm4999_vm0, %v6739_v26 }
  0xf7   : > { %v792_v62 = vpop.permute.xlu0 %791  ;;  %v802_v63 = vpop.permute.xlu1 %801 }
  0xfb   : > { %v797_v0 = vpop.permute.xlu0 %796  ;;  %v807_v1 = vpop.permute.xlu1 %806 }
  0xff   : > { %v5293_v2 = vpop.permute.xlu0 %811  ;;  %v5295_v3 = vpop.permute.xlu1 %816 }
 0x103   : > { %v822_v4 = vpop.permute.xlu0 %821  ;;  %v5297_v5 = vpop.permute.xlu1 %826 }
 0x107   : > { %v5305_v11 = vpop.permute.xlu0 %831  ;;  %v5308_v14 = vpop.permute.xlu1 %836 }
 0x10b   : > { %v5320_v29 = vpop.permute.xlu0 %841  ;;  %v5326_v35 = vpop.permute.xlu1 %846 }
 0x10f   : > { %v5354_v58 = vpop.permute.xlu0 %851 }
 0x163   : > { %v4029_v8 = vpop.f32.mrb[0].mxu0 }
 0x164   : > { %v607_v9 = vadd.f32 %v4029_v8, %v5302_v6  ;;  %v598_v10 = vpop.f32.mrb[1].mxu0 }
 0x165   : > { %v599_v12 = vadd.f32 %v5302_v6, %v598_v10  ;;  %v4030_v13 = vpop.f32.mrb[2].mxu0 }
 0x166   : > { %vm695_vm1 = vcmp.gt.f32.partialorder %v607_v9, 0.0  ;;  %v719_v15 = vmul.f32 0.01, %v607_v9  ;;  %v610_v16 = vadd.f32 %v4030_v13, %v5302_v6  ;;  %v601_v17 = vpop.f32.mrb[3].mxu0 }
 0x167   : > { %vm693_vm2 = vcmp.gt.f32.partialorder %v599_v12, 0.0  ;;  %v717_v19 = vmul.f32 0.01, %v599_v12  ;;  %v602_v20 = vadd.f32 %v5302_v6, %v601_v17 }
 0x168   : > { %v743_v21 = vsel %vm695_vm1, %v607_v9, %v719_v15  ;;  %vm696_vm3 = vcmp.gt.f32.partialorder %v610_v16, 0.0  ;;  %v720_v22 = vmul.f32 0.01, %v610_v16 }
 0x169   : > { %v5314_v23 = vmul.f32 %v802_v63, %v743_v21  ;;  %v741_v24 = vsel %vm693_vm2, %v599_v12, %v717_v19  ;;  %vm694_vm4 = vcmp.gt.f32.partialorder %v602_v20, 0.0  ;;  %v718_v25 = vmul.f32 0.01, %v602_v20 }
 0x16a   : > { %v5316_v27 = vmul.f32 %v792_v62, %v741_v24  ;;  %v744_v28 = vsel %vm696_vm3, %v610_v16, %v720_v22  ;;  %v5358_v62 = vpop.permute.xlu1 %856 }
 0x16b   : > { %v1373_v30 = vrot.slane %v5314_v23, 1  ;;  %v5323_v31 = vmul.f32 %v807_v1, %v744_v28  ;;  %v742_v32 = vsel %vm694_vm4, %v602_v20, %v718_v25  ;;  %v4033_v33 = vpop.f32.mrb[4].mxu0  ;;  %v977_v34 = vrot.slane %v5314_v23, 7 }
 0x16c   : > { %v6737_v36 = vrot.slane %v5316_v27, 7  ;;  %v6736_v37 = vrot.slane %v5316_v27, 1  ;;  %v910_v38 = vmul.f32 %v797_v0, %v742_v32  ;;  %v623_v39 = vadd.f32 %v4033_v33, %v5302_v6  ;;  %v614_v40 = vpop.f32.mrb[5].mxu0  ;;  %v862_v32 = vpop.permute.xlu0 %861 }
 0x16d   : > { %v615_v41 = vadd.f32 %v5302_v6, %v614_v40  ;;  %v4034_v42 = vpop.f32.mrb[6].mxu0  ;;  %v1040_v43 = vpack.c.bf16 %v5323_v31, %v5314_v23  ;;  %v5335_v44 = vrot.slane %v5323_v31, 7  ;;  %v5338_v45 = vrot.slane %v5323_v31, 1 }
 0x16e   : > { %v976_v46 = vrot.slane %v910_v38, 7  ;;  %v1372_v47 = vrot.slane %v910_v38, 1  ;;  %vm699_vm7 = vcmp.gt.f32.partialorder %v623_v39, 0.0  ;;  %v723_v48 = vmul.f32 0.01, %v623_v39  ;;  %v617_v49 = vpop.f32.mrb[7].mxu0  ;;  %v867_v40 = vpop.permute.xlu1 %866 }
 0x16f   : > { %6795 = vst [vmem:[#allocation22_spill] sm:$0xff] %v5338_v45  ;;  %vm697_vm8 = vcmp.gt.f32.partialorder %v615_v41, 0.0  ;;  %v721_v50 = vmul.f32 0.01, %v615_v41  ;;  %v626_v51 = vadd.f32 %v4034_v42, %v5302_v6  ;;  %v618_v52 = vadd.f32 %v5302_v6, %v617_v49 }
 0x170   : > { %v747_v54 = vsel %vm699_vm7, %v623_v39, %v723_v48  ;;  %v1039_v55 = vpack.c.bf16 %v910_v38, %v5316_v27  ;;  %v5347_v56 = vsel %vm995_vm5, %v6737_v36, %v976_v46  ;;  %v5352_v57 = vsel %vm995_vm5, %v977_v34, %v5335_v44  ;;  %v4738_v39 = vld [vmem:[#allocation6 + $0x90] sm:$0xff]  }
 0x171   : > { %v5356_v59 = vmul.f32 %v822_v4, %v747_v54  ;;  %v745_v60 = vsel %vm697_vm8, %v615_v41, %v721_v50  ;;  %vm700_vm9 = vcmp.gt.f32.partialorder %v626_v51, 0.0  ;;  %v724_v61 = vmul.f32 0.01, %v626_v51  ;;  %v4735_v4 = vld [vmem:[#allocation6 + $0x88] sm:$0xff]  }
 0x172   : > { %v5361_v63 = vmul.f32 %v5293_v2, %v745_v60  ;;  %vm698_vm10 = vcmp.gt.f32.partialorder %v618_v52, 0.0  ;;  %v722_v0 = vmul.f32 0.01, %v618_v52  ;;  %4068 = vmatmul.mubr.bf16.vlgmr.msra.gmra.mrb[0].mxu1 %v1039_v55  ;;  %v5365_v1 = vsel %vm995_vm5, %v976_v46, %v977_v34  ;;  %v4741_v55 = vld [vmem:[#allocation6 + $0x98] sm:$0xff]  }
 0x173   : > { %6796 = vst [vmem:[#allocation23_spill] sm:$0xff] %v5356_v59  ;;  %v748_v7 = vsel %vm700_vm9, %v626_v51, %v724_v61  ;;  %4156 = vmatpush3.bf16.msra.mxu1 %v4732_v53  ;;  %v4037_v8 = vpop.f32.mrb[8].mxu0  ;;  %4071 = vmatprep.mubr.msk.bf16.mxu1 %vm4999_vm0, %v6739_v26  ;;  %v5372_v2 = vrot.slane %v5356_v59, 7  ;;  %v5378_v10 = vsel %vm1389_vm6, %v1372_v47, %v1373_v30 }
 0x174   : > { %6797 = vst [vmem:[#allocation24_spill] sm:$0xff] %v5378_v10  ;;  %v5381_v12 = vmul.f32 %v5297_v5, %v748_v7  ;;  %v746_v13 = vsel %vm698_vm10, %v618_v52, %v722_v0  ;;  %v639_v15 = vadd.f32 %v4037_v8, %v5302_v6  ;;  %v630_v16 = vpop.f32.mrb[9].mxu0  ;;  %4157 = vmatprep.subr.bf16.mxu1 %v6739_v26  ;;  %v979_v17 = vrot.slane %v5361_v63, 7 }
 0x175   : > { %v5387_v19 = vmul.f32 %v5295_v3, %v746_v13  ;;  %v631_v20 = vadd.f32 %v5302_v6, %v630_v16  ;;  %v4038_v21 = vpop.f32.mrb[10].mxu0  ;;  %v5394_v5 = vsel %vm1389_vm6, %v6736_v37, %v1372_v47  ;;  %v6738_v22 = vrot.slane %v5361_v63, 1 }
 0x176   : > { %6799 = vst [vmem:[#allocation26_spill] sm:$0xff] %v5394_v5  ;;  %vm703_vm11 = vcmp.gt.f32.partialorder %v639_v15, 0.0  ;;  %v727_v24 = vmul.f32 0.01, %v639_v15  ;;  %v642_v25 = vadd.f32 %v4038_v21, %v5302_v6  ;;  %v633_v28 = vpop.f32.mrb[11].mxu0  ;;  %v5400_v3 = vpack.c.bf16 %v5381_v12, %v5356_v59 }
 0x177   : > { %6798 = vst [vmem:[#allocation25_spill] sm:$0xff] %v5387_v19  ;;  %vm701_vm12 = vcmp.gt.f32.partialorder %v631_v20, 0.0  ;;  %v725_v33 = vmul.f32 0.01, %v631_v20  ;;  %v634_v34 = vadd.f32 %v5302_v6, %v633_v28  ;;  %4158 = vmatpush3.bf16.msra.mxu1 %v4735_v4  ;;  %v1041_v38 = vpack.c.bf16 %v5387_v19, %v5361_v63  ;;  %v5444_v4 = vpop.permute.xlu0 %871 }
 0x178   : > { %6800 = vst [vmem:[#allocation27_spill] sm:$0xff] %v5400_v3  ;;  %v751_v41 = vsel %vm703_vm11, %v639_v15, %v727_v24  ;;  %vm704_vm13 = vcmp.gt.f32.partialorder %v642_v25, 0.0  ;;  %v728_v42 = vmul.f32 0.01, %v642_v25  ;;  %4159 = vmatprep.subr.bf16.mxu1 %v6739_v26  ;;  %v980_v46 = vrot.slane %v5387_v19, 7 }
 0x179   : > { %v5408_v47 = vmul.f32 %v5320_v29, %v751_v41  ;;  %v749_v48 = vsel %vm701_vm12, %v631_v20, %v725_v33  ;;  %vm702_vm14 = vcmp.gt.f32.partialorder %v634_v34, 0.0  ;;  %v726_v49 = vmul.f32 0.01, %v634_v34  ;;  %v5458_v20 = vpop.permute.xlu1 %876 }
 0x17a   : > { %v5411_v50 = vmul.f32 %v5305_v11, %v749_v48  ;;  %v752_v51 = vsel %vm704_vm13, %v642_v25, %v728_v42  ;;  %4072 = vmatmul.mubr.bf16.gmra.mrb[4].mxu1 %v1040_v43  ;;  %v5418_v52 = vsel %vm995_vm5, %v979_v17, %v980_v46  ;;  %v5423_v29 = vsel %vm995_vm5, %v5335_v44, %v979_v17  ;;  %v4746_v17 = vld [vmem:[#allocation6 + $0xb0] sm:$0xff]  }
 0x17b   : > { %v5426_v53 = vmul.f32 %v5326_v35, %v752_v51  ;;  %v750_v54 = vsel %vm702_vm14, %v634_v34, %v726_v49  ;;  %v4041_v11 = vpop.f32.mrb[12].mxu0  ;;  %4075 = vmatprep.mubr.msk.bf16.mxu1 %vm4999_vm0, %v6739_v26  ;;  %4160 = vmatpush3.bf16.msra.mxu1 %v4738_v39  ;;  %v982_v60 = vrot.slane %v5381_v12, 7  ;;  %v5441_v35 = vsel %vm995_vm5, %v980_v46, %v5372_v2  ;;  %v4744_v39 = vld [vmem:[#allocation6 + $0xa0] sm:$0xff]  }
 0x17c   : > { %v5434_v61 = vmul.f32 %v5308_v14, %v750_v54  ;;  %v655_v0 = vadd.f32 %v4041_v11, %v5302_v6  ;;  %v646_v7 = vpop.f32.mrb[13].mxu0  ;;  %4161 = vmatprep.subr.bf16.mxu1 %v6739_v26  ;;  %v983_v8 = vrot.slane %v5411_v50, 7  ;;  %v6814_v10 = vrot.slane %v5316_v27, 7 }
 0x17d   : > { %v647_v13 = vadd.f32 %v5302_v6, %v646_v7  ;;  %v4042_v15 = vpop.f32.mrb[14].mxu0  ;;  %v5449_v14 = vpack.c.bf16 %v5426_v53, %v5408_v47  ;;  %v5454_v16 = vsel %vm995_vm5, %v5372_v2, %v982_v60 }
 0x17e   : > { %vm707_vm15 = vcmp.gt.f32.partialorder %v655_v0, 0.0  ;;  %v731_v21 = vmul.f32 0.01, %v655_v0  ;;  %v658_v24 = vadd.f32 %v4042_v15, %v5302_v6  ;;  %v649_v25 = vpop.f32.mrb[15].mxu0  ;;  %v5463_v28 = vpack.c.bf16 %v5434_v61, %v5411_v50  ;;  %v5483_v15 = vpop.permute.xlu0 %891 }
 0x17f   : > { %6801 = vst [vmem:[#allocation28_spill] sm:$0xff] %v5449_v14  ;;  %vm705_vm1 = vcmp.gt.f32.partialorder %v647_v13, 0.0  ;;  %v729_v33 = vmul.f32 0.01, %v647_v13  ;;  %v650_v34 = vadd.f32 %v5302_v6, %v649_v25  ;;  %4162 = vmatpush3.bf16.msra.mxu1 %v4741_v55  ;;  %v984_v48 = vrot.slane %v5434_v61, 7  ;;  %v882_v25 = vpop.permute.xlu1 %881 }
 0x180   : > { %6802 = vst [vmem:[#allocation29_spill] sm:$0xff] %v5463_v28  ;;  %v755_v42 = vsel %vm707_vm15, %v655_v0, %v731_v21  ;;  %vm708_vm2 = vcmp.gt.f32.partialorder %v658_v24, 0.0  ;;  %v732_v46 = vmul.f32 0.01, %v658_v24  ;;  %4163 = vmatprep.subr.bf16.mxu1 %v6739_v26  ;;  %v5481_v0 = vsel %vm995_vm5, %v982_v60, %v983_v8 }
 0x181   : > { %v5470_v49 = vmul.f32 %v862_v32, %v755_v42  ;;  %v753_v51 = vsel %vm705_vm1, %v647_v13, %v729_v33  ;;  %vm706_vm3 = vcmp.gt.f32.partialorder %v650_v34, 0.0  ;;  %v730_v54 = vmul.f32 0.01, %v650_v34  ;;  %6803 = vst [vmem:[#allocation30_spill] sm:$0xff] %v5481_v0 }
 0x182   : > { %v5473_v11 = vmul.f32 %v5354_v58, %v753_v51  ;;  %v756_v55 = vsel %vm708_vm2, %v658_v24, %v732_v46  ;;  %4076 = vmatmul.mubr.bf16.gmra.mrb[8].mxu1 %v1041_v38  ;;  %v5477_v7 = vsel %vm995_vm5, %v983_v8, %v984_v48  ;;  %v4745_v58 = vld [vmem:[#allocation6 + $0xa8] sm:$0xff]   ;;  %v985_v24 = vrot.slane %v5408_v47, 7 }
 0x183   : > { %v5485_v32 = vmul.f32 %v867_v40, %v756_v55  ;;  %v754_v13 = vsel %vm706_vm3, %v650_v34, %v730_v54  ;;  %v4045_v21 = vpop.f32.mrb[16].mxu0  ;;  %4079 = vmatprep.mubr.msk.bf16.mxu1 %vm4999_vm0, %v6739_v26  ;;  %4164 = vmatpush3.bf16.msra.mxu1 %v4744_v39  ;;  %v5491_v38 = vpack.c.bf16 %v5477_v7, %v5481_v0  ;;  %v986_v33 = vrot.slane %v5426_v53, 7  ;;  %v907_v9 = vpop.permute.xlu1 %906 }
 0x184   : > { %v5495_v60 = vmul.f32 %v5358_v62, %v754_v13  ;;  %v671_v40 = vadd.f32 %v4045_v21, %v5302_v6  ;;  %v662_v8 = vpop.f32.mrb[17].mxu0  ;;  %4165 = vmatprep.subr.bf16.mxu1 %v6739_v26  ;;  %v5505_v34 = vsel %vm1389_vm6, %v5338_v45, %v6738_v22  ;;  %v5514_v46 = vsel %vm995_vm5, %v984_v48, %v985_v24 }
 0x185   : > { %6804 = vst [vmem:[#allocation31_spill] sm:$0xff] %v5491_v38  ;;  %v663_v39 = vadd.f32 %v5302_v6, %v662_v8  ;;  %v4046_v42 = vpop.f32.mrb[18].mxu0  ;;  %v5510_v62 = vpack.c.bf16 %v5485_v32, %v5470_v49  ;;  %v5521_v51 = vsel %vm1389_vm6, %v1373_v30, %v5338_v45  ;;  %v5531_v23 = vsel %vm995_vm5, %v985_v24, %v986_v33 }
 0x186   : > { %6806 = vst [vmem:[#allocation33_spill] sm:$0xff] %v5521_v51  ;;  %vm711_vm4 = vcmp.gt.f32.partialorder %v671_v40, 0.0  ;;  %v735_v54 = vmul.f32 0.01, %v671_v40  ;;  %v674_v55 = vadd.f32 %v4046_v42, %v5302_v6  ;;  %v665_v13 = vpop.f32.mrb[19].mxu0  ;;  %v5526_v21 = vpack.c.bf16 %v5495_v60, %v5473_v11  ;;  %6808 = vst [vmem:[#allocation35_spill] sm:$0xff] %v5531_v23 }
 0x187   : > { %6805 = vst [vmem:[#allocation32_spill] sm:$0xff] %v5510_v62  ;;  %vm709_vm7 = vcmp.gt.f32.partialorder %v663_v39, 0.0  ;;  %v733_v8 = vmul.f32 0.01, %v663_v39  ;;  %v666_v48 = vadd.f32 %v5302_v6, %v665_v13  ;;  %4166 = vmatpush3.bf16.msra.mxu1 %v4745_v58  ;;  %v5536_v42 = vpack.c.bf16 %v5531_v23, %v5514_v46  ;;  %v887_v58 = vpop.permute.xlu0 %886 }
 0x188   : > { %6807 = vst [vmem:[#allocation34_spill] sm:$0xff] %v5526_v21  ;;  %v759_v30 = vsel %vm711_vm4, %v671_v40, %v735_v54  ;;  %vm712_vm8 = vcmp.gt.f32.partialorder %v674_v55, 0.0  ;;  %v736_v41 = vmul.f32 0.01, %v674_v55  ;;  %4167 = vmatprep.subr.bf16.mxu1 %v6739_v26  ;;  %v987_v54 = vrot.slane %v5473_v11, 7 }
 0x189   : > { %6809 = vst [vmem:[#allocation36_spill] sm:$0xff] %v5536_v42  ;;  %v5538_v43 = vmul.f32 %v882_v25, %v759_v30  ;;  %v757_v37 = vsel %vm709_vm7, %v663_v39, %v733_v8  ;;  %vm710_vm9 = vcmp.gt.f32.partialorder %v666_v48, 0.0  ;;  %v734_v13 = vmul.f32 0.01, %v666_v48  ;;  %v4747_v39 = vld [vmem:[#allocation6 + $0xb8] sm:$0xff]  }
 0x18a   : > { %v5541_v36 = vmul.f32 %v5444_v4, %v757_v37  ;;  %v760_v24 = vsel %vm712_vm8, %v674_v55, %v736_v41  ;;  %4080 = vmatmul.mubr.bf16.gmra.mrb[12].mxu1 %v5400_v3  ;;  %v988_v37 = vrot.slane %v5495_v60, 7  ;;  %v1376_v4 = vrot.slane %v5387_v19, 1 }
 0x18b   : > { %v5547_v22 = vmul.f32 %v887_v58, %v760_v24  ;;  %v758_v25 = vsel %vm710_vm9, %v666_v48, %v734_v13  ;;  %v4049_v30 = vpop.f32.mrb[20].mxu0  ;;  %4083 = vmatprep.mubr.msk.bf16.mxu1 %vm4999_vm0, %v6739_v26  ;;  %4168 = vmatpush3.bf16.msra.mxu1 %v4746_v17  ;;  %v5560_v48 = vsel %vm995_vm5, %v986_v33, %v987_v54  ;;  %v5563_v13 = vrot.slane %v5356_v59, 1 }
 0x18c   : > { %v5554_v41 = vmul.f32 %v5458_v20, %v758_v25  ;;  %v687_v55 = vadd.f32 %v4049_v30, %v5302_v6  ;;  %v678_v8 = vpop.f32.mrb[21].mxu0  ;;  %4169 = vmatprep.subr.bf16.mxu1 %v6739_v26  ;;  %v5568_v24 = vsel %vm995_vm5, %v987_v54, %v988_v37  ;;  %v6812_v20 = vrot.slane %v5361_v63, 1 }
 0x18d   : > { %6810 = vst [vmem:[#allocation37_spill] sm:$0xff] %v5547_v22  ;;  %v679_v17 = vadd.f32 %v5302_v6, %v678_v8  ;;  %v4050_v58 = vpop.f32.mrb[22].mxu0  ;;  %v989_v30 = vrot.slane %v5470_v49, 7  ;;  %v6815_v38 = vmov 0.0   ;;  %v5601_v45 = vpack.c.bf16 %v5568_v24, %v5560_v48 }
 0x18e   : > { %6811 = vst [vmem:[#allocation38_spill] sm:$0xff] %v5554_v41  ;;  %v5574_v25 = vsel %vm1389_vm6, %v6812_v20, %v1376_v4  ;;  %v5578_v33 = vrot.slane %v5554_v41, 7  ;;  %vm715_vm10 = vcmp.gt.f32.partialorder %v687_v55, 0.0  ;;  %v739_v40 = vmul.f32 0.01, %v687_v55  ;;  %v681_v26 = vpop.f32.mrb[23].mxu0  ;;  %v902_v20 = vpop.permute.xlu1 %901 }
 0x18f   : > { %v690_v8 = vadd.f32 %v4050_v58, %v5302_v6  ;;  %vm713_vm11 = vcmp.gt.f32.partialorder %v679_v17, 0.0  ;;  %v737_v3 = vmul.f32 0.01, %v679_v17  ;;  %v682_v54 = vadd.f32 %v5302_v6, %v681_v26  ;;  %4170 = vmatpush3.bf16.msra.mxu1 %v4747_v39  ;;  %v4748_v39 = vld [vmem:[#allocation6 + $0xc0] sm:$0xff]  }
 0x190   : > { %v5584_v51 = vpack.c.bf16 %v5554_v41, %v5541_v36  ;;  %v763_v42 = vsel %vm715_vm10, %v687_v55, %v739_v40  ;;  %v1013_v58 = vsel %vm995_vm5, %v5578_v33, %v6814_v10  ;;  %4259 = vmatprep.subr.bf16.mxu1 %v6815_v38  ;;  %v897_v10 = vpop.permute.xlu0 %896  ;;  %v1388_v0 = vrot.slane %v5554_v41, 1  ;;  %v6837_v41 = vld [vmem:[#allocation32_spill] sm:$0xff] }
 0x191   : > { %vm716_vm12 = vcmp.gt.f32.partialorder %v690_v8, 0.0  ;;  %v740_v5 = vmul.f32 0.01, %v690_v8  ;;  %v5592_v62 = vmul.f32 %v902_v20, %v763_v42  ;;  %v761_v26 = vsel %vm713_vm11, %v679_v17, %v737_v3 }
 0x192   : > { %6813 = vst [vmem:[#allocation39_spill] sm:$0xff] %v5584_v51  ;;  %vm714_vm13 = vcmp.gt.f32.partialorder %v682_v54, 0.0  ;;  %v738_v6 = vmul.f32 0.01, %v682_v54  ;;  %v5595_v51 = vmul.f32 %v5483_v15, %v761_v26  ;;  %4084 = vmatmul.mubr.bf16.gmra.mrb[16].mxu1 %v5463_v28  ;;  %v1014_v55 = vpack.c.bf16 %v5347_v56, %v1013_v58 }
 0x193   : > { %6816 = vst [vmem:[#allocation40_spill] sm:$0xff] %v5592_v62  ;;  %v764_v40 = vsel %vm716_vm12, %v690_v8, %v740_v5  ;;  %4087 = vmatprep.mubr.msk.bf16.mxu1 %vm4999_vm0, %v6815_v38  ;;  %v5610_v3 = vsel %vm1389_vm6, %v1376_v4, %v5563_v13  ;;  %v990_v17 = vrot.slane %v5485_v32, 7  ;;  %v4750_v4 = vld [vmem:[#allocation6 + $0xc8] sm:$0xff]   ;;  %v1378_v20 = vrot.slane %v5381_v12, 1 }
 0x194   : > { %v5603_v22 = vmul.f32 %v907_v9, %v764_v40  ;;  %v762_v42 = vsel %vm714_vm13, %v682_v54, %v738_v6  ;;  %4120 = vmatmul.mubr.bf16.vlgmr.msra.gmra.mrb[24].mxu0 %v1014_v55  ;;  %v5617_v15 = vrot.slane %v5595_v51, 7  ;;  %v5627_v54 = vsel %vm995_vm5, %v988_v37, %v989_v30  ;;  %v4752_v40 = vld [vmem:[#allocation6 + $0xd0] sm:$0xff]  }
 0x195   : > { %v5614_v56 = vmul.f32 %v897_v10, %v762_v42  ;;  %4123 = vmatprep.mubr.msk.bf16.mxu0 %vm4999_vm0, %v6815_v38  ;;  %4208 = vmatpush3.bf16.msra.mxu0 %v4748_v39  ;;  %v1379_v58 = vrot.slane %v5411_v50, 1  ;;  %v5640_v6 = vsel %vm995_vm5, %v989_v30, %v990_v17  ;;  %v991_v39 = vrot.slane %v5541_v36, 7 }
 0x196   : > { %v6751_v8 = vrot.slane %v5603_v22, 7  ;;  %v5635_v26 = vsel %vm995_vm5, %v5617_v15, %v5335_v44  ;;  %4209 = vmatprep.subr.bf16.mxu0 %v6815_v38  ;;  %v1380_v37 = vrot.slane %v5434_v61, 1  ;;  %v5655_v55 = vpack.c.bf16 %v5640_v6, %v5627_v54 }
 0x197   : > { %6817 = vst [vmem:[#allocation41_spill] sm:$0xff] %v5614_v56  ;;  %6818 = vst [vmem:[#allocation42_spill] sm:$0xff] %v5635_v26  ;;  %v5659_v30 = vsel %vm1389_vm6, %v1378_v20, %v1379_v58  ;;  %v5666_v42 = vsel %vm1389_vm6, %v5563_v13, %v1378_v20  ;;  %v5675_v5 = vsel %vm995_vm5, %v990_v17, %v991_v39  ;;  %v1381_v20 = vrot.slane %v5408_v47, 1 }
 0x198   : > { %v5651_v44 = vsel %vm995_vm5, %v6751_v8, %v5372_v2  ;;  %v5671_v2 = vsel %vm995_vm5, %v991_v39, %v5578_v33  ;;  %v5679_v9 = vpack.c.bf16 %v5659_v30, %v5666_v42  ;;  %v5688_v8 = vsel %vm1389_vm6, %v1379_v58, %v1380_v37 }
 0x199   : > { %6819 = vst [vmem:[#allocation43_spill] sm:$0xff] %v5651_v44  ;;  %4210 = vmatpush3.bf16.msra.mxu0 %v4750_v4  ;;  %v5683_v10 = vpack.c.bf16 %v5671_v2, %v5675_v5  ;;  %v1382_v17 = vrot.slane %v5426_v53, 1  ;;  %v1383_v4 = vrot.slane %v5473_v11, 1  ;;  %v1384_v28 = vrot.slane %v5495_v60, 1 }
 0x19a   : > { %6820 = vst [vmem:[#allocation44_spill] sm:$0xff] %v5679_v9  ;;  %4088 = vmatmul.mubr.bf16.gmra.mrb[20].mxu1 %v5449_v14  ;;  %4211 = vmatprep.subr.bf16.mxu0 %v6815_v38  ;;  %v5701_v58 = vsel %vm1389_vm6, %v1380_v37, %v1381_v20  ;;  %v1385_v14 = vrot.slane %v5470_v49, 1  ;;  %v1386_v26 = vrot.slane %v5485_v32, 1  ;;  %v6834_v19 = vpack.c.bf16 %v5418_v52, %v5423_v29 }
 0x19b   : > { %6821 = vst [vmem:[#allocation45_spill] sm:$0xff] %v5683_v10  ;;  %4091 = vmatprep.mubr.msk.bf16.mxu1 %vm4999_vm0, %v6815_v38  ;;  %6822 = vst [vmem:[#allocation46_spill] sm:$0xff] %v5701_v58  ;;  %v6823_v10 = vpack.c.bf16 %v5352_v57, %v5365_v1  ;;  %v5712_v39 = vpack.c.bf16 %v5701_v58, %v5688_v8  ;;  %v5716_v9 = vsel %vm1389_vm6, %v1382_v17, %v1383_v4  ;;  %v4753_v57 = vld [vmem:[#allocation6 + $0xd8] sm:$0xff]  }
 0x19c   : > { %6825 = vst [vmem:[#allocation48_spill] sm:$0xff] %v5716_v9  ;;  %v5720_v37 = vsel %vm1389_vm6, %v1381_v20, %v1382_v17  ;;  %v5724_v44 = vsel %vm1389_vm6, %v1383_v4, %v1384_v28  ;;  %v1387_v20 = vrot.slane %v5541_v36, 1  ;;  %v5739_v17 = vsel %vm1389_vm6, %v1385_v14, %v1386_v26 }
 0x19d   : > { %4124 = vmatmul.mubr.bf16.gmra.mrb[28].mxu0 %v6823_v10  ;;  %6824 = vst [vmem:[#allocation47_spill] sm:$0xff] %v5712_v39  ;;  %6826 = vst [vmem:[#allocation49_spill] sm:$0xff] %v5724_v44  ;;  %v5730_v1 = vpack.c.bf16 %v5716_v9, %v5720_v37  ;;  %v5734_v10 = vsel %vm1389_vm6, %v1384_v28, %v1385_v14  ;;  %v4755_v14 = vld [vmem:[#allocation6 + $0xe0] sm:$0xff]   ;;  %v2070_v39 = vrot.slane %v5595_v51, 1  ;;  %v2319_v9 = vrot.slane %v5614_v56, 7 }
 0x19e   : > { %4127 = vmatprep.mubr.msk.bf16.mxu0 %vm4999_vm0, %v6815_v38  ;;  %4212 = vmatpush3.bf16.msra.mxu0 %v4752_v40  ;;  %6828 = vst [vmem:[#allocation51_spill] sm:$0xff] %v5734_v10  ;;  %6829 = vst [vmem:[#allocation52_spill] sm:$0xff] %v5739_v17  ;;  %v5744_v40 = vpack.c.bf16 %v5734_v10, %v5724_v44  ;;  %v5767_v28 = vsel %vm1389_vm6, %v1387_v20, %v1388_v0  ;;  %v2320_v44 = vrot.slane %v5592_v62, 7  ;;  %v4758_v10 = vld [vmem:[#allocation6 + $0xf0] sm:$0xff]  }
 0x19f   : > { %6827 = vst [vmem:[#allocation50_spill] sm:$0xff] %v5730_v1  ;;  %4213 = vmatprep.subr.bf16.mxu0 %v6815_v38  ;;  %v5753_v1 = vsel %vm1389_vm6, %v1386_v26, %v1387_v20  ;;  %v6832_v26 = vrot.slane %v5316_v27, 1  ;;  %v1638_v20 = vrot.slane %v5538_v43, 7  ;;  %v6836_v58 = vrot.slane %v5603_v22, 7 }
 0x1a0   : > { %6830 = vst [vmem:[#allocation53_spill] sm:$0xff] %v5744_v40  ;;  %6831 = vst [vmem:[#allocation54_spill] sm:$0xff] %v5753_v1  ;;  %v5763_v4 = vpack.c.bf16 %v5753_v1, %v5739_v17  ;;  %v6835_v1 = vld [vmem:[#allocation22_spill] sm:$0xff]  ;;  %v2749_v17 = vrot.slane %v5614_v56, 1 }
 0x1a1   : > { %v5773_v23 = vsel %vm1389_vm6, %v1388_v0, %v6832_v26  ;;  %v6833_v26 = vld [vmem:[#allocation37_spill] sm:$0xff]  ;;  %v5798_v27 = vsel %vm995_vm5, %v5578_v33, %v1638_v20 }
 0x1a2   : > { %4214 = vmatpush3.bf16.msra.mxu0 %v4753_v57  ;;  %4092 = vmatmul.mubr.bf16.gmra.mrb[24].mxu1 %v5526_v21  ;;  %v1639_v59 = vrot.slane %v6833_v26, 7  ;;  %v2069_v57 = vrot.slane %v6833_v26, 1  ;;  %v5903_v56 = vsel %vm1389_vm6, %v2070_v39, %v2749_v17 }
 0x1a3   : > { %4215 = vmatprep.subr.bf16.mxu0 %v6815_v38  ;;  %4095 = vmatprep.mubr.msk.bf16.mxu1 %vm4999_vm0, %v6815_v38  ;;  %6839 = vst [vmem:[#allocation37_spill] sm:$0xff] %v5903_v56 }
 0x1a4   : > { %v5814_v33 = vsel %vm995_vm5, %v1639_v59, %v5617_v15  ;;  %v5818_v40 = vsel %vm995_vm5, %v1638_v20, %v1639_v59  ;;  %v2068_v59 = vrot.slane %v5538_v43, 1 }
 0x1a5   : > { %4128 = vmatmul.mubr.bf16.gmra.mrb[32].mxu0 %v6834_v19  ;;  %v4756_v19 = vld [vmem:[#allocation6 + $0xe8] sm:$0xff]  }
 0x1a6   : > { %4131 = vmatprep.mubr.msk.bf16.mxu0 %vm4999_vm0, %v6815_v38  ;;  %4216 = vmatpush3.bf16.msra.mxu0 %v4755_v14  ;;  %v5840_v21 = vsel %vm1389_vm6, %v1388_v0, %v2068_v59  ;;  %v5848_v20 = vsel %vm1389_vm6, %v2068_v59, %v2069_v57  ;;  %v5852_v14 = vsel %vm1389_vm6, %v2069_v57, %v2070_v39  ;;  %v6856_v56 = vld [vmem:[#allocation50_spill] sm:$0xff] }
 0x1a7   : > { %4217 = vmatprep.subr.bf16.mxu0 %v6815_v38  ;;  %v5857_v0 = vsel %vm1389_vm6, %v2070_v39, %v6835_v1  ;;  %v5868_v57 = vsel %vm995_vm5, %v5617_v15, %v2319_v9  ;;  %v5874_v1 = vsel %vm995_vm5, %v2320_v44, %v6836_v58  ;;  %v5882_v59 = vsel %vm995_vm5, %v2319_v9, %v2320_v44 }
 0x1a8   : > { %v6838_v44 = vpack.c.bf16 %v5454_v16, %v5441_v35  ;;  %v2750_v15 = vrot.slane %v5592_v62, 1  ;;  %v2751_v58 = vrot.slane %v5603_v22, 1  ;;  %v6842_v62 = vld [vmem:[#allocation39_spill] sm:$0xff] }
 0x1aa   : > { %4218 = vmatpush3.bf16.msra.mxu0 %v4756_v19  ;;  %4096 = vmatmul.mubr.bf16.gmra.mrb[28].mxu1 %v6837_v41  ;;  %v4759_v19 = vld [vmem:[#allocation6 + $0xf8] sm:$0xff]   ;;  %v5911_v9 = vsel %vm1389_vm6, %v2749_v17, %v2750_v15  ;;  %v5920_v39 = vsel %vm1389_vm6, %v2751_v58, %v5563_v13  ;;  %v6844_v13 = vld [vmem:[#allocation24_spill] sm:$0xff]  ;;  %v4754_v41 = vld [vmem:[#allocation6 + $0x110] sm:$0xff]  }
 0x1ab   : > { %4219 = vmatprep.subr.bf16.mxu0 %v6815_v38  ;;  %4099 = vmatprep.mubr.msk.bf16.mxu1 %vm4999_vm0, %v6815_v38  ;;  %6841 = vst [vmem:[#allocation55_spill] sm:$0xff] %v5920_v39  ;;  %v6843_v17 = vld [vmem:[#allocation31_spill] sm:$0xff]  ;;  %v4766_v39 = vld [vmem:[#allocation6 + $0x148] sm:$0xff]  }
 0x1ad   : > { %4132 = vmatmul.mubr.bf16.gmra.mrb[36].mxu0 %v6838_v44  ;;  %v5915_v44 = vsel %vm1389_vm6, %v2750_v15, %v2751_v58  ;;  %v6845_v15 = vld [vmem:[#allocation26_spill] sm:$0xff] }
 0x1ae   : > { %4135 = vmatprep.mubr.msk.bf16.mxu0 %vm4999_vm0, %v6815_v38  ;;  %4220 = vmatpush3.bf16.msra.mxu0 %v4758_v10  ;;  %6840 = vst [vmem:[#allocation22_spill] sm:$0xff] %v5915_v44  ;;  %v6846_v58 = vpack.c.bf16 %v6844_v13, %v6845_v15  ;;  %v6847_v10 = vld [vmem:[#allocation36_spill] sm:$0xff]  ;;  %v6848_v44 = vld [vmem:[#allocation33_spill] sm:$0xff] }
 0x1af   : > { %4221 = vmatprep.subr.bf16.mxu0 %v6815_v38  ;;  %v6849_v13 = vpack.c.bf16 %v5505_v34, %v6848_v44  ;;  %v4760_v15 = vld [vmem:[#allocation6 + $0x120] sm:$0xff]   ;;  %v6850_v44 = vpack.c.bf16 %v5610_v3, %v5574_v25 }
 0x1b2   : > { %4222 = vmatpush3.bf16.msra.mxu0 %v4759_v19  ;;  %4100 = vmatmul.mubr.bf16.gmra.mrb[32].mxu1 %v6842_v62  ;;  %v4751_v19 = vld [vmem:[#allocation6 + $0x108] sm:$0xff]  }
 0x1b3   : > { %4311 = vmatprep.subr.bf16.mxu0 %v6815_v38  ;;  %4171 = vmatprep.mubr.msk.bf16.mxu1 %vm4999_vm0, %v6815_v38 }
 0x1b5   : > { %4136 = vmatmul.mubr.bf16.gmra.mrb[40].mxu0 %v6843_v17 }
 0x1b6   : > { %4139 = vmatprep.mubr.msk.bf16.mxu0 %vm4999_vm0, %v6815_v38 }
 0x1ba   : > { %4172 = vmatmul.mubr.bf16.vlgmr.msra.gmra.mrb[36].mxu1 %v6846_v58  ;;  %v4762_v58 = vld [vmem:[#allocation6 + $0x130] sm:$0xff]  }
 0x1bb   : > { %4260 = vmatpush3.bf16.msra.mxu1 %v4749_v18  ;;  %4175 = vmatprep.mubr.msk.bf16.mxu1 %vm4999_vm0, %v6815_v38  ;;  %v4757_v18 = vld [vmem:[#allocation6 + $0x118] sm:$0xff]  }
 0x1bc   : > { %4261 = vmatprep.subr.bf16.mxu1 %v6815_v38 }
 0x1bd   : > { %4140 = vmatmul.mubr.bf16.gmra.mrb[44].mxu0 %v6847_v10 }
 0x1be   : > { %4143 = vmatprep.mubr.msk.bf16.mxu0 %vm4999_vm0, %v6815_v38 }
 0x1bf   : > { %4262 = vmatpush3.bf16.msra.mxu1 %v4751_v19  ;;  %v6851_v19 = vld [vmem:[#allocation44_spill] sm:$0xff] }
 0x1c0   : > { %4263 = vmatprep.subr.bf16.mxu1 %v6815_v38 }
 0x1c2   : > { %4176 = vmatmul.mubr.bf16.gmra.mrb[40].mxu1 %v6849_v13  ;;  %v4763_v13 = vld [vmem:[#allocation6 + $0x138] sm:$0xff]  }
 0x1c3   : > { %4179 = vmatprep.mubr.msk.bf16.mxu1 %vm4999_vm0, %v6815_v38  ;;  %4264 = vmatpush3.bf16.msra.mxu1 %v4754_v41  ;;  %v4761_v41 = vld [vmem:[#allocation6 + $0x128] sm:$0xff]  }
 0x1c4   : > { %4265 = vmatprep.subr.bf16.mxu1 %v6815_v38 }
 0x1c5   : > { %4144 = vmatmul.mubr.bf16.gmra.mrb[48].mxu0 %v5601_v45 }
 0x1c6   : > { %4147 = vmatprep.mubr.msk.bf16.mxu0 %vm4999_vm0, %v6815_v38 }
 0x1c7   : > { %4266 = vmatpush3.bf16.msra.mxu1 %v4757_v18  ;;  %v6852_v18 = vld [vmem:[#allocation45_spill] sm:$0xff] }
 0x1c8   : > { %4267 = vmatprep.subr.bf16.mxu1 %v6815_v38 }
 0x1ca   : > { %4180 = vmatmul.mubr.bf16.gmra.mrb[44].mxu1 %v6850_v44  ;;  %v6853_v44 = vld [vmem:[#allocation47_spill] sm:$0xff] }
 0x1cb   : > { %4183 = vmatprep.mubr.msk.bf16.mxu1 %vm4999_vm0, %v6815_v38  ;;  %4268 = vmatpush3.bf16.msra.mxu1 %v4760_v15  ;;  %v4764_v15 = vld [vmem:[#allocation6 + $0x140] sm:$0xff]  }
 0x1cc   : > { %4269 = vmatprep.subr.bf16.mxu1 %v6815_v38 }
 0x1cd   : > { %4148 = vmatmul.mubr.bf16.gmra.mrb[52].mxu0 %v5655_v55 }
 0x1ce   : > { %4151 = vmatprep.mubr.msk.bf16.mxu0 %vm4999_vm0, %v6815_v38 }
 0x1cf   : > { %4270 = vmatpush3.bf16.msra.mxu1 %v4761_v41  ;;  %v6854_v41 = vld [vmem:[#allocation42_spill] sm:$0xff] }
 0x1d0   : > { %4271 = vmatprep.subr.bf16.mxu1 %v6815_v38 }
 0x1d2   : > { %4184 = vmatmul.mubr.bf16.gmra.mrb[48].mxu1 %v6851_v19 }
 0x1d3   : > { %4187 = vmatprep.mubr.msk.bf16.mxu1 %vm4999_vm0, %v6815_v38  ;;  %4272 = vmatpush3.bf16.msra.mxu1 %v4762_v58  ;;  %v6855_v58 = vpack.c.bf16 %v5423_v29, %v6854_v41  ;;  %v6857_v29 = vpack.c.bf16 %v5441_v35, %v5418_v52  ;;  %v6858_v41 = vld [vmem:[#allocation53_spill] sm:$0xff] }
 0x1d4   : > { %4273 = vmatprep.subr.bf16.mxu1 %v6815_v38  ;;  %v4772_v35 = vld [vmem:[#allocation6 + $0x168] sm:$0xff]  }
 0x1d5   : > { %4152 = vmatmul.mubr.bf16.gmra.mrb[56].mxu0 %v6852_v18 }
 0x1d6   : > { %4223 = vmatprep.mubr.msk.bf16.mxu0 %vm4999_vm0, %v6815_v38 }
 0x1d7   : > { %4274 = vmatpush3.bf16.msra.mxu1 %v4763_v13  ;;  %v4768_v13 = vld [vmem:[#allocation6 + $0x150] sm:$0xff]  }
 0x1d8   : > { %4363 = vmatprep.subr.bf16.mxu1 %v6815_v38 }
 0x1da   : > { %4188 = vmatmul.mubr.bf16.gmra.mrb[52].mxu1 %v6853_v44 }
 0x1db   : > { %4191 = vmatprep.mubr.msk.bf16.mxu1 %vm4999_vm0, %v6815_v38 }
 0x1dd   : > { %4224 = vmatmul.mubr.bf16.vlgmr.msra.gmra.mrb[60].mxu0 %v6855_v58  ;;  %v6859_v58 = vld [vmem:[#allocation30_spill] sm:$0xff] }
 0x1de   : > { %4227 = vmatprep.mubr.msk.bf16.mxu0 %vm4999_vm0, %v6815_v38  ;;  %4312 = vmatpush3.bf16.msra.mxu0 %v4764_v15  ;;  %v4769_v15 = vld [vmem:[#allocation6 + $0x158] sm:$0xff]   ;;  %v6860_v52 = vpack.c.bf16 %v6859_v58, %v5454_v16  ;;  %v4765_v58 = vld [vmem:[#allocation6 + $0x180] sm:$0xff]  }
 0x1df   : > { %4313 = vmatprep.subr.bf16.mxu0 %v6815_v38 }
 0x1e2   : > { %4314 = vmatpush3.bf16.msra.mxu0 %v4766_v39  ;;  %4192 = vmatmul.mubr.bf16.gmra.mrb[56].mxu1 %v6856_v56  ;;  %v4771_v39 = vld [vmem:[#allocation6 + $0x160] sm:$0xff]  }
 0x1e3   : > { %4315 = vmatprep.subr.bf16.mxu0 %v6815_v38  ;;  %4195 = vmatprep.mubr.msk.bf16.mxu1 %vm4999_vm0, %v6815_v38 }
 0x1e5   : > { %4228 = vmatmul.mubr.bf16.gmra.mrb[64].mxu0 %v6857_v29  ;;  %v6861_v29 = vpack.c.bf16 %v5514_v46, %v5477_v7  ;;  %v6863_v7 = vld [vmem:[#allocation35_spill] sm:$0xff] }
 0x1e6   : > { %4231 = vmatprep.mubr.msk.bf16.mxu0 %vm4999_vm0, %v6815_v38  ;;  %4316 = vmatpush3.bf16.msra.mxu0 %v4768_v13  ;;  %v4774_v13 = vld [vmem:[#allocation6 + $0x170] sm:$0xff]   ;;  %v6864_v46 = vpack.c.bf16 %v5560_v48, %v6863_v7  ;;  %v4780_v7 = vld [vmem:[#allocation6 + $0x1c0] sm:$0xff]  }
 0x1e7   : > { %4317 = vmatprep.subr.bf16.mxu0 %v6815_v38  ;;  %v4770_v48 = vld [vmem:[#allocation6 + $0x190] sm:$0xff]  }
 0x1ea   : > { %4318 = vmatpush3.bf16.msra.mxu0 %v4769_v15  ;;  %4196 = vmatmul.mubr.bf16.gmra.mrb[60].mxu1 %v6858_v41  ;;  %v4775_v15 = vld [vmem:[#allocation6 + $0x178] sm:$0xff]  }
 0x1eb   : > { %4319 = vmatprep.subr.bf16.mxu0 %v6815_v38  ;;  %4199 = vmatprep.mubr.msk.bf16.mxu1 %vm4999_vm0, %v6815_v38 }
 0x1ed   : > { %4232 = vmatmul.mubr.bf16.gmra.mrb[68].mxu0 %v6860_v52  ;;  %v6865_v52 = vpack.c.bf16 %v5361_v63, %v5323_v31  ;;  %v6867_v31 = vld [vmem:[#allocation23_spill] sm:$0xff]  ;;  %v6868_v63 = vld [vmem:[#allocation25_spill] sm:$0xff] }
 0x1ee   : > { %4235 = vmatprep.mubr.msk.bf16.mxu0 %vm4999_vm0, %v6815_v38  ;;  %4320 = vmatpush3.bf16.msra.mxu0 %v4771_v39  ;;  %v6862_v39 = vpack.c.bf16 %v5773_v23, %v5767_v28  ;;  %v4767_v23 = vld [vmem:[#allocation6 + $0x188] sm:$0xff]  }
 0x1ef   : > { %4321 = vmatprep.subr.bf16.mxu0 %v6815_v38 }
 0x1f2   : > { %4322 = vmatpush3.bf16.msra.mxu0 %v4772_v35  ;;  %4200 = vmatmul.mubr.bf16.gmra.mrb[64].mxu1 %v5763_v4  ;;  %v6866_v35 = vpack.c.bf16 %v5627_v54, %v5568_v24  ;;  %v6870_v24 = vpack.c.bf16 %v5675_v5, %v5640_v6  ;;  %v4776_v54 = vld [vmem:[#allocation6 + $0x1a0] sm:$0xff]   ;;  %v6872_v5 = vpack.c.bf16 %v5798_v27, %v5671_v2  ;;  %v4778_v6 = vld [vmem:[#allocation6 + $0x1b0] sm:$0xff]  }
 0x1f3   : > { %4323 = vmatprep.subr.bf16.mxu0 %v6815_v38  ;;  %4203 = vmatprep.mubr.msk.bf16.mxu1 %vm4999_vm0, %v6815_v38  ;;  %v6874_v2 = vpack.c.bf16 %v5814_v33, %v5818_v40 }
 0x1f5   : > { %4236 = vmatmul.mubr.bf16.gmra.mrb[72].mxu0 %v6861_v29  ;;  %v4773_v29 = vld [vmem:[#allocation6 + $0x198] sm:$0xff]  }
 0x1f6   : > { %4239 = vmatprep.mubr.msk.bf16.mxu0 %vm4999_vm0, %v6815_v38  ;;  %4324 = vmatpush3.bf16.msra.mxu0 %v4774_v13  ;;  %v6869_v13 = vpack.c.bf16 %v6867_v31, %v6868_v63 }
 0x1f7   : > { %4325 = vmatprep.subr.bf16.mxu0 %v6815_v38 }
 0x1fa   : > { %4326 = vmatpush3.bf16.msra.mxu0 %v4775_v15  ;;  %4204 = vmatmul.mubr.bf16.gmra.mrb[68].mxu1 %v6862_v39  ;;  %v6871_v15 = vpack.c.bf16 %v5411_v50, %v5381_v12  ;;  %v4777_v39 = vld [vmem:[#allocation6 + $0x1a8] sm:$0xff]   ;;  %v6873_v12 = vpack.c.bf16 %v5408_v47, %v5434_v61  ;;  %v4779_v50 = vld [vmem:[#allocation6 + $0x1b8] sm:$0xff]   ;;  %v6875_v47 = vpack.c.bf16 %v5473_v11, %v5426_v53 }
 0x1fb   : > { %4415 = vmatprep.subr.bf16.mxu0 %v6815_v38  ;;  %4275 = vmatprep.mubr.msk.bf16.mxu1 %vm4999_vm0, %v6815_v38  ;;  %v6876_v61 = vpack.c.bf16 %v5574_v25, %v5505_v34  ;;  %v6877_v53 = vpack.c.bf16 %v5470_v49, %v5495_v60  ;;  %v6878_v11 = vpack.c.bf16 %v5666_v42, %v5610_v3  ;;  %v4785_v34 = vld [vmem:[#allocation6 + $0x1d8] sm:$0xff]   ;;  %v4787_v25 = vld [vmem:[#allocation6 + $0x1e0] sm:$0xff]   ;;  %v4788_v3 = vld [vmem:[#allocation6 + $0x1e8] sm:$0xff]  }
 0x1fc   : > { %v6879_v49 = vpack.c.bf16 %v5541_v36, %v5485_v32  ;;  %v6880_v60 = vpack.c.bf16 %v5688_v8, %v5659_v30  ;;  %v4790_v42 = vld [vmem:[#allocation6 + $0x1f0] sm:$0xff]  }
 0x1fd   : > { %4240 = vmatmul.mubr.bf16.gmra.mrb[76].mxu0 %v6864_v46  ;;  %v4782_v46 = vld [vmem:[#allocation6 + $0x1c8] sm:$0xff]   ;;  %v6881_v36 = vld [vmem:[#allocation38_spill] sm:$0xff] }
 0x1fe   : > { %4243 = vmatprep.mubr.msk.bf16.mxu0 %vm4999_vm0, %v6815_v38  ;;  %v6882_v32 = vpack.c.bf16 %v5538_v43, %v6881_v36  ;;  %v6883_v8 = vld [vmem:[#allocation46_spill] sm:$0xff] }
 0x1ff   : > { %v6884_v30 = vpack.c.bf16 %v5720_v37, %v6883_v8  ;;  %v6887_v37 = vld [vmem:[#allocation48_spill] sm:$0xff]  ;;  %v4795_v8 = vld [vmem:[#allocation6 + $0x238] sm:$0xff]  }
 0x202   : > { %4276 = vmatmul.mubr.bf16.vlgmr.msra.gmra.mrb[72].mxu1 %v6865_v52  ;;  %v4791_v52 = vld [vmem:[#allocation6 + $0x1f8] sm:$0xff]  }
 0x203   : > { %4364 = vmatpush3.bf16.msra.mxu1 %v4765_v58  ;;  %4279 = vmatprep.mubr.msk.bf16.mxu1 %vm4999_vm0, %v6815_v38  ;;  %v4784_v58 = vld [vmem:[#allocation6 + $0x1d0] sm:$0xff]  }
 0x204   : > { %4365 = vmatprep.subr.bf16.mxu1 %v6815_v38 }
 0x205   : > { %4244 = vmatmul.mubr.bf16.gmra.mrb[80].mxu0 %v6866_v35  ;;  %v6886_v35 = vld [vmem:[#allocation49_spill] sm:$0xff] }
 0x206   : > { %4247 = vmatprep.mubr.msk.bf16.mxu0 %vm4999_vm0, %v6815_v38 }
 0x207   : > { %4366 = vmatpush3.bf16.msra.mxu1 %v4767_v23  ;;  %v6885_v23 = vpack.c.bf16 %v5595_v51, %v6833_v26 }
 0x208   : > { %4367 = vmatprep.subr.bf16.mxu1 %v6815_v38 }
 0x20a   : > { %4280 = vmatmul.mubr.bf16.gmra.mrb[76].mxu1 %v6869_v13 }
 0x20b   : > { %4283 = vmatprep.mubr.msk.bf16.mxu1 %vm4999_vm0, %v6815_v38  ;;  %4368 = vmatpush3.bf16.msra.mxu1 %v4770_v48  ;;  %v6888_v48 = vpack.c.bf16 %v6886_v35, %v6887_v37 }
 0x20c   : > { %4369 = vmatprep.subr.bf16.mxu1 %v6815_v38 }
 0x20d   : > { %4248 = vmatmul.mubr.bf16.gmra.mrb[84].mxu0 %v6870_v24 }
 0x20e   : > { %4251 = vmatprep.mubr.msk.bf16.mxu0 %vm4999_vm0, %v6815_v38 }
 0x20f   : > { %4370 = vmatpush3.bf16.msra.mxu1 %v4773_v29  ;;  %v4781_v29 = vld [vmem:[#allocation6 + $0x200] sm:$0xff]  }
 0x210   : > { %4371 = vmatprep.subr.bf16.mxu1 %v6815_v38 }
 0x212   : > { %4284 = vmatmul.mubr.bf16.gmra.mrb[80].mxu1 %v6871_v15 }
 0x213   : > { %4287 = vmatprep.mubr.msk.bf16.mxu1 %vm4999_vm0, %v6815_v38  ;;  %4372 = vmatpush3.bf16.msra.mxu1 %v4776_v54  ;;  %v6889_v54 = vld [vmem:[#allocation43_spill] sm:$0xff] }
 0x214   : > { %4373 = vmatprep.subr.bf16.mxu1 %v6815_v38  ;;  %v6890_v15 = vpack.c.bf16 %v5454_v16, %v6889_v54  ;;  %v4786_v16 = vld [vmem:[#allocation6 + $0x210] sm:$0xff]   ;;  %v6898_v54 = vld [vmem:[#allocation27_spill] sm:$0xff] }
 0x215   : > { %4252 = vmatmul.mubr.bf16.gmra.mrb[88].mxu0 %v6872_v5  ;;  %v6891_v5 = vld [vmem:[#allocation52_spill] sm:$0xff] }
 0x216   : > { %4255 = vmatprep.mubr.msk.bf16.mxu0 %vm4999_vm0, %v6815_v38 }
 0x217   : > { %4374 = vmatpush3.bf16.msra.mxu1 %v4777_v39  ;;  %v4783_v39 = vld [vmem:[#allocation6 + $0x208] sm:$0xff]  }
 0x218   : > { %4375 = vmatprep.subr.bf16.mxu1 %v6815_v38 }
 0x21a   : > { %4288 = vmatmul.mubr.bf16.gmra.mrb[84].mxu1 %v6873_v12 }
 0x21b   : > { %4291 = vmatprep.mubr.msk.bf16.mxu1 %vm4999_vm0, %v6815_v38  ;;  %4376 = vmatpush3.bf16.msra.mxu1 %v4778_v6  ;;  %v6892_v6 = vld [vmem:[#allocation51_spill] sm:$0xff] }
 0x21c   : > { %4377 = vmatprep.subr.bf16.mxu1 %v6815_v38  ;;  %v6893_v12 = vpack.c.bf16 %v6891_v5, %v6892_v6 }
 0x21d   : > { %4256 = vmatmul.mubr.bf16.gmra.mrb[92].mxu0 %v6874_v2 }
 0x21e   : > { %4327 = vmatprep.mubr.msk.bf16.mxu0 %vm4999_vm0, %v6815_v38 }
 0x21f   : > { %4378 = vmatpush3.bf16.msra.mxu1 %v4779_v50 }
 0x220   : > { %4467 = vmatprep.subr.bf16.mxu1 %v6815_v38 }
 0x222   : > { %4292 = vmatmul.mubr.bf16.gmra.mrb[88].mxu1 %v6875_v47 }
 0x223   : > { %4295 = vmatprep.mubr.msk.bf16.mxu1 %vm4999_vm0, %v6815_v38 }
 0x225   : > { %4328 = vmatmul.mubr.bf16.vlgmr.msra.gmra.mrb[96].mxu0 %v6876_v61  ;;  %v4789_v61 = vld [vmem:[#allocation6 + $0x218] sm:$0xff]  }
 0x226   : > { %4331 = vmatprep.mubr.msk.bf16.mxu0 %vm4999_vm0, %v6815_v38  ;;  %4416 = vmatpush3.bf16.msra.mxu0 %v4780_v7 }
 0x227   : > { %4417 = vmatprep.subr.bf16.mxu0 %v6815_v38 }
 0x22a   : > { %4418 = vmatpush3.bf16.msra.mxu0 %v4782_v46  ;;  %4296 = vmatmul.mubr.bf16.gmra.mrb[92].mxu1 %v6877_v53  ;;  %v6894_v46 = vld [vmem:[#allocation54_spill] sm:$0xff] }
 0x22b   : > { %4419 = vmatprep.subr.bf16.mxu0 %v6815_v38  ;;  %4299 = vmatprep.mubr.msk.bf16.mxu1 %vm4999_vm0, %v6815_v38 }
 0x22d   : > { %4332 = vmatmul.mubr.bf16.gmra.mrb[100].mxu0 %v6878_v11 }
 0x22e   : > { %4335 = vmatprep.mubr.msk.bf16.mxu0 %vm4999_vm0, %v6815_v38  ;;  %4420 = vmatpush3.bf16.msra.mxu0 %v4784_v58  ;;  %v6895_v58 = vpack.c.bf16 %v5767_v28, %v6894_v46 }
 0x22f   : > { %4421 = vmatprep.subr.bf16.mxu0 %v6815_v38 }
 0x232   : > { %4422 = vmatpush3.bf16.msra.mxu0 %v4785_v34  ;;  %4300 = vmatmul.mubr.bf16.gmra.mrb[96].mxu1 %v6879_v49  ;;  %v4793_v49 = vld [vmem:[#allocation6 + $0x228] sm:$0xff]  }
 0x233   : > { %4423 = vmatprep.subr.bf16.mxu0 %v6815_v38  ;;  %4303 = vmatprep.mubr.msk.bf16.mxu1 %vm4999_vm0, %v6815_v38 }
 0x235   : > { %4336 = vmatmul.mubr.bf16.gmra.mrb[104].mxu0 %v6880_v60  ;;  %v6896_v60 = vpack.c.bf16 %v5848_v20, %v5840_v21 }
 0x236   : > { %4339 = vmatprep.mubr.msk.bf16.mxu0 %vm4999_vm0, %v6815_v38  ;;  %4424 = vmatpush3.bf16.msra.mxu0 %v4787_v25 }
 0x237   : > { %4425 = vmatprep.subr.bf16.mxu0 %v6815_v38 }
 0x23a   : > { %4426 = vmatpush3.bf16.msra.mxu0 %v4788_v3  ;;  %4304 = vmatmul.mubr.bf16.gmra.mrb[100].mxu1 %v6882_v32 }
 0x23b   : > { %4427 = vmatprep.subr.bf16.mxu0 %v6815_v38  ;;  %4307 = vmatprep.mubr.msk.bf16.mxu1 %vm4999_vm0, %v6815_v38 }
 0x23d   : > { %4340 = vmatmul.mubr.bf16.gmra.mrb[108].mxu0 %v6884_v30  ;;  %v6897_v30 = vpack.c.bf16 %v5857_v0, %v5852_v14 }
 0x23e   : > { %4343 = vmatprep.mubr.msk.bf16.mxu0 %vm4999_vm0, %v6815_v38  ;;  %4428 = vmatpush3.bf16.msra.mxu0 %v4790_v42 }
 0x23f   : > { %4429 = vmatprep.subr.bf16.mxu0 %v6815_v38 }
 0x242   : > { %4430 = vmatpush3.bf16.msra.mxu0 %v4791_v52  ;;  %4308 = vmatmul.mubr.bf16.gmra.mrb[104].mxu1 %v6885_v23 }
 0x243   : > { %4519 = vmatprep.subr.bf16.mxu0 %v6815_v38  ;;  %4379 = vmatprep.mubr.msk.bf16.mxu1 %vm4999_vm0, %v6815_v38 }
 0x245   : > { %4344 = vmatmul.mubr.bf16.gmra.mrb[112].mxu0 %v6888_v48  ;;  %v1147_v31 = vpop.f32.mrb[0].mxu1 }
 0x246   : > { %4347 = vmatprep.mubr.msk.bf16.mxu0 %vm4999_vm0, %v6815_v38  ;;  %v4069_v63 = vpop.f32.mrb[1].mxu1 }
 0x247   : > { %v1150_v13 = vpop.f32.mrb[2].mxu1 }
 0x248   : > { %v4070_v24 = vpop.f32.mrb[3].mxu1 }
 0x24a   : > { %4380 = vmatmul.mubr.bf16.vlgmr.msra.gmra.mrb[108].mxu1 %v6890_v15 }
 0x24b   : > { %4468 = vmatpush3.bf16.msra.mxu1 %v4781_v29  ;;  %4383 = vmatprep.mubr.msk.bf16.mxu1 %vm4999_vm0, %v6815_v38 }
 0x24c   : > { %4469 = vmatprep.subr.bf16.mxu1 %v6815_v38 }
 0x24d   : > { %4348 = vmatmul.mubr.bf16.gmra.mrb[116].mxu0 %v6893_v12  ;;  %v6136_v50 = vpop.f32.mrb[4].mxu1 }
 0x24e   : > { %4351 = vmatprep.mubr.msk.bf16.mxu0 %vm4999_vm0, %v6815_v38  ;;  %v4073_v2 = vpop.f32.mrb[5].mxu1 }
 0x24f   : > { %v6140_v7 = vpop.f32.mrb[6].mxu1  ;;  %4470 = vmatpush3.bf16.msra.mxu1 %v4783_v39 }
 0x250   : > { %v4074_v47 = vpop.f32.mrb[7].mxu1  ;;  %4471 = vmatprep.subr.bf16.mxu1 %v6815_v38 }
 0x251   : > { %v6899_v47 = vld [vmem:[#allocation29_spill] sm:$0xff] }
 0x252   : > { %4384 = vmatmul.mubr.bf16.gmra.mrb[112].mxu1 %v6843_v17  ;;  %v4792_v17 = vld [vmem:[#allocation6 + $0x220] sm:$0xff]  }
 0x253   : > { %4387 = vmatprep.mubr.msk.bf16.mxu1 %vm4999_vm0, %v6815_v38  ;;  %4472 = vmatpush3.bf16.msra.mxu1 %v4786_v16 }
 0x254   : > { %4473 = vmatprep.subr.bf16.mxu1 %v6815_v38 }
 0x255   : > { %4352 = vmatmul.mubr.bf16.gmra.mrb[120].mxu0 %v6895_v58  ;;  %v6150_v53 = vpop.f32.mrb[8].mxu1 }
 0x256   : > { %4355 = vmatprep.mubr.msk.bf16.mxu0 %vm4999_vm0, %v6815_v38  ;;  %v4077_v11 = vpop.f32.mrb[9].mxu1 }
 0x257   : > { %v6154_v34 = vpop.f32.mrb[10].mxu1  ;;  %4474 = vmatpush3.bf16.msra.mxu1 %v4789_v61 }
 0x258   : > { %v4078_v25 = vpop.f32.mrb[11].mxu1  ;;  %4475 = vmatprep.subr.bf16.mxu1 %v6815_v38 }
 0x25a   : > { %4388 = vmatmul.mubr.bf16.gmra.mrb[116].mxu1 %v6847_v10  ;;  %v4794_v10 = vld [vmem:[#allocation6 + $0x230] sm:$0xff]  }
 0x25b   : > { %4391 = vmatprep.mubr.msk.bf16.mxu1 %vm4999_vm0, %v6815_v38  ;;  %4476 = vmatpush3.bf16.msra.mxu1 %v4792_v17 }
 0x25c   : > { %4477 = vmatprep.subr.bf16.mxu1 %v6815_v38 }
 0x25d   : > { %4356 = vmatmul.mubr.bf16.gmra.mrb[124].mxu0 %v6896_v60  ;;  %v6164_v3 = vpop.f32.mrb[12].mxu1 }
 0x25e   : > { %4359 = vmatprep.mubr.msk.bf16.mxu0 %vm4999_vm0, %v6815_v38  ;;  %v4081_v42 = vpop.f32.mrb[13].mxu1 }
 0x25f   : > { %v6168_v36 = vpop.f32.mrb[14].mxu1  ;;  %4478 = vmatpush3.bf16.msra.mxu1 %v4793_v49  ;;  %v6900_v49 = vpack.c.bf16 %v5818_v40, %v5798_v27  ;;  %v6901_v42 = vld [vmem:[#allocation28_spill] sm:$0xff] }
 0x260   : > { %v4082_v32 = vpop.f32.mrb[15].mxu1  ;;  %4479 = vmatprep.subr.bf16.mxu1 %v6815_v38 }
 0x262   : > { %4392 = vmatmul.mubr.bf16.gmra.mrb[120].mxu1 %v5601_v45 }
 0x263   : > { %4395 = vmatprep.mubr.msk.bf16.mxu1 %vm4999_vm0, %v6815_v38  ;;  %4480 = vmatpush3.bf16.msra.mxu1 %v4794_v10 }
 0x264   : > { %4481 = vmatprep.subr.bf16.mxu1 %v6815_v38 }
 0x265   : > { %4360 = vmatmul.mubr.bf16.gmra.mrb[128].mxu0 %v6897_v30  ;;  %v6178_v52 = vpop.f32.mrb[16].mxu1 }
 0x266   : > { %4431 = vmatprep.mubr.msk.bf16.mxu0 %vm4999_vm0, %v6815_v38  ;;  %v4085_v23 = vpop.f32.mrb[17].mxu1 }
 0x267   : > { %v6182_v35 = vpop.f32.mrb[18].mxu1  ;;  %v1300_v45 = vpop.f32.mrb[24].mxu0  ;;  %4482 = vmatpush3.bf16.msra.mxu1 %v4795_v8 }
 0x268   : > { %v4086_v37 = vpop.f32.mrb[19].mxu1  ;;  %v6184_v48 = vadd.f32 %v1300_v45, %v1147_v31  ;;  %v4121_v63 = vpop.f32.mrb[25].mxu0  ;;  %4571 = vmatprep.subr.bf16.mxu1 %v6815_v38  ;;  %v6902_v45 = vpack.c.bf16 %v5868_v57, %v5814_v33 }
 0x269   : > { %v1303_v0 = vpop.f32.mrb[26].mxu0  ;;  %v6903_v63 = vld [vmem:[#allocation34_spill] sm:$0xff] }
 0x26a   : > { %v6187_v29 = vadd.f32 %v1303_v0, %v1150_v13  ;;  %4396 = vmatmul.mubr.bf16.gmra.mrb[124].mxu1 %v5655_v55  ;;  %v4122_v24 = vpop.f32.mrb[27].mxu0 }
 0x26b   : > { %4399 = vmatprep.mubr.msk.bf16.mxu1 %vm4999_vm0, %v6815_v38 }
 0x26d   : > { %4432 = vmatmul.mubr.bf16.vlgmr.msra.gmra.mrb[132].mxu0 %v6898_v54  ;;  %v6193_v15 = vpop.f32.mrb[20].mxu1 }
 0x26e   : > { %4435 = vmatprep.mubr.msk.bf16.mxu0 %vm4999_vm0, %v6815_v38  ;;  %v4089_v31 = vpop.f32.mrb[21].mxu1 }
 0x26f   : > { %v6197_v39 = vpop.f32.mrb[22].mxu1 }
 0x270   : > { %v1308_v5 = vpop.f32.mrb[28].mxu0  ;;  %v4090_v6 = vpop.f32.mrb[23].mxu1 }
 0x271   : > { %v6200_v13 = vadd.f32 %v1308_v5, %v6136_v50  ;;  %v4125_v55 = vpop.f32.mrb[29].mxu0  ;;  %v6904_v6 = vpack.c.bf16 %v5874_v1, %v5882_v59 }
 0x272   : > { %v1311_v12 = vpop.f32.mrb[30].mxu0  ;;  %4400 = vmatmul.mubr.bf16.gmra.mrb[128].mxu1 %v6852_v18 }
 0x273   : > { %v6203_v2 = vadd.f32 %v1311_v12, %v6140_v7  ;;  %v4126_v16 = vpop.f32.mrb[31].mxu0  ;;  %4403 = vmatprep.mubr.msk.bf16.mxu1 %vm4999_vm0, %v6815_v38  ;;  %v6905_v12 = vld [vmem:[#allocation32_spill] sm:$0xff] }
 0x275   : > { %4436 = vmatmul.mubr.bf16.gmra.mrb[136].mxu0 %v6899_v47  ;;  %v6209_v61 = vpop.f32.mrb[24].mxu1 }
 0x276   : > { %4439 = vmatprep.mubr.msk.bf16.mxu0 %vm4999_vm0, %v6815_v38  ;;  %v4093_v50 = vpop.f32.mrb[25].mxu1 }
 0x277   : > { %v6213_v46 = vpop.f32.mrb[26].mxu1 }
 0x278   : > { %v1316_v58 = vpop.f32.mrb[32].mxu0  ;;  %v4094_v11 = vpop.f32.mrb[27].mxu1 }
 0x279   : > { %v6216_v7 = vadd.f32 %v1316_v58, %v6150_v53  ;;  %v4129_v18 = vpop.f32.mrb[33].mxu0 }
 0x27a   : > { %v1319_v17 = vpop.f32.mrb[34].mxu0  ;;  %4404 = vmatmul.mubr.bf16.gmra.mrb[132].mxu1 %v6900_v49 }
 0x27b   : > { %v6219_v25 = vadd.f32 %v1319_v17, %v6154_v34  ;;  %v4130_v60 = vpop.f32.mrb[35].mxu0  ;;  %4407 = vmatprep.mubr.msk.bf16.mxu1 %vm4999_vm0, %v6815_v38 }
 0x27d   : > { %4440 = vmatmul.mubr.bf16.gmra.mrb[140].mxu0 %v6901_v42  ;;  %v6227_v10 = vpop.f32.mrb[28].mxu1 }
 0x27e   : > { %4443 = vmatprep.mubr.msk.bf16.mxu0 %vm4999_vm0, %v6815_v38  ;;  %v4097_v53 = vpop.f32.mrb[29].mxu1 }
 0x27f   : > { %v6231_v32 = vpop.f32.mrb[30].mxu1 }
 0x280   : > { %v1324_v34 = vpop.f32.mrb[36].mxu0  ;;  %v4098_v8 = vpop.f32.mrb[31].mxu1 }
 0x281   : > { %v6234_v30 = vadd.f32 %v1324_v34, %v6164_v3  ;;  %v4133_v40 = vpop.f32.mrb[37].mxu0 }
 0x282   : > { %v1327_v27 = vpop.f32.mrb[38].mxu0  ;;  %4408 = vmatmul.mubr.bf16.gmra.mrb[136].mxu1 %v6902_v45 }
 0x283   : > { %v6237_v23 = vadd.f32 %v1327_v27, %v6168_v36  ;;  %v4134_v37 = vpop.f32.mrb[39].mxu0  ;;  %4411 = vmatprep.mubr.msk.bf16.mxu1 %vm4999_vm0, %v6815_v38 }
 0x285   : > { %4444 = vmatmul.mubr.bf16.gmra.mrb[144].mxu0 %v6903_v63  ;;  %v6245_v0 = vpop.f32.mrb[32].mxu1 }
 0x286   : > { %4447 = vmatprep.mubr.msk.bf16.mxu0 %vm4999_vm0, %v6815_v38  ;;  %v4101_v3 = vpop.f32.mrb[33].mxu1 }
 0x287   : > { %v6249_v24 = vpop.f32.mrb[34].mxu1 }
 0x288   : > { %v1332_v36 = vpop.f32.mrb[40].mxu0  ;;  %v4102_v54 = vpop.f32.mrb[35].mxu1 }
 0x289   : > { %v6252_v31 = vadd.f32 %v1332_v36, %v6178_v52  ;;  %v4137_v33 = vpop.f32.mrb[41].mxu0 }
 0x28a   : > { %v1335_v57 = vpop.f32.mrb[42].mxu0  ;;  %4412 = vmatmul.mubr.bf16.gmra.mrb[140].mxu1 %v6904_v6 }
 0x28b   : > { %v6255_v5 = vadd.f32 %v1335_v57, %v6182_v35  ;;  %v4138_v55 = vpop.f32.mrb[43].mxu0  ;;  %4483 = vmatprep.mubr.msk.bf16.mxu1 %vm4999_vm0, %v6815_v38 }
 0x28d   : > { %4448 = vmatmul.mubr.bf16.gmra.mrb[148].mxu0 %v6905_v12  ;;  %v1516_v16 = vpop.f32.mrb[36].mxu1 }
 0x28e   : > { %4451 = vmatprep.mubr.msk.bf16.mxu0 %vm4999_vm0, %v6815_v38  ;;  %v6266_v52 = vadd.f32 %v1516_v16, %v6184_v48  ;;  %v4173_v47 = vpop.f32.mrb[37].mxu1 }
 0x28f   : > { %v1519_v35 = vpop.f32.mrb[38].mxu1 }
 0x290   : > { %v1340_v50 = vpop.f32.mrb[44].mxu0  ;;  %v6269_v58 = vadd.f32 %v1519_v35, %v6187_v29  ;;  %v4174_v1 = vpop.f32.mrb[39].mxu1 }
 0x291   : > { %v6272_v59 = vadd.f32 %v1340_v50, %v6193_v15  ;;  %v4141_v11 = vpop.f32.mrb[45].mxu0 }
 0x292   : > { %v1343_v18 = vpop.f32.mrb[46].mxu0  ;;  %4484 = vmatmul.mubr.bf16.vlgmr.msra.gmra.mrb[144].mxu1 %v6851_v19 }
 0x293   : > { %v6275_v17 = vadd.f32 %v1343_v18, %v6197_v39  ;;  %v4142_v49 = vpop.f32.mrb[47].mxu0  ;;  %4487 = vmatprep.mubr.msk.bf16.mxu1 %vm4999_vm0, %v6815_v38 }
 0x295   : > { %4452 = vmatmul.mubr.bf16.gmra.mrb[152].mxu0 %v6842_v62  ;;  %v1524_v48 = vpop.f32.mrb[40].mxu1 }
 0x296   : > { %4455 = vmatprep.mubr.msk.bf16.mxu0 %vm4999_vm0, %v6815_v38  ;;  %v6284_v29 = vadd.f32 %v1524_v48, %v6200_v13  ;;  %v4177_v15 = vpop.f32.mrb[41].mxu1  ;;  %v6906_v13 = vpack.c.bf16 %v6833_v26, %v5538_v43 }
 0x297   : > { %v1527_v60 = vpop.f32.mrb[42].mxu1 }
 0x298   : > { %v1348_v42 = vpop.f32.mrb[48].mxu0  ;;  %v6287_v39 = vadd.f32 %v1527_v60, %v6203_v2  ;;  %v4178_v53 = vpop.f32.mrb[43].mxu1 }
 0x299   : > { %v6290_v19 = vadd.f32 %v1348_v42, %v6209_v61  ;;  %v4145_v34 = vpop.f32.mrb[49].mxu0 }
 0x29a   : > { %v1351_v8 = vpop.f32.mrb[50].mxu0  ;;  %4488 = vmatmul.mubr.bf16.gmra.mrb[148].mxu1 %v6853_v44 }
 0x29b   : > { %v6293_v62 = vadd.f32 %v1351_v8, %v6213_v46  ;;  %v4146_v40 = vpop.f32.mrb[51].mxu0  ;;  %4491 = vmatprep.mubr.msk.bf16.mxu1 %vm4999_vm0, %v6815_v38 }
 0x29d   : > { %4456 = vmatmul.mubr.bf16.gmra.mrb[156].mxu0 %v6906_v13  ;;  %v1532_v2 = vpop.f32.mrb[44].mxu1  ;;  %v6911_v13 = vpack.c.bf16 %v5840_v21, %v5767_v28  ;;  %v4796_v28 = vld [vmem:[#allocation8] sm:$0xff]  }
 0x29e   : > { %4459 = vmatprep.mubr.msk.bf16.mxu0 %vm4999_vm0, %v6815_v38  ;;  %v6304_v61 = vadd.f32 %v1532_v2, %v6216_v7  ;;  %v4181_v27 = vpop.f32.mrb[45].mxu1  ;;  %v6907_v7 = vld [vmem:[#allocation41_spill] sm:$0xff]  ;;  %4520 = vmatpush3.bf16.msra.mxu0 %v4796_v28 }
 0x29f   : > { %v1535_v46 = vpop.f32.mrb[46].mxu1  ;;  %v6908_v54 = vpack.c.bf16 %v6907_v7, %v5595_v51  ;;  %4521 = vmatprep.subr.bf16.mxu0 %v6815_v38  ;;  %4579 = vmatpush3.bf16.msra.mxu1 %v4796_v28 }
 0x2a0   : > { %v1356_v45 = vpop.f32.mrb[52].mxu0  ;;  %v6307_v44 = vadd.f32 %v1535_v46, %v6219_v25  ;;  %v4182_v63 = vpop.f32.mrb[47].mxu1  ;;  %4572 = vmatprep.subr.bf16.mxu1 %v6815_v38 }
 0x2a1   : > { %v6310_v37 = vadd.f32 %v1356_v45, %v6227_v10  ;;  %v4149_v3 = vpop.f32.mrb[53].mxu0 }
 0x2a2   : > { %v1359_v43 = vpop.f32.mrb[54].mxu0  ;;  %4492 = vmatmul.mubr.bf16.gmra.mrb[152].mxu1 %v6856_v56 }
 0x2a3   : > { %v6313_v26 = vadd.f32 %v1359_v43, %v6231_v32  ;;  %v4150_v36 = vpop.f32.mrb[55].mxu0  ;;  %4495 = vmatprep.mubr.msk.bf16.mxu1 %vm4999_vm0, %v6815_v38 }
 0x2a5   : > { %4460 = vmatmul.mubr.bf16.gmra.mrb[160].mxu0 %v6908_v54  ;;  %v1540_v25 = vpop.f32.mrb[48].mxu1 }
 0x2a6   : > { %4463 = vmatprep.mubr.msk.bf16.mxu0 %vm4999_vm0, %v6815_v38  ;;  %v6324_v10 = vadd.f32 %v1540_v25, %v6234_v30  ;;  %v4185_v33 = vpop.f32.mrb[49].mxu1  ;;  %v6909_v30 = vld [vmem:[#allocation40_spill] sm:$0xff] }
 0x2a7   : > { %v1543_v32 = vpop.f32.mrb[50].mxu1  ;;  %v6910_v35 = vpack.c.bf16 %v5603_v22, %v6909_v30 }
 0x2a8   : > { %v1364_v57 = vpop.f32.mrb[56].mxu0  ;;  %v6327_v56 = vadd.f32 %v1543_v32, %v6237_v23  ;;  %v4186_v55 = vpop.f32.mrb[51].mxu1 }
 0x2a9   : > { %v6330_v6 = vadd.f32 %v1364_v57, %v6245_v0  ;;  %v4153_v12 = vpop.f32.mrb[57].mxu0  ;;  %v6913_v55 = vld [vmem:[#allocation37_spill] sm:$0xff] }
 0x2aa   : > { %v1367_v51 = vpop.f32.mrb[58].mxu0  ;;  %4496 = vmatmul.mubr.bf16.gmra.mrb[156].mxu1 %v6858_v41  ;;  %v6914_v12 = vpack.c.bf16 %v5911_v9, %v6913_v55 }
 0x2ab   : > { %v6333_v16 = vadd.f32 %v1367_v51, %v6249_v24  ;;  %v4154_v47 = vpop.f32.mrb[59].mxu0  ;;  %4499 = vmatprep.mubr.msk.bf16.mxu1 %vm4999_vm0, %v6815_v38  ;;  %v4797_v51 = vld [vmem:[#allocation8 + $0x8] sm:$0xff]  }
 0x2ac   : > { %4522 = vmatpush3.bf16.msra.mxu0 %v4797_v51  ;;  %4580 = vmatpush3.bf16.msra.mxu1 %v4797_v51 }
 0x2ad   : > { %4464 = vmatmul.mubr.bf16.gmra.mrb[164].mxu0 %v6910_v35  ;;  %v1548_v23 = vpop.f32.mrb[52].mxu1  ;;  %4523 = vmatprep.subr.bf16.mxu0 %v6815_v38 }
 0x2ae   : > { %4535 = vmatprep.mubr.msk.bf16.mxu0 %vm4999_vm0, %v6815_v38  ;;  %v6344_v0 = vadd.f32 %v1548_v23, %v6252_v31  ;;  %v4189_v50 = vpop.f32.mrb[53].mxu1  ;;  %4573 = vmatprep.subr.bf16.mxu1 %v6815_v38 }
 0x2af   : > { %v1551_v24 = vpop.f32.mrb[54].mxu1 }
 0x2b0   : > { %v1767_v1 = vpop.f32.mrb[60].mxu0  ;;  %v6347_v41 = vadd.f32 %v1551_v24, %v6255_v5  ;;  %v4190_v11 = vpop.f32.mrb[55].mxu1 }
 0x2b1   : > { %v6350_v18 = vadd.f32 %v1767_v1, %v6266_v52  ;;  %v4225_v49 = vpop.f32.mrb[61].mxu0  ;;  %v6915_v11 = vld [vmem:[#allocation55_spill] sm:$0xff] }
 0x2b2   : > { %v1770_v22 = vpop.f32.mrb[62].mxu0  ;;  %4500 = vmatmul.mubr.bf16.gmra.mrb[160].mxu1 %v5763_v4  ;;  %v6916_v49 = vld [vmem:[#allocation22_spill] sm:$0xff] }
 0x2b3   : > { %v6353_v48 = vadd.f32 %v1770_v22, %v6269_v58  ;;  %v4226_v15 = vpop.f32.mrb[63].mxu0  ;;  %4503 = vmatprep.mubr.msk.bf16.mxu1 %vm4999_vm0, %v6815_v38  ;;  %v6917_v22 = vpack.c.bf16 %v6915_v11, %v6916_v49 }
 0x2b4   : > { %v4798_v15 = vld [vmem:[#allocation8 + $0x10] sm:$0xff]  }
 0x2b5   : > { %v1556_v31 = vpop.f32.mrb[56].mxu1  ;;  %4524 = vmatpush3.bf16.msra.mxu0 %v4798_v15  ;;  %4581 = vmatpush3.bf16.msra.mxu1 %v4798_v15 }
 0x2b6   : > { %v6359_v60 = vadd.f32 %v1556_v31, %v6272_v59  ;;  %v4193_v5 = vpop.f32.mrb[57].mxu1  ;;  %4525 = vmatprep.subr.bf16.mxu0 %v6815_v38  ;;  %4574 = vmatprep.subr.bf16.mxu1 %v6815_v38 }
 0x2b7   : > { %v1559_v42 = vpop.f32.mrb[58].mxu1 }
 0x2b8   : > { %v1775_v53 = vpop.f32.mrb[64].mxu0  ;;  %v6362_v52 = vadd.f32 %v1559_v42, %v6275_v17  ;;  %v4194_v34 = vpop.f32.mrb[59].mxu1 }
 0x2b9   : > { %v6365_v58 = vadd.f32 %v1775_v53, %v6284_v29  ;;  %v4229_v8 = vpop.f32.mrb[65].mxu0 }
 0x2ba   : > { %v1778_v4 = vpop.f32.mrb[66].mxu0  ;;  %4504 = vmatmul.mubr.bf16.gmra.mrb[164].mxu1 %v6911_v13 }
 0x2bb   : > { %v6368_v40 = vadd.f32 %v1778_v4, %v6287_v39  ;;  %v4230_v59 = vpop.f32.mrb[67].mxu0  ;;  %4507 = vmatprep.mubr.msk.bf16.mxu1 %vm4999_vm0, %v6815_v38 }
 0x2bd   : > { %v1564_v2 = vpop.f32.mrb[60].mxu1 }
 0x2be   : > { %v6376_v17 = vadd.f32 %v1564_v2, %v6290_v19  ;;  %v4197_v27 = vpop.f32.mrb[61].mxu1  ;;  %v6912_v19 = vpack.c.bf16 %v5852_v14, %v5848_v20  ;;  %v4799_v2 = vld [vmem:[#allocation8 + $0x18] sm:$0xff]  }
 0x2bf   : > { %v1567_v29 = vpop.f32.mrb[62].mxu1  ;;  %4526 = vmatpush3.bf16.msra.mxu0 %v4799_v2  ;;  %4582 = vmatpush3.bf16.msra.mxu1 %v4799_v2 }
 0x2c0   : > { %v1783_v46 = vpop.f32.mrb[68].mxu0  ;;  %v6379_v45 = vadd.f32 %v1567_v29, %v6293_v62  ;;  %v4198_v39 = vpop.f32.mrb[63].mxu1  ;;  %4527 = vmatprep.subr.bf16.mxu0 %v6815_v38  ;;  %4575 = vmatprep.subr.bf16.mxu1 %v6815_v38 }
 0x2c1   : > { %v6382_v63 = vadd.f32 %v1783_v46, %v6304_v61  ;;  %v4233_v21 = vpop.f32.mrb[69].mxu0 }
 0x2c2   : > { %v1786_v3 = vpop.f32.mrb[70].mxu0  ;;  %4508 = vmatmul.mubr.bf16.gmra.mrb[168].mxu1 %v6912_v19 }
 0x2c3   : > { %v6385_v43 = vadd.f32 %v1786_v3, %v6307_v44  ;;  %v4234_v36 = vpop.f32.mrb[71].mxu0  ;;  %4511 = vmatprep.mubr.msk.bf16.mxu1 %vm4999_vm0, %v6815_v38 }
 0x2c4   : > { %v4800_v36 = vld [vmem:[#allocation8 + $0x20] sm:$0xff]  }
 0x2c5   : > { %v1572_v62 = vpop.f32.mrb[64].mxu1  ;;  %4528 = vmatpush3.bf16.msra.mxu0 %v4800_v36  ;;  %4583 = vmatpush3.bf16.msra.mxu1 %v4800_v36 }
 0x2c6   : > { %v6395_v61 = vadd.f32 %v1572_v62, %v6310_v37  ;;  %v4201_v44 = vpop.f32.mrb[65].mxu1  ;;  %4529 = vmatprep.subr.bf16.mxu0 %v6815_v38  ;;  %4576 = vmatprep.subr.bf16.mxu1 %v6815_v38 }
 0x2c7   : > { %v1575_v7 = vpop.f32.mrb[66].mxu1 }
 0x2c8   : > { %v1791_v54 = vpop.f32.mrb[72].mxu0  ;;  %v6398_v20 = vadd.f32 %v1575_v7, %v6313_v26  ;;  %v4202_v14 = vpop.f32.mrb[67].mxu1 }
 0x2c9   : > { %v6401_v25 = vadd.f32 %v1791_v54, %v6324_v10  ;;  %v4237_v33 = vpop.f32.mrb[73].mxu0 }
 0x2ca   : > { %v1794_v32 = vpop.f32.mrb[74].mxu0  ;;  %4512 = vmatmul.mubr.bf16.gmra.mrb[172].mxu1 %v6914_v12  ;;  %v4801_v12 = vld [vmem:[#allocation8 + $0x28] sm:$0xff]  }
 0x2cb   : > { %v6404_v57 = vadd.f32 %v1794_v32, %v6327_v56  ;;  %v4238_v37 = vpop.f32.mrb[75].mxu0  ;;  %4515 = vmatprep.mubr.msk.bf16.mxu1 %vm4999_vm0, %v6815_v38  ;;  %4530 = vmatpush3.bf16.msra.mxu0 %v4801_v12 }
 0x2cc   : > { %4584 = vmatpush3.bf16.msra.mxu1 %v4801_v12  ;;  %4531 = vmatprep.subr.bf16.mxu0 %v6815_v38 }
 0x2cd   : > { %v1580_v26 = vpop.f32.mrb[68].mxu1  ;;  %4577 = vmatprep.subr.bf16.mxu1 %v6815_v38 }
 0x2ce   : > { %v6414_v10 = vadd.f32 %v1580_v26, %v6330_v6  ;;  %v4205_v56 = vpop.f32.mrb[69].mxu1 }
 0x2cf   : > { %v1583_v47 = vpop.f32.mrb[70].mxu1 }
 0x2d0   : > { %v1799_v30 = vpop.f32.mrb[76].mxu0  ;;  %v6417_v9 = vadd.f32 %v1583_v47, %v6333_v16  ;;  %v4206_v35 = vpop.f32.mrb[71].mxu1 }
 0x2d1   : > { %v6420_v23 = vadd.f32 %v1799_v30, %v6344_v0  ;;  %v4241_v50 = vpop.f32.mrb[77].mxu0 }
 0x2d2   : > { %v1802_v24 = vpop.f32.mrb[78].mxu0  ;;  %4516 = vmatmul.mubr.bf16.gmra.mrb[176].mxu1 %v6917_v22 }
 0x2d3   : > { %v6423_v1 = vadd.f32 %v1802_v24, %v6347_v41  ;;  %v4242_v6 = vpop.f32.mrb[79].mxu0  ;;  %4559 = vmatprep.mubr.msk.bf16.mxu1 %vm4999_vm0, %v6815_v38  ;;  %v4803_v24 = vld [vmem:[#allocation8 + $0x38] sm:$0xff]  }
 0x2d5   : > { %v1964_v16 = vpop.f32.mrb[72].mxu1 }
 0x2d6   : > { %v6433_v0 = vadd.f32 %v1964_v16, %v6350_v18  ;;  %v4277_v41 = vpop.f32.mrb[73].mxu1 }
 0x2d7   : > { %v1967_v31 = vpop.f32.mrb[74].mxu1 }
 0x2d8   : > { %v1807_v5 = vpop.f32.mrb[80].mxu0  ;;  %v6436_v42 = vadd.f32 %v1967_v31, %v6353_v48  ;;  %v4278_v34 = vpop.f32.mrb[75].mxu1 }
 0x2d9   : > { %v6439_v53 = vadd.f32 %v1807_v5, %v6359_v60  ;;  %v4245_v8 = vpop.f32.mrb[81].mxu0 }
 0x2da   : > { %v1810_v4 = vpop.f32.mrb[82].mxu0 }
 0x2db   : > { %v6442_v13 = vadd.f32 %v1810_v4, %v6362_v52  ;;  %v4246_v59 = vpop.f32.mrb[83].mxu0 }
 0x2dd   : > { %v1972_v18 = vpop.f32.mrb[76].mxu1 }
 0x2de   : > { %v6447_v48 = vadd.f32 %v1972_v18, %v6365_v58  ;;  %v4281_v60 = vpop.f32.mrb[77].mxu1 }
 0x2df   : > { %v1975_v27 = vpop.f32.mrb[78].mxu1 }
 0x2e0   : > { %v1815_v29 = vpop.f32.mrb[84].mxu0  ;;  %v6450_v46 = vadd.f32 %v1975_v27, %v6368_v40  ;;  %v4282_v39 = vpop.f32.mrb[79].mxu1 }
 0x2e1   : > { %v6453_v52 = vadd.f32 %v1815_v29, %v6376_v17  ;;  %v4249_v21 = vpop.f32.mrb[85].mxu0 }
 0x2e2   : > { %v1818_v28 = vpop.f32.mrb[86].mxu0 }
 0x2e3   : > { %v6456_v3 = vadd.f32 %v1818_v28, %v6379_v45  ;;  %v4250_v19 = vpop.f32.mrb[87].mxu0 }
 0x2e5   : > { %v1980_v58 = vpop.f32.mrb[80].mxu1 }
 0x2e6   : > { %v6461_v40 = vadd.f32 %v1980_v58, %v6382_v63  ;;  %v4285_v17 = vpop.f32.mrb[81].mxu1 }
 0x2e7   : > { %v1983_v62 = vpop.f32.mrb[82].mxu1 }
 0x2e8   : > { %v1823_v44 = vpop.f32.mrb[88].mxu0  ;;  %v6464_v7 = vadd.f32 %v1983_v62, %v6385_v43  ;;  %v4286_v54 = vpop.f32.mrb[83].mxu1 }
 0x2e9   : > { %v6467_v45 = vadd.f32 %v1823_v44, %v6395_v61  ;;  %v4253_v14 = vpop.f32.mrb[89].mxu0  ;;  %v4802_v61 = vld [vmem:[#allocation8 + $0x30] sm:$0xff]  }
 0x2ea   : > { %v1826_v33 = vpop.f32.mrb[90].mxu0  ;;  %4532 = vmatpush3.bf16.msra.mxu0 %v4802_v61  ;;  %4585 = vmatpush3.bf16.msra.mxu1 %v4802_v61 }
 0x2eb   : > { %v6470_v32 = vadd.f32 %v1826_v33, %v6398_v20  ;;  %v4254_v55 = vpop.f32.mrb[91].mxu0  ;;  %4533 = vmatprep.subr.bf16.mxu0 %v6815_v38  ;;  %4578 = vmatprep.subr.bf16.mxu1 %v6815_v38 }
 0x2ed   : > { %v1988_v37 = vpop.f32.mrb[84].mxu1 }
 0x2ee   : > { %v6473_v63 = vadd.f32 %v1988_v37, %v6401_v25  ;;  %v4289_v51 = vpop.f32.mrb[85].mxu1  ;;  %4534 = vmatpush3.bf16.msra.mxu0 %v4803_v24  ;;  %4586 = vmatpush3.bf16.msra.mxu1 %v4803_v24 }
 0x2ef   : > { %v1991_v43 = vpop.f32.mrb[86].mxu1 }
 0x2f0   : > { %v1831_v26 = vpop.f32.mrb[92].mxu0  ;;  %v2042_v56 = vadd.f32 %v1991_v43, %v6404_v57  ;;  %v4290_v47 = vpop.f32.mrb[87].mxu1 }
 0x2f1   : > { %v1854_v20 = vadd.f32 %v1831_v26, %v6414_v10  ;;  %v4257_v30 = vpop.f32.mrb[93].mxu0 }
 0x2f2   : > { %v1834_v35 = vpop.f32.mrb[94].mxu0 }
 0x2f3   : > { %v1855_v25 = vadd.f32 %v1834_v35, %v6417_v9  ;;  %v4258_v50 = vpop.f32.mrb[95].mxu0 }
 0x2f5   : > { %v1996_v11 = vpop.f32.mrb[88].mxu1 }
 0x2f6   : > { %v2043_v49 = vadd.f32 %v1996_v11, %v6420_v23  ;;  %v4293_v22 = vpop.f32.mrb[89].mxu1 }
 0x2f7   : > { %v1999_v57 = vpop.f32.mrb[90].mxu1 }
 0x2f8   : > { %v2197_v10 = vpop.f32.mrb[96].mxu0  ;;  %v2044_v6 = vadd.f32 %v1999_v57, %v6423_v1  ;;  %v4294_v15 = vpop.f32.mrb[91].mxu1 }
 0x2f9   : > { %v2268_v9 = vadd.f32 %v2197_v10, %v6433_v0  ;;  %v4329_v16 = vpop.f32.mrb[97].mxu0 }
 0x2fa   : > { %v2200_v41 = vpop.f32.mrb[98].mxu0 }
 0x2fb   : > { %v2269_v31 = vadd.f32 %v2200_v41, %v6436_v42  ;;  %v4330_v5 = vpop.f32.mrb[99].mxu0 }
 0x2fd   : > { %v2004_v34 = vpop.f32.mrb[92].mxu1 }
 0x2fe   : > { %v2045_v8 = vadd.f32 %v2004_v34, %v6439_v53  ;;  %v4297_v4 = vpop.f32.mrb[93].mxu1 }
 0x2ff   : > { %v2007_v23 = vpop.f32.mrb[94].mxu1 }
 0x300   : > { %v2205_v59 = vpop.f32.mrb[100].mxu0  ;;  %v2046_v2 = vadd.f32 %v2007_v23, %v6442_v13  ;;  %v4298_v18 = vpop.f32.mrb[95].mxu1 }
 0x301   : > { %v2270_v60 = vadd.f32 %v2205_v59, %v6447_v48  ;;  %v4333_v1 = vpop.f32.mrb[101].mxu0 }
 0x302   : > { %v2208_v27 = vpop.f32.mrb[102].mxu0 }
 0x303   : > { %v2271_v0 = vadd.f32 %v2208_v27, %v6450_v46  ;;  %v4334_v29 = vpop.f32.mrb[103].mxu0 }
 0x305   : > { %v2012_v39 = vpop.f32.mrb[96].mxu1 }
 0x306   : > { %v2047_v42 = vadd.f32 %v2012_v39, %v6453_v52  ;;  %v4301_v21 = vpop.f32.mrb[97].mxu1 }
 0x307   : > { %v2015_v28 = vpop.f32.mrb[98].mxu1 }
 0x308   : > { %v2213_v19 = vpop.f32.mrb[104].mxu0  ;;  %v2048_v53 = vadd.f32 %v2015_v28, %v6456_v3  ;;  %v4302_v36 = vpop.f32.mrb[99].mxu1 }
 0x309   : > { %v2272_v58 = vadd.f32 %v2213_v19, %v6461_v40  ;;  %v4337_v13 = vpop.f32.mrb[105].mxu0 }
 0x30a   : > { %v2216_v17 = vpop.f32.mrb[106].mxu0 }
 0x30b   : > { %v2273_v48 = vadd.f32 %v2216_v17, %v6464_v7  ;;  %v4338_v62 = vpop.f32.mrb[107].mxu0 }
 0x30d   : > { %v2020_v44 = vpop.f32.mrb[100].mxu1 }
 0x30e   : > { %v2049_v46 = vadd.f32 %v2020_v44, %v6467_v45  ;;  %v4305_v54 = vpop.f32.mrb[101].mxu1 }
 0x30f   : > { %v2023_v14 = vpop.f32.mrb[102].mxu1 }
 0x310   : > { %v2221_v33 = vpop.f32.mrb[108].mxu0  ;;  %v2050_v52 = vadd.f32 %v2023_v14, %v6470_v32  ;;  %v4306_v55 = vpop.f32.mrb[103].mxu1 }
 0x311   : > { %v2274_v12 = vadd.f32 %v2221_v33, %v6473_v63  ;;  %v4341_v3 = vpop.f32.mrb[109].mxu0 }
 0x312   : > { %v2224_v37 = vpop.f32.mrb[110].mxu0 }
 0x313   : > { %v2275_v51 = vadd.f32 %v2224_v37, %v2042_v56  ;;  %v4342_v40 = vpop.f32.mrb[111].mxu0 }
 0x315   : > { %v2028_v43 = vpop.f32.mrb[104].mxu1 }
 0x316   : > { %v2051_v26 = vadd.f32 %v2028_v43, %v1854_v20  ;;  %v4309_v61 = vpop.f32.mrb[105].mxu1 }
 0x317   : > { %v2031_v7 = vpop.f32.mrb[106].mxu1 }
 0x318   : > { %v2229_v47 = vpop.f32.mrb[112].mxu0  ;;  %v2052_v30 = vadd.f32 %v2031_v7, %v1855_v25  ;;  %v4310_v35 = vpop.f32.mrb[107].mxu1 }
 0x319   : > { %v2276_v45 = vadd.f32 %v2229_v47, %v2043_v49  ;;  %v4345_v50 = vpop.f32.mrb[113].mxu0 }
 0x31a   : > { %v2232_v24 = vpop.f32.mrb[114].mxu0 }
 0x31b   : > { %v2277_v11 = vadd.f32 %v2232_v24, %v2044_v6  ;;  %v4346_v22 = vpop.f32.mrb[115].mxu0 }
 0x31d   : > { %v2448_v32 = vpop.f32.mrb[108].mxu1 }
 0x31e   : > { %v2519_v57 = vadd.f32 %v2448_v32, %v2268_v9  ;;  %v4381_v10 = vpop.f32.mrb[109].mxu1 }
 0x31f   : > { %v2451_v63 = vpop.f32.mrb[110].mxu1 }
 0x320   : > { %v2237_v15 = vpop.f32.mrb[116].mxu0  ;;  %v2520_v16 = vadd.f32 %v2451_v63, %v2269_v31  ;;  %v4382_v41 = vpop.f32.mrb[111].mxu1 }
 0x321   : > { %v2278_v56 = vadd.f32 %v2237_v15, %v2045_v8  ;;  %v4349_v5 = vpop.f32.mrb[117].mxu0 }
 0x322   : > { %v2240_v20 = vpop.f32.mrb[118].mxu0 }
 0x323   : > { %v2279_v34 = vadd.f32 %v2240_v20, %v2046_v2  ;;  %v4350_v4 = vpop.f32.mrb[119].mxu0 }
 0x325   : > { %v2456_v23 = vpop.f32.mrb[112].mxu1 }
 0x326   : > { %v2521_v25 = vadd.f32 %v2456_v23, %v2270_v60  ;;  %v4385_v59 = vpop.f32.mrb[113].mxu1 }
 0x327   : > { %v2459_v49 = vpop.f32.mrb[114].mxu1 }
 0x328   : > { %v2245_v18 = vpop.f32.mrb[120].mxu0  ;;  %v2522_v1 = vadd.f32 %v2459_v49, %v2271_v0  ;;  %v4386_v27 = vpop.f32.mrb[115].mxu1 }
 0x329   : > { %v2280_v6 = vadd.f32 %v2245_v18, %v2047_v42  ;;  %v4353_v29 = vpop.f32.mrb[121].mxu0 }
 0x32a   : > { %v2248_v9 = vpop.f32.mrb[122].mxu0 }
 0x32b   : > { %v2281_v39 = vadd.f32 %v2248_v9, %v2048_v53  ;;  %v4354_v21 = vpop.f32.mrb[123].mxu0 }
 0x32d   : > { %v2464_v28 = vpop.f32.mrb[116].mxu1 }
 0x32e   : > { %v2523_v31 = vadd.f32 %v2464_v28, %v2272_v58  ;;  %v4389_v8 = vpop.f32.mrb[117].mxu1 }
 0x32f   : > { %v2467_v19 = vpop.f32.mrb[118].mxu1 }
 0x330   : > { %v2253_v36 = vpop.f32.mrb[124].mxu0  ;;  %v2524_v13 = vadd.f32 %v2467_v19, %v2273_v48  ;;  %v4390_v17 = vpop.f32.mrb[119].mxu1 }
 0x331   : > { %v2282_v2 = vadd.f32 %v2253_v36, %v2049_v46  ;;  %v4357_v62 = vpop.f32.mrb[125].mxu0 }
 0x332   : > { %v2256_v60 = vpop.f32.mrb[126].mxu0 }
 0x333   : > { %v2283_v44 = vadd.f32 %v2256_v60, %v2050_v52  ;;  %v4358_v54 = vpop.f32.mrb[127].mxu0 }
 0x335   : > { %v2472_v14 = vpop.f32.mrb[120].mxu1 }
 0x336   : > { %v2525_v0 = vadd.f32 %v2472_v14, %v2274_v12  ;;  %v4393_v42 = vpop.f32.mrb[121].mxu1 }
 0x337   : > { %v2475_v33 = vpop.f32.mrb[122].mxu1 }
 0x338   : > { %v2261_v55 = vpop.f32.mrb[128].mxu0  ;;  %v2526_v3 = vadd.f32 %v2475_v33, %v2275_v51  ;;  %v4394_v37 = vpop.f32.mrb[123].mxu1 }
 0x339   : > { %v2284_v53 = vadd.f32 %v2261_v55, %v2051_v26  ;;  %v4361_v40 = vpop.f32.mrb[129].mxu0 }
 0x33a   : > { %v2264_v58 = vpop.f32.mrb[130].mxu0 }
 0x33b   : > { %v2285_v43 = vadd.f32 %v2264_v58, %v2052_v30  ;;  %v4362_v61 = vpop.f32.mrb[131].mxu0 }
 0x33d   : > { %v2480_v7 = vpop.f32.mrb[124].mxu1 }
 0x33e   : > { %v2527_v48 = vadd.f32 %v2480_v7, %v2276_v45  ;;  %v4397_v46 = vpop.f32.mrb[125].mxu1 }
 0x33f   : > { %v2483_v47 = vpop.f32.mrb[126].mxu1 }
 0x340   : > { %v2645_v35 = vpop.f32.mrb[132].mxu0  ;;  %v2528_v50 = vadd.f32 %v2483_v47, %v2277_v11  ;;  %v4398_v52 = vpop.f32.mrb[127].mxu1 }
 0x341   : > { %v2716_v24 = vadd.f32 %v2645_v35, %v2519_v57  ;;  %v4433_v22 = vpop.f32.mrb[133].mxu0 }
 0x342   : > { %v2648_v12 = vpop.f32.mrb[134].mxu0 }
 0x343   : > { %v2717_v32 = vadd.f32 %v2648_v12, %v2520_v16  ;;  %v4434_v10 = vpop.f32.mrb[135].mxu0 }
 0x345   : > { %v2488_v63 = vpop.f32.mrb[128].mxu1 }
 0x346   : > { %v2529_v51 = vadd.f32 %v2488_v63, %v2278_v56  ;;  %v4401_v26 = vpop.f32.mrb[129].mxu1 }
 0x347   : > { %v2491_v15 = vpop.f32.mrb[130].mxu1 }
 0x348   : > { %v2653_v41 = vpop.f32.mrb[136].mxu0  ;;  %v2530_v5 = vadd.f32 %v2491_v15, %v2279_v34  ;;  %v4402_v30 = vpop.f32.mrb[131].mxu1 }
 0x349   : > { %v6497_v20 = vadd.f32 %v2653_v41, %v2521_v25  ;;  %v4437_v45 = vpop.f32.mrb[137].mxu0 }
 0x34a   : > { %v2656_v4 = vpop.f32.mrb[138].mxu0 }
 0x34b   : > { %v6499_v23 = vadd.f32 %v2656_v4, %v2522_v1  ;;  %v4438_v11 = vpop.f32.mrb[139].mxu0 }
 0x34d   : > { %v2496_v59 = vpop.f32.mrb[132].mxu1 }
 0x34e   : > { %v6501_v57 = vadd.f32 %v2496_v59, %v2280_v6  ;;  %v4405_v49 = vpop.f32.mrb[133].mxu1 }
 0x34f   : > { %v2499_v16 = vpop.f32.mrb[134].mxu1 }
 0x350   : > { %v2661_v18 = vpop.f32.mrb[140].mxu0  ;;  %v6503_v27 = vadd.f32 %v2499_v16, %v2281_v39  ;;  %v4406_v56 = vpop.f32.mrb[135].mxu1 }
 0x351   : > { %v6505_v29 = vadd.f32 %v2661_v18, %v2523_v31  ;;  %v4441_v34 = vpop.f32.mrb[141].mxu0 }
 0x352   : > { %v2664_v9 = vpop.f32.mrb[142].mxu0 }
 0x353   : > { %v6507_v25 = vadd.f32 %v2664_v9, %v2524_v13  ;;  %v4442_v21 = vpop.f32.mrb[143].mxu0 }
 0x355   : > { %v2504_v28 = vpop.f32.mrb[136].mxu1 }
 0x356   : > { %v6509_v1 = vadd.f32 %v2504_v28, %v2282_v2  ;;  %v4409_v8 = vpop.f32.mrb[137].mxu1 }
 0x357   : > { %v2507_v19 = vpop.f32.mrb[138].mxu1 }
 0x358   : > { %v2669_v6 = vpop.f32.mrb[144].mxu0  ;;  %v6511_v36 = vadd.f32 %v2507_v19, %v2283_v44  ;;  %v4410_v17 = vpop.f32.mrb[139].mxu1 }
 0x359   : > { %v6513_v62 = vadd.f32 %v2669_v6, %v2525_v0  ;;  %v4445_v39 = vpop.f32.mrb[145].mxu0 }
 0x35a   : > { %v2672_v60 = vpop.f32.mrb[146].mxu0 }
 0x35b   : > { %v6515_v31 = vadd.f32 %v2672_v60, %v2526_v3  ;;  %v4446_v54 = vpop.f32.mrb[147].mxu0  ;;  %v6528_v3 = vld [vmem:[%s6719_s5] ss:$0 sm:$0xff] }
 0x35d   : > { %v2512_v14 = vpop.f32.mrb[140].mxu1 }
 0x35e   : > { %v6517_v13 = vadd.f32 %v2512_v14, %v2284_v53  ;;  %v4413_v42 = vpop.f32.mrb[141].mxu1 }
 0x35f   : > { %v2515_v33 = vpop.f32.mrb[142].mxu1 }
 0x360   : > { %v2677_v2 = vpop.f32.mrb[148].mxu0  ;;  %v6519_v55 = vadd.f32 %v2515_v33, %v2285_v43  ;;  %v4414_v37 = vpop.f32.mrb[143].mxu1 }
 0x361   : > { %v6521_v40 = vadd.f32 %v2677_v2, %v2527_v48  ;;  %v4449_v44 = vpop.f32.mrb[149].mxu0 }
 0x362   : > { %v2680_v58 = vpop.f32.mrb[150].mxu0 }
 0x363   : > { %v6523_v0 = vadd.f32 %v2680_v58, %v2528_v50  ;;  %v4450_v61 = vpop.f32.mrb[151].mxu0 }
 0x365   : > { %v2878_v7 = vpop.f32.mrb[144].mxu1 }
 0x366   : > { %v2949_v53 = vadd.f32 %v2878_v7, %v2716_v24  ;;  %v4485_v46 = vpop.f32.mrb[145].mxu1 }
 0x367   : > { %v2881_v47 = vpop.f32.mrb[146].mxu1 }
 0x368   : > { %v2685_v35 = vpop.f32.mrb[152].mxu0  ;;  %v2974_v43 = vadd.f32 %v6528_v3, %v2949_v53  ;;  %v2950_v52 = vadd.f32 %v2881_v47, %v2717_v32  ;;  %v4486_v22 = vpop.f32.mrb[147].mxu1 }
 0x369   : > { %v6531_v48 = vadd.f32 %v2685_v35, %v2529_v51  ;;  %v4453_v12 = vpop.f32.mrb[153].mxu0 }
 0x36a   : > { %v2688_v50 = vpop.f32.mrb[154].mxu0  ;;  %v3010_v10 = vmul.f32 0.01, %v2974_v43  ;;  %v2975_v63 = vadd.f32 %v6528_v3, %v2950_v52  ;;  %vm2992_vm5 = vcmp.gt.f32.partialorder %v2974_v43, 0.0 }
 0x36b   : > { %v6534_v26 = vadd.f32 %v2688_v50, %v2530_v5  ;;  %v4454_v15 = vpop.f32.mrb[155].mxu0 }
 0x36c   : > { %vm2993_vm6 = vcmp.gt.f32.partialorder %v2975_v63, 0.0  ;;  %v3011_v24 = vmul.f32 0.01, %v2975_v63  ;;  %v3028_v30 = vsel %vm2992_vm5, %v2974_v43, %v3010_v10 }
 0x36d   : > { %v2886_v41 = vpop.f32.mrb[148].mxu1 }
 0x36e   : > { %v3029_v45 = vsel %vm2993_vm6, %v2975_v63, %v3011_v24  ;;  %v2951_v4 = vadd.f32 %v2886_v41, %v6497_v20  ;;  %v4489_v32 = vpop.f32.mrb[149].mxu1 }
 0x36f   : > { %v3046_v51 = vpack.c.bf16 %v3029_v45, %v3028_v30  ;;  %v2889_v11 = vpop.f32.mrb[150].mxu1 }
 0x370   : > { %v2693_v59 = vpop.f32.mrb[156].mxu0  ;;  %v2976_v49 = vadd.f32 %v6528_v3, %v2951_v4  ;;  %v2952_v16 = vadd.f32 %v2889_v11, %v6499_v23  ;;  %v4490_v18 = vpop.f32.mrb[151].mxu1 }
 0x371   : > { %v6540_v5 = vadd.f32 %v2693_v59, %v6501_v57  ;;  %v4457_v56 = vpop.f32.mrb[157].mxu0  ;;  %4536 = vmatmul.mubr.bf16.vlgmr.msra.gmra.mrb[168].mxu0 %v3046_v51 }
 0x372   : > { %v2696_v34 = vpop.f32.mrb[158].mxu0  ;;  %v3012_v9 = vmul.f32 0.01, %v2976_v49  ;;  %v2977_v21 = vadd.f32 %v6528_v3, %v2952_v16  ;;  %4539 = vmatprep.mubr.msk.bf16.mxu0 %vm4999_vm0, %v6815_v38  ;;  %vm2994_vm14 = vcmp.gt.f32.partialorder %v2976_v49, 0.0 }
 0x373   : > { %v6544_v20 = vadd.f32 %v2696_v34, %v6503_v27  ;;  %v4458_v28 = vpop.f32.mrb[159].mxu0 }
 0x374   : > { %vm2995_vm15 = vcmp.gt.f32.partialorder %v2977_v21, 0.0  ;;  %v3013_v23 = vmul.f32 0.01, %v2977_v21  ;;  %v3030_v6 = vsel %vm2994_vm14, %v2976_v49, %v3012_v9 }
 0x375   : > { %v2894_v8 = vpop.f32.mrb[152].mxu1 }
 0x376   : > { %v2953_v57 = vadd.f32 %v2894_v8, %v6505_v29  ;;  %v4493_v19 = vpop.f32.mrb[153].mxu1  ;;  %v3031_v17 = vsel %vm2995_vm15, %v2977_v21, %v3013_v23 }
 0x377   : > { %v2897_v39 = vpop.f32.mrb[154].mxu1  ;;  %v3047_v54 = vpack.c.bf16 %v3031_v17, %v3030_v6 }
 0x378   : > { %v2701_v60 = vpop.f32.mrb[160].mxu0  ;;  %v2978_v14 = vadd.f32 %v6528_v3, %v2953_v57  ;;  %v2954_v27 = vadd.f32 %v2897_v39, %v6507_v25  ;;  %v4494_v33 = vpop.f32.mrb[155].mxu1 }
 0x379   : > { %v6552_v42 = vadd.f32 %v2701_v60, %v6509_v1  ;;  %v4461_v2 = vpop.f32.mrb[161].mxu0  ;;  %4540 = vmatmul.mubr.bf16.gmra.mrb[172].mxu0 %v3047_v54 }
 0x37a   : > { %v2704_v37 = vpop.f32.mrb[162].mxu0  ;;  %v3014_v44 = vmul.f32 0.01, %v2978_v14  ;;  %v2979_v29 = vadd.f32 %v6528_v3, %v2954_v27  ;;  %4543 = vmatprep.mubr.msk.bf16.mxu0 %vm4999_vm0, %v6815_v38  ;;  %vm2996_vm1 = vcmp.gt.f32.partialorder %v2978_v14, 0.0 }
 0x37b   : > { %v6556_v58 = vadd.f32 %v2704_v37, %v6511_v36  ;;  %v4462_v61 = vpop.f32.mrb[163].mxu0 }
 0x37c   : > { %vm2997_vm2 = vcmp.gt.f32.partialorder %v2979_v29, 0.0  ;;  %v3015_v25 = vmul.f32 0.01, %v2979_v29  ;;  %v3032_v46 = vsel %vm2996_vm1, %v2978_v14, %v3014_v44 }
 0x37d   : > { %v2902_v7 = vpop.f32.mrb[156].mxu1 }
 0x37e   : > { %v2955_v1 = vadd.f32 %v2902_v7, %v6513_v62  ;;  %v4497_v53 = vpop.f32.mrb[157].mxu1  ;;  %v3033_v47 = vsel %vm2997_vm2, %v2979_v29, %v3015_v25 }
 0x37f   : > { %v2905_v35 = vpop.f32.mrb[158].mxu1  ;;  %v3048_v52 = vpack.c.bf16 %v3033_v47, %v3032_v46 }
 0x380   : > { %v2709_v43 = vpop.f32.mrb[164].mxu0  ;;  %v2980_v22 = vadd.f32 %v6528_v3, %v2955_v1  ;;  %v2956_v36 = vadd.f32 %v2905_v35, %v6515_v31  ;;  %v4498_v50 = vpop.f32.mrb[159].mxu1 }
 0x381   : > { %v6564_v12 = vadd.f32 %v2709_v43, %v6517_v13  ;;  %v4465_v10 = vpop.f32.mrb[165].mxu0  ;;  %4544 = vmatmul.mubr.bf16.gmra.mrb[176].mxu0 %v3048_v52 }
 0x382   : > { %v2712_v63 = vpop.f32.mrb[166].mxu0  ;;  %v3016_v15 = vmul.f32 0.01, %v2980_v22  ;;  %v2981_v62 = vadd.f32 %v6528_v3, %v2956_v36  ;;  %4547 = vmatprep.mubr.msk.bf16.mxu0 %vm4999_vm0, %v6815_v38  ;;  %vm2998_vm3 = vcmp.gt.f32.partialorder %v2980_v22, 0.0 }
 0x383   : > { %v6568_v24 = vadd.f32 %v2712_v63, %v6519_v55  ;;  %v4466_v41 = vpop.f32.mrb[167].mxu0 }
 0x384   : > { %vm2999_vm4 = vcmp.gt.f32.partialorder %v2981_v62, 0.0  ;;  %v3017_v31 = vmul.f32 0.01, %v2981_v62  ;;  %v3034_v4 = vsel %vm2998_vm3, %v2980_v22, %v3016_v15 }
 0x385   : > { %v2910_v30 = vpop.f32.mrb[160].mxu1 }
 0x386   : > { %v2957_v13 = vadd.f32 %v2910_v30, %v6521_v40  ;;  %v4501_v45 = vpop.f32.mrb[161].mxu1  ;;  %v3035_v32 = vsel %vm2999_vm4, %v2981_v62, %v3017_v31 }
 0x387   : > { %v2913_v51 = vpop.f32.mrb[162].mxu1  ;;  %v3049_v11 = vpack.c.bf16 %v3035_v32, %v3034_v4 }
 0x388   : > { %v2982_v59 = vadd.f32 %v6528_v3, %v2957_v13  ;;  %v2958_v55 = vadd.f32 %v2913_v51, %v6523_v0  ;;  %v4502_v49 = vpop.f32.mrb[163].mxu1 }
 0x389   : > { %4548 = vmatmul.mubr.bf16.gmra.mrb[180].mxu0 %v3049_v11 }
 0x38a   : > { %v3018_v16 = vmul.f32 0.01, %v2982_v59  ;;  %v2983_v18 = vadd.f32 %v6528_v3, %v2958_v55  ;;  %4551 = vmatprep.mubr.msk.bf16.mxu0 %vm4999_vm0, %v6815_v38  ;;  %vm3000_vm7 = vcmp.gt.f32.partialorder %v2982_v59, 0.0 }
 0x38c   : > { %vm3001_vm8 = vcmp.gt.f32.partialorder %v2983_v18, 0.0  ;;  %v3019_v40 = vmul.f32 0.01, %v2983_v18  ;;  %v3036_v21 = vsel %vm3000_vm7, %v2982_v59, %v3018_v16  ;;  %v6601_v59 = vld [vmem:[%s5228_s12 + $0xc] ss:$68 sps:$4 sm:$0xff]  }
 0x38d   : > { %v2918_v56 = vpop.f32.mrb[164].mxu1 }
 0x38e   : > { %v2959_v34 = vadd.f32 %v2918_v56, %v6531_v48  ;;  %v4505_v9 = vpop.f32.mrb[165].mxu1  ;;  %v3037_v28 = vsel %vm3001_vm8, %v2983_v18, %v3019_v40 }
 0x38f   : > { %v2921_v23 = vpop.f32.mrb[166].mxu1  ;;  %v3050_v8 = vpack.c.bf16 %v3037_v28, %v3036_v21 }
 0x390   : > { %v2984_v0 = vadd.f32 %v6528_v3, %v2959_v34  ;;  %v2960_v57 = vadd.f32 %v2921_v23, %v6534_v26  ;;  %v4506_v19 = vpop.f32.mrb[167].mxu1  ;;  %v3806_v23 = vld [vmem:[%s5228_s12 + $0x18] sm:$0xff]  }
 0x391   : > { %4552 = vmatmul.mubr.bf16.gmra.mrb[184].mxu0 %v3050_v8 }
 0x392   : > { %v3020_v6 = vmul.f32 0.01, %v2984_v0  ;;  %v2985_v17 = vadd.f32 %v6528_v3, %v2960_v57  ;;  %4555 = vmatprep.mubr.msk.bf16.mxu0 %vm4999_vm0, %v6815_v38  ;;  %vm3002_vm9 = vcmp.gt.f32.partialorder %v2984_v0, 0.0 }
 0x394   : > { %vm3003_vm10 = vcmp.gt.f32.partialorder %v2985_v17, 0.0  ;;  %v3021_v48 = vmul.f32 0.01, %v2985_v17  ;;  %v3038_v14 = vsel %vm3002_vm9, %v2984_v0, %v3020_v6 }
 0x395   : > { %v2926_v39 = vpop.f32.mrb[168].mxu1 }
 0x396   : > { %v2961_v60 = vadd.f32 %v2926_v39, %v6540_v5  ;;  %v4509_v54 = vpop.f32.mrb[169].mxu1  ;;  %v3039_v27 = vsel %vm3003_vm10, %v2985_v17, %v3021_v48  ;;  %v3734_v39 = vunpack.c.l.bf16 %v3806_v23 }
 0x397   : > { %v2929_v33 = vpop.f32.mrb[170].mxu1  ;;  %v3051_v2 = vpack.c.bf16 %v3039_v27, %v3038_v14 }
 0x398   : > { %v2986_v26 = vadd.f32 %v6528_v3, %v2961_v60  ;;  %v2962_v37 = vadd.f32 %v2929_v33, %v6544_v20  ;;  %v4510_v44 = vpop.f32.mrb[171].mxu1 }
 0x399   : > { %4556 = vmatmul.mubr.bf16.gmra.mrb[188].mxu0 %v3051_v2 }
 0x39a   : > { %v3022_v29 = vmul.f32 0.01, %v2986_v26  ;;  %v2987_v61 = vadd.f32 %v6528_v3, %v2962_v37  ;;  %vm3004_vm11 = vcmp.gt.f32.partialorder %v2986_v26, 0.0  ;;  %v3807_v37 = vld [vmem:[%s5228_s12 + $0x20] sm:$0xff]  }
 0x39c   : > { %vm3005_vm12 = vcmp.gt.f32.partialorder %v2987_v61, 0.0  ;;  %v3023_v25 = vmul.f32 0.01, %v2987_v61  ;;  %v3040_v1 = vsel %vm3004_vm11, %v2986_v26, %v3022_v29  ;;  %v3735_v29 = vunpack.c.h.bf16 %v3806_v23 }
 0x39d   : > { %v2934_v7 = vpop.f32.mrb[172].mxu1 }
 0x39e   : > { %v3041_v5 = vsel %vm3005_vm12, %v2987_v61, %v3023_v25  ;;  %v2963_v53 = vadd.f32 %v2934_v7, %v6552_v42  ;;  %v4513_v46 = vpop.f32.mrb[173].mxu1 }
 0x39f   : > { %v3052_v47 = vpack.c.bf16 %v3041_v5, %v3040_v1  ;;  %v2937_v35 = vpop.f32.mrb[174].mxu1 }
 0x3a0   : > { %v2988_v43 = vadd.f32 %v6528_v3, %v2963_v53  ;;  %v2964_v20 = vadd.f32 %v2937_v35, %v6556_v58  ;;  %v4514_v52 = vpop.f32.mrb[175].mxu1  ;;  %v3738_v53 = vunpack.c.l.bf16 %v3807_v37 }
 0x3a1   : > { %4560 = vmatmul.mubr.bf16.vlgmr.msra.gmra.mrb[180].mxu1 %v3052_v47 }
 0x3a2   : > { %v3024_v22 = vmul.f32 0.01, %v2988_v43  ;;  %v2989_v36 = vadd.f32 %v6528_v3, %v2964_v20  ;;  %4563 = vmatprep.mubr.msk.bf16.mxu1 %vm4999_vm0, %v6815_v38  ;;  %vm3006_vm13 = vcmp.gt.f32.partialorder %v2988_v43, 0.0 }
 0x3a4   : > { %vm3007_vm5 = vcmp.gt.f32.partialorder %v2989_v36, 0.0  ;;  %v3025_v50 = vmul.f32 0.01, %v2989_v36  ;;  %v3042_v15 = vsel %vm3006_vm13, %v2988_v43, %v3024_v22 }
 0x3a5   : > { %v2942_v10 = vpop.f32.mrb[176].mxu1 }
 0x3a6   : > { %v2965_v42 = vadd.f32 %v2942_v10, %v6564_v12  ;;  %v4517_v63 = vpop.f32.mrb[177].mxu1  ;;  %v3043_v62 = vsel %vm3007_vm5, %v2989_v36, %v3025_v50  ;;  %v3808_v36 = vld [vmem:[%s5228_s12 + $0x28] sm:$0xff]   ;;  %v3739_v10 = vunpack.c.h.bf16 %v3807_v37 }
 0x3a7   : > { %v2945_v41 = vpop.f32.mrb[178].mxu1  ;;  %v3053_v58 = vpack.c.bf16 %v3043_v62, %v3042_v15 }
 0x3a8   : > { %v2990_v31 = vadd.f32 %v6528_v3, %v2965_v42  ;;  %v2966_v30 = vadd.f32 %v2945_v41, %v6568_v24  ;;  %v4518_v13 = vpop.f32.mrb[179].mxu1  ;;  %v6606_v24 = vld [vmem:[%s6721_s7] ss:$0 sm:$0xff] }
 0x3a9   : > { %4564 = vmatmul.mubr.bf16.gmra.mrb[184].mxu1 %v3053_v58  ;;  %v3742_v58 = vunpack.c.l.bf16 %v3808_v36 }
 0x3aa   : > { %v3026_v45 = vmul.f32 0.01, %v2990_v31  ;;  %v2991_v4 = vadd.f32 %v6528_v3, %v2966_v30  ;;  %4567 = vmatprep.mubr.msk.bf16.mxu1 %vm4999_vm0, %v6815_v38  ;;  %vm3008_vm6 = vcmp.gt.f32.partialorder %v2990_v31, 0.0  ;;  %v3805_v3 = vld [vmem:[%s5228_s12 + $0x10] sm:$0xff]   ;;  %v3249_v38 = vunpack.c.l.bf16 %v6601_v59 }
 0x3ab   : > { %v3730_v18 = vunpack.c.l.bf16 %v3805_v3  ;;  %v3731_v0 = vunpack.c.h.bf16 %v3805_v3  ;;  %v3743_v3 = vunpack.c.h.bf16 %v3808_v36 }
 0x3ac   : > { %vm3009_vm14 = vcmp.gt.f32.partialorder %v2991_v4, 0.0  ;;  %v3027_v12 = vmul.f32 0.01, %v2991_v4  ;;  %v3044_v32 = vsel %vm3008_vm6, %v2990_v31, %v3026_v45 }
 0x3ae   : > { %v3045_v51 = vsel %vm3009_vm14, %v2991_v4, %v3027_v12 }
 0x3af   : > { %v3054_v11 = vpack.c.bf16 %v3045_v51, %v3044_v32  ;;  %v3809_v51 = vld [vmem:[%s5228_s12 + $0x30] sm:$0xff]  }
 0x3b1   : > { %4568 = vmatmul.mubr.bf16.gmra.mrb[188].mxu1 %v3054_v11 }
 0x444   : > { %v3160_v55 = vpop.f32.mrb[168].mxu0 }
 0x445   : > { %v3161_v49 = vadd.f32 %v6606_v24, %v3160_v55  ;;  %v4537_v16 = vpop.f32.mrb[169].mxu0 }
 0x446   : > { %v3163_v40 = vpop.f32.mrb[170].mxu0 }
 0x447   : > { %v3267_v56 = vadd.f32 %v3249_v38, %v3161_v49  ;;  %v3164_v34 = vadd.f32 %v6606_v24, %v3163_v40  ;;  %v4538_v9 = vpop.f32.mrb[171].mxu0  ;;  %v3746_v40 = vunpack.c.l.bf16 %v3809_v51 }
 0x449   : > { %v3303_v21 = vmul.f32 0.01, %v3267_v56  ;;  %v3268_v28 = vadd.f32 %v3730_v18, %v3164_v34  ;;  %vm3285_vm0 = vcmp.gt.f32.partialorder %v3267_v56, 0.0 }
 0x44b   : > { %vm3286_vm15 = vcmp.gt.f32.partialorder %v3268_v28, 0.0  ;;  %v3304_v8 = vmul.f32 0.01, %v3268_v28  ;;  %v3321_v19 = vsel %vm3285_vm0, %v3267_v56, %v3303_v21 }
 0x44c   : > { %v3168_v57 = vpop.f32.mrb[172].mxu0 }
 0x44d   : > { %v3322_v6 = vsel %vm3286_vm15, %v3268_v28, %v3304_v8  ;;  %v3169_v17 = vadd.f32 %v6606_v24, %v3168_v57  ;;  %v4541_v48 = vpop.f32.mrb[173].mxu0 }
 0x44e   : > { %v3763_v60 = vpack.c.bf16 %v3322_v6, %v3321_v19  ;;  %v3171_v54 = vpop.f32.mrb[174].mxu0  ;;  %v3747_v19 = vunpack.c.h.bf16 %v3809_v51 }
 0x44f   : > { %v3269_v14 = vadd.f32 %v3731_v0, %v3169_v17  ;;  %v3172_v27 = vadd.f32 %v6606_v24, %v3171_v54  ;;  %v4542_v33 = vpop.f32.mrb[175].mxu0  ;;  %v3810_v0 = vld [vmem:[%s5228_s12 + $0x38] sm:$0xff]  }
 0x450   : > { %3764 = vst [vmem:[%s6618_s17] sm:$0xff] %v3763_v60   ;;  %v3750_v54 = vunpack.c.l.bf16 %v3810_v0 }
 0x451   : > { %v3305_v2 = vmul.f32 0.01, %v3269_v14  ;;  %v3270_v26 = vadd.f32 %v3734_v39, %v3172_v27  ;;  %vm3287_vm1 = vcmp.gt.f32.partialorder %v3269_v14, 0.0 }
 0x453   : > { %vm3288_vm2 = vcmp.gt.f32.partialorder %v3270_v26, 0.0  ;;  %v3306_v44 = vmul.f32 0.01, %v3270_v26  ;;  %v3323_v25 = vsel %vm3287_vm1, %v3269_v14, %v3305_v2 }
 0x454   : > { %v3176_v61 = vpop.f32.mrb[176].mxu0 }
 0x455   : > { %v3324_v7 = vsel %vm3288_vm2, %v3270_v26, %v3306_v44  ;;  %v3177_v1 = vadd.f32 %v6606_v24, %v3176_v61  ;;  %v4545_v5 = vpop.f32.mrb[177].mxu0 }
 0x456   : > { %v3768_v46 = vpack.c.bf16 %v3324_v7, %v3323_v25  ;;  %v3179_v47 = vpop.f32.mrb[178].mxu0  ;;  %v3751_v25 = vunpack.c.h.bf16 %v3810_v0 }
 0x457   : > { %v3271_v35 = vadd.f32 %v3735_v29, %v3177_v1  ;;  %v3180_v43 = vadd.f32 %v6606_v24, %v3179_v47  ;;  %v4546_v20 = vpop.f32.mrb[179].mxu0  ;;  %v3811_v29 = vld [vmem:[%s5228_s12 + $0x40] sm:$0xff]  }
 0x458   : > { %3813 = vst [vmem:[%s6618_s17 + $0x8] sm:$0xff] %v3768_v46   ;;  %v3754_v47 = vunpack.c.l.bf16 %v3811_v29 }
 0x459   : > { %v3307_v52 = vmul.f32 0.01, %v3271_v35  ;;  %v3272_v22 = vadd.f32 %v3738_v53, %v3180_v43  ;;  %vm3289_vm3 = vcmp.gt.f32.partialorder %v3271_v35, 0.0 }
 0x45b   : > { %vm3290_vm4 = vcmp.gt.f32.partialorder %v3272_v22, 0.0  ;;  %v3308_v50 = vmul.f32 0.01, %v3272_v22  ;;  %v3325_v63 = vsel %vm3289_vm3, %v3271_v35, %v3307_v52 }
 0x45c   : > { %v3184_v42 = vpop.f32.mrb[180].mxu0 }
 0x45d   : > { %v3326_v15 = vsel %vm3290_vm4, %v3272_v22, %v3308_v50  ;;  %v3185_v62 = vadd.f32 %v6606_v24, %v3184_v42  ;;  %v4549_v41 = vpop.f32.mrb[181].mxu0 }
 0x45e   : > { %v3773_v31 = vpack.c.bf16 %v3326_v15, %v3325_v63  ;;  %v3187_v30 = vpop.f32.mrb[182].mxu0  ;;  %v3755_v63 = vunpack.c.h.bf16 %v3811_v29 }
 0x45f   : > { %v3273_v13 = vadd.f32 %v3739_v10, %v3185_v62  ;;  %v3188_v45 = vadd.f32 %v6606_v24, %v3187_v30  ;;  %v4550_v4 = vpop.f32.mrb[183].mxu0  ;;  %v3812_v10 = vld [vmem:[%s5228_s12 + $0x48] sm:$0xff]  }
 0x460   : > { %3814 = vst [vmem:[%s6618_s17 + $0x10] sm:$0xff] %v3773_v31   ;;  %v3758_v30 = vunpack.c.l.bf16 %v3812_v10 }
 0x461   : > { %v3309_v12 = vmul.f32 0.01, %v3273_v13  ;;  %v3274_v32 = vadd.f32 %v3742_v58, %v3188_v45  ;;  %vm3291_vm7 = vcmp.gt.f32.partialorder %v3273_v13, 0.0 }
 0x463   : > { %vm3292_vm8 = vcmp.gt.f32.partialorder %v3274_v32, 0.0  ;;  %v3310_v11 = vmul.f32 0.01, %v3274_v32  ;;  %v3327_v55 = vsel %vm3291_vm7, %v3273_v13, %v3309_v12 }
 0x464   : > { %v3192_v38 = vpop.f32.mrb[184].mxu0 }
 0x465   : > { %v3328_v49 = vsel %vm3292_vm8, %v3274_v32, %v3310_v11  ;;  %v3193_v16 = vadd.f32 %v6606_v24, %v3192_v38  ;;  %v4553_v18 = vpop.f32.mrb[185].mxu0  ;;  %v3759_v38 = vunpack.c.h.bf16 %v3812_v10 }
 0x466   : > { %v3778_v56 = vpack.c.bf16 %v3328_v49, %v3327_v55  ;;  %v3195_v34 = vpop.f32.mrb[186].mxu0 }
 0x467   : > { %v3275_v9 = vadd.f32 %v3743_v3, %v3193_v16  ;;  %v3196_v21 = vadd.f32 %v6606_v24, %v3195_v34  ;;  %v4554_v28 = vpop.f32.mrb[187].mxu0 }
 0x468   : > { %3815 = vst [vmem:[%s6618_s17 + $0x18] sm:$0xff] %v3778_v56   ;;  %v3266_v56 = vunpack.c.h.bf16 %v6601_v59 }
 0x469   : > { %v3311_v23 = vmul.f32 0.01, %v3275_v9  ;;  %v3276_v8 = vadd.f32 %v3746_v40, %v3196_v21  ;;  %vm3293_vm9 = vcmp.gt.f32.partialorder %v3275_v9, 0.0 }
 0x46b   : > { %vm3294_vm10 = vcmp.gt.f32.partialorder %v3276_v8, 0.0  ;;  %v3312_v57 = vmul.f32 0.01, %v3276_v8  ;;  %v3329_v17 = vsel %vm3293_vm9, %v3275_v9, %v3311_v23 }
 0x46c   : > { %v3200_v6 = vpop.f32.mrb[188].mxu0 }
 0x46d   : > { %v3330_v48 = vsel %vm3294_vm10, %v3276_v8, %v3312_v57  ;;  %v3201_v39 = vadd.f32 %v6606_v24, %v3200_v6  ;;  %v4557_v60 = vpop.f32.mrb[189].mxu0 }
 0x46e   : > { %v3783_v14 = vpack.c.bf16 %v3330_v48, %v3329_v17  ;;  %v3203_v27 = vpop.f32.mrb[190].mxu0 }
 0x46f   : > { %v3277_v33 = vadd.f32 %v3747_v19, %v3201_v39  ;;  %v3204_v2 = vadd.f32 %v6606_v24, %v3203_v27  ;;  %v4558_v26 = vpop.f32.mrb[191].mxu0 }
 0x470   : > { %3816 = vst [vmem:[%s6618_s17 + $0x20] sm:$0xff] %v3783_v14  }
 0x471   : > { %v3313_v37 = vmul.f32 0.01, %v3277_v33  ;;  %v3278_v44 = vadd.f32 %v3750_v54, %v3204_v2  ;;  %vm3295_vm11 = vcmp.gt.f32.partialorder %v3277_v33, 0.0 }
 0x473   : > { %vm3296_vm12 = vcmp.gt.f32.partialorder %v3278_v44, 0.0  ;;  %v3314_v61 = vmul.f32 0.01, %v3278_v44  ;;  %v3331_v1 = vsel %vm3295_vm11, %v3277_v33, %v3313_v37 }
 0x474   : > { %v3208_v7 = vpop.f32.mrb[180].mxu1 }
 0x475   : > { %v3332_v5 = vsel %vm3296_vm12, %v3278_v44, %v3314_v61  ;;  %v3209_v53 = vadd.f32 %v6606_v24, %v3208_v7  ;;  %v4561_v46 = vpop.f32.mrb[181].mxu1 }
 0x476   : > { %v3788_v35 = vpack.c.bf16 %v3332_v5, %v3331_v1  ;;  %v3211_v43 = vpop.f32.mrb[182].mxu1 }
 0x477   : > { %v3279_v20 = vadd.f32 %v3751_v25, %v3209_v53  ;;  %v3212_v52 = vadd.f32 %v6606_v24, %v3211_v43  ;;  %v4562_v22 = vpop.f32.mrb[183].mxu1 }
 0x478   : > { %3817 = vst [vmem:[%s6618_s17 + $0x28] sm:$0xff] %v3788_v35  }
 0x479   : > { %v3315_v36 = vmul.f32 0.01, %v3279_v20  ;;  %v3280_v50 = vadd.f32 %v3754_v47, %v3212_v52  ;;  %vm3297_vm13 = vcmp.gt.f32.partialorder %v3279_v20, 0.0 }
 0x47b   : > { %vm3298_vm5 = vcmp.gt.f32.partialorder %v3280_v50, 0.0  ;;  %v3316_v42 = vmul.f32 0.01, %v3280_v50  ;;  %v3333_v62 = vsel %vm3297_vm13, %v3279_v20, %v3315_v36 }
 0x47c   : > { %v3216_v15 = vpop.f32.mrb[184].mxu1 }
 0x47d   : > { %v3334_v41 = vsel %vm3298_vm5, %v3280_v50, %v3316_v42  ;;  %v3217_v58 = vadd.f32 %v6606_v24, %v3216_v15  ;;  %v4565_v31 = vpop.f32.mrb[185].mxu1 }
 0x47e   : > { %v3793_v13 = vpack.c.bf16 %v3334_v41, %v3333_v62  ;;  %v3219_v45 = vpop.f32.mrb[186].mxu1 }
 0x47f   : > { %v3281_v4 = vadd.f32 %v3755_v63, %v3217_v58  ;;  %v3220_v12 = vadd.f32 %v6606_v24, %v3219_v45  ;;  %v4566_v32 = vpop.f32.mrb[187].mxu1 }
 0x480   : > { %3818 = vst [vmem:[%s6618_s17 + $0x30] sm:$0xff] %v3793_v13  }
 0x481   : > { %v3317_v51 = vmul.f32 0.01, %v3281_v4  ;;  %v3282_v11 = vadd.f32 %v3758_v30, %v3220_v12  ;;  %vm3299_vm6 = vcmp.gt.f32.partialorder %v3281_v4, 0.0 }
 0x483   : > { %vm3300_vm14 = vcmp.gt.f32.partialorder %v3282_v11, 0.0  ;;  %v3318_v3 = vmul.f32 0.01, %v3282_v11  ;;  %v3335_v49 = vsel %vm3299_vm6, %v3281_v4, %v3317_v51 }
 0x484   : > { %v3224_v55 = vpop.f32.mrb[188].mxu1 }
 0x485   : > { %v3336_v16 = vsel %vm3300_vm14, %v3282_v11, %v3318_v3  ;;  %v3225_v18 = vadd.f32 %v6606_v24, %v3224_v55  ;;  %v4569_v40 = vpop.f32.mrb[189].mxu1 }
 0x486   : > { %v3798_v34 = vpack.c.bf16 %v3336_v16, %v3335_v49  ;;  %v3227_v9 = vpop.f32.mrb[190].mxu1 }
 0x487   : > { %v3283_v21 = vadd.f32 %v3759_v38, %v3225_v18  ;;  %v3228_v28 = vadd.f32 %v6606_v24, %v3227_v9  ;;  %v4570_v23 = vpop.f32.mrb[191].mxu1 }
 0x488   : > { %3819 = vst [vmem:[%s6618_s17 + $0x38] sm:$0xff] %v3798_v34  }
 0x489   : > { %v3319_v8 = vmul.f32 0.01, %v3283_v21  ;;  %v3284_v0 = vadd.f32 %v3266_v56, %v3228_v28  ;;  %vm3301_vm0 = vcmp.gt.f32.partialorder %v3283_v21, 0.0 }
 0x48b   : > { %vm3302_vm15 = vcmp.gt.f32.partialorder %v3284_v0, 0.0  ;;  %v3320_v57 = vmul.f32 0.01, %v3284_v0  ;;  %v3337_v19 = vsel %vm3301_vm0, %v3283_v21, %v3319_v8 }
 0x48d   : > { %v3338_v59 = vsel %vm3302_vm15, %v3284_v0, %v3320_v57 }
 0x48e   : > { %v3803_v24 = vpack.c.bf16 %v3338_v59, %v3337_v19 }
 0x490   : > { %3820 = vst [vmem:[%s6618_s17 + $0x40] sm:$0xff] %v3803_v24  }
 0x491   : > { %4901 = shalt.err (!%p4898_p9)
}
 0x492   : > { %s4902_s14 = scalar_lea.hbm %s6657_s20, 1152  ;;  %s4906_s23 = scalar_lea.hbm %s6722_s8, 6912 }
 0x493   : > { %p4903_p11 = scmp.ne.s32.totalorder %s6657_s20, %s4902_s14  ;;  %p4907_p2 = scmp.lt.u32.totalorder %s6657_s20, %s6722_s8 }
 0x494   : > { %p4908_p0 = scmp.lt.u32.totalorder %s4906_s23, %s4902_s14  ;;  %p4910_p10 = scmp.lt.u32.totalorder %s4902_s14, %s6657_s20 }
 0x495   : > { %p4904_p13 = pnand %p4903_p11, %p6918_p12 }
 0x496   : > { %p4909_p8 = por %p4908_p0, %p4907_p2 }
 0x497   : > { %p4905_p3 = pneg %p4904_p13 }
 0x498   : > { %p4911_p1 = por %p4910_p10, %p4909_p8 }
 0x49a   : > { %p4912_p4 = pnand %p4911_p1, %p4905_p3 }
 0x49c   : > { %4915 = shalt.err (!%p4912_p4)
}
 0x49d   : > { %s5001_s17 = smov 64   ;;  %s5002_s15 = smov 4  }
 0x49e   : > { %4605 = dma.vmem_to_hbm [thread:$0]  (%p6918_p12), %s6652_s9, 1152, %s6657_s20, %s6662_s22, %s5001_s17, %s5001_s17, %s5002_s15  }
 0x49f PF: > { %s6919_s16 = sld [smem:[#allocation17_spill]]  ;;  %s6920_s30 = sld [smem:[#allocation13_spill]] }
 0x4a0   : > { %s6921_s24 = sld [smem:[#allocation20_spill]] }
 0x4a5   : > { %p4627_p5 = scmp.ge.s32.totalorder %s6919_s16, 2  ;;  %s3460_s29 = sand.u32 1, %s6920_s30  }
 0x4a6   : > { %p6922_p6 = scmp.ne.s32.totalorder %s6921_s24, 0  ;;  %s3461_s12 = scalar_lea.sflag [#allocation5], %s3460_s29 }
 0x4a8   : > { %p4618_p7 = pnand %p4627_p5, %p6922_p6 }
 0x4aa   : > { %4957 = dma.done.wait (!%p4618_p7), %s3461_s12, 1152  }
 0x4ab   : > { %4959 = vsyncadd (!%p4618_p7), %s3461_s12, 4294966144  ;;  %s23_s12 = sadd.s32 1, %s6919_s16   ;;  %s6923_s13 = sld [smem:[#allocation14_spill]] }
 0x4ac   : > { %p20_p9 = scmp.ge.s32.totalorder %s23_s12, 8   ;;  %s6924_s29 = sld [smem:[#allocation21_spill]] }
 0x4ad   : > { %s6925_s30 = sld [smem:[#allocation15_spill]]  ;;  %s6926_s9 = sld [smem:[#allocation16_spill]] }
 0x4ae   : > { %s6927_s10 = sld [smem:[#allocation18_spill]]  ;;  %s6928_s11 = sld [smem:[#allocation19_spill]] }
 0x4af   : > { %s6929_s27 = smov %s4966_s28  ;;  %22 = sbr.rel (!%p20_p9) target bundleno = 7 (0x7), region = 111 }
 0x4b1   : > { %s6930_s28 = smov %s6923_s13 }
 0x4b6   :  { %3466 = vsyncpa [#allocation4], 1 }
 0x4b7   :  { %3468 = vsyncpa [#allocation4 + $0x1], 1 }
 0x4b8   :  { %3469 = vsyncpa [#allocation7], 1 }
 0x4b9   :  { %3470 = vsyncpa [#allocation5], 1 }
 0x4ba   :  { %3472 = vsyncpa [#allocation5 + $0x1], 1 }

</bundles_post_ra>
